<compile_context>
chip_gen: v7x
topology: tpu7x:2x2x1
jax: 0.10.0
libtpu: 0.0.40
codegen_flags: <defaults>
</compile_context>

<pallas_src>
import functools

import jax
import jax.numpy as jnp
from jax import lax
from jax.experimental import pallas as pl
from jax.experimental.pallas import tpu as pltpu  # noqa: F401  (kept for CompilerParams when scaling up)

# ---------------- small synthetic CLIP config ----------------
DIM = 32
TEXT_HEADS = 4
VIS_HEADS = 4
DIM_HEAD = DIM // TEXT_HEADS    # TODO(synk): x-transformers Encoder defaults dim_head=64; use dim//heads here.
TEXT_DEPTH = 2
VIS_DEPTH = 2
TEXT_SEQ = 8
VIS_SEQ = 16
NUM_TEXT_TOKENS = 50
NUM_VIS_TOKENS = 48
FF_MULT = 4
BATCH = 2
LN_EPS = 1e-5

_NEG_INF = -1e9
_ENC_NREFS = 16   # x, bias, pool + 13 parameter tensors per encoder


# ---------------- in-kernel helpers ----------------
def _layernorm(x, g, b):
    mu = jnp.mean(x, axis=-1, keepdims=True)
    xc = x - mu
    var = jnp.mean(xc * xc, axis=-1, keepdims=True)
    return xc * lax.rsqrt(var + LN_EPS) * g + b


def _encoder(refs, depth, heads, dh):
    """Run one transformer encoder entirely on in-VMEM values.

    refs = (x, bias, pool, ln1_g, ln1_b, wqkv, wo, bo, ln2_g, ln2_b,
            w1, b1, w2, b2, fin_g, fin_b).  Returns pooled latents (B, D).
    x is the batch-flattened (B*N, D) embedding (tokens + positions already
    added); bias is the (M, M) additive attention bias (key mask + block-diag
    batch structure); pool is the (B, M) normalized masked-mean matrix.
    """
    (x_ref, bias_ref, pool_ref,
     ln1_g_ref, ln1_b_ref, wqkv_ref, wo_ref, bo_ref,
     ln2_g_ref, ln2_b_ref, w1_ref, b1_ref, w2_ref, b2_ref,
     fin_g_ref, fin_b_ref) = refs

    M, D = x_ref.shape
    scale = dh ** -0.5

    x = x_ref[...]
    # Hoisted: broadcast the additive bias over heads ONCE (not per layer/head).
    bias = jnp.broadcast_to(bias_ref[...][None], (heads, M, M))

    for l in range(depth):                      # static unroll over layers
        # ---- attention block (pre-norm, residual) ----
        h = _layernorm(x, ln1_g_ref[l], ln1_b_ref[l])
        # Head-batched QKV projection: one batched matmul over a (3*heads) axis.
        hb = jnp.broadcast_to(h[None], (3 * heads, M, D))
        qkv = jnp.einsum('bmd,bdk->bmk', hb, wqkv_ref[l],
                         preferred_element_type=jnp.float32)     # (3*heads, M, dh)
        q = qkv[:heads]                                          # leading-axis slices
        k = qkv[heads:2 * heads]                                 # (no lane extracts)
        v = qkv[2 * heads:]

        s = jnp.einsum('hqd,hkd->hqk', q, k,
                       preferred_element_type=jnp.float32) * scale + bias
        s = s - jnp.max(s, axis=-1, keepdims=True)
        e = jnp.exp(s)
        p = e * pl.reciprocal(jnp.sum(e, axis=-1, keepdims=True), approx=True)
        o = jnp.einsum('hqk,hkd->hqd', p, v,
                       preferred_element_type=jnp.float32)       # (heads, M, dh)

        # Head re-packing folded into the output projection (no concat):
        # attn = sum_h  o_h @ wo[l, h]   with wo stored (depth, heads, dh, D).
        proj = jnp.einsum('hqd,hde->hqe', o, wo_ref[l],
                          preferred_element_type=jnp.float32)    # (heads, M, D)
        attn = proj[0]
        for hh in range(1, heads):
            attn = attn + proj[hh]
        x = x + attn + bo_ref[l]

        # ---- feed-forward block (pre-norm, residual) ----
        h = _layernorm(x, ln2_g_ref[l], ln2_b_ref[l])
        h = jnp.dot(h, w1_ref[l], preferred_element_type=jnp.float32) + b1_ref[l]
        h = jax.nn.gelu(h, approximate=True)     # TODO(synk): exact erf GELU per PyTorch default
        x = x + jnp.dot(h, w2_ref[l], preferred_element_type=jnp.float32) + b2_ref[l]

    xf = _layernorm(x, fin_g_ref[...], fin_b_ref[...])           # (M, D)
    # masked mean = one matmul with a precomputed, exactly-normalized pool matrix
    return jnp.dot(pool_ref[...], xf, preferred_element_type=jnp.float32)   # (B, D)


def _clip_kernel(sim_scale, *refs):
    """Whole CLIP forward: text encoder, image encoder, similarity. One call."""
    text_refs = refs[:_ENC_NREFS]
    vis_refs = refs[_ENC_NREFS:2 * _ENC_NREFS]
    out_ref = refs[2 * _ENC_NREFS]

    t_lat = _encoder(text_refs, TEXT_DEPTH, TEXT_HEADS, DIM_HEAD)   # (B, D)
    i_lat = _encoder(vis_refs, VIS_DEPTH, VIS_HEADS, DIM_HEAD)      # (B, D)

    # einsum('i d, j d -> i j') * scale, latents never leave VMEM.
    sim = lax.dot_general(t_lat, i_lat, (((1,), (1,)), ((), ())),
                          preferred_element_type=jnp.float32) * sim_scale
    out_ref[...] = sim.astype(out_ref.dtype)


# ---------------- JAX-side glue ----------------
def _mask_to_bias_pool(mask):
    """mask: (B, N) float {0,1}.  Returns additive attention bias (M, M) with
    block-diagonal batch structure + key masking, and the normalized
    masked-mean pooling matrix (B, M), with M = B*N."""
    B, N = mask.shape
    M = B * N
    batch_id = jnp.repeat(jnp.arange(B), N)
    same_batch = batch_id[:, None] == batch_id[None, :]
    key_ok = (mask.reshape(M) > 0.5)[None, :]
    bias = jnp.where(same_batch & key_ok, 0.0, _NEG_INF).astype(jnp.float32)

    pool_rows = mask / jnp.maximum(mask.sum(axis=1, keepdims=True), 1.0)    # (B, N)
    pool = (jnp.eye(B, dtype=jnp.float32)[:, :, None]
            * pool_rows[None, :, :]).reshape(B, M)
    return bias, pool


def _enc_args(p, x, bias, pool):
    return (x, bias, pool,
            p['ln1_g'], p['ln1_b'], p['wqkv'], p['wo'], p['bo'],
            p['ln2_g'], p['ln2_b'], p['w1'], p['b1'], p['w2'], p['b2'],
            p['final_g'], p['final_b'])


@jax.jit
def clip_forward(params, text, image, text_mask):
    B, Nt = text.shape
    _, Nv = image.shape

    # token-embedding gathers + positional add stay in plain JAX (data-dependent gather = glue)
    text_x = (jnp.take(params['text_emb'], text, axis=0)
              + params['text_pos'][None, :Nt]).reshape(B * Nt, DIM)
    img_x = (jnp.take(params['vis_emb'], image, axis=0)
             + params['vis_pos'][None, :Nv]).reshape(B * Nv, DIM)

    bias_t, pool_t = _mask_to_bias_pool(text_mask.astype(jnp.float32))
    bias_v, pool_v = _mask_to_bias_pool(jnp.ones((B, Nv), jnp.float32))

    args = (_enc_args(params['text_tr'], text_x, bias_t, pool_t)
            + _enc_args(params['vis_tr'], img_x, bias_v, pool_v))

    kernel = functools.partial(_clip_kernel, DIM ** -0.5)
    # grid=() (single invocation); every operand is a whole-array VMEM block,
    # so nothing is double-buffered and no per-step writeback occurs.
    return pl.pallas_call(
        kernel,
        out_shape=jax.ShapeDtypeStruct((B, B), jnp.float32),
    )(*args)


# ---------------- deterministic parameter init ----------------
def init_params(key):
    keys = iter(jax.random.split(key, 64))

    def nrm(shape, std=0.02):
        return jax.random.normal(next(keys), shape, dtype=jnp.float32) * std

    def make_encoder(depth, heads):
        dh = DIM_HEAD
        ff = DIM * FF_MULT
        return dict(
            ln1_g=jnp.ones((depth, 1, DIM), jnp.float32),
            ln1_b=jnp.zeros((depth, 1, DIM), jnp.float32),
            # q/k/v per-head weights stacked on a leading (3*heads) batch axis:
            # [q_h0..q_h(H-1), k_h0..k_h(H-1), v_h0..v_h(H-1)], each (DIM, dh).
            wqkv=nrm((depth, 3 * heads, DIM, dh)),
            # per-head output projection (heads, dh, DIM) -> folds the concat away
            wo=nrm((depth, heads, dh, DIM)),
            bo=jnp.zeros((depth, 1, DIM), jnp.float32),
            ln2_g=jnp.ones((depth, 1, DIM), jnp.float32),
            ln2_b=jnp.zeros((depth, 1, DIM), jnp.float32),
            w1=nrm((depth, DIM, ff)),
            b1=jnp.zeros((depth, 1, ff), jnp.float32),
            w2=nrm((depth, ff, DIM)),
            b2=jnp.zeros((depth, 1, DIM), jnp.float32),
            final_g=jnp.ones((1, DIM), jnp.float32),
            final_b=jnp.zeros((1, DIM), jnp.float32),
        )

    return dict(
        text_emb=nrm((NUM_TEXT_TOKENS, DIM)),
        vis_emb=nrm((NUM_VIS_TOKENS, DIM)),
        text_pos=nrm((TEXT_SEQ, DIM)),
        vis_pos=nrm((VIS_SEQ, DIM)),
        text_tr=make_encoder(TEXT_DEPTH, TEXT_HEADS),
        vis_tr=make_encoder(VIS_DEPTH, VIS_HEADS),
    )


if __name__ == "__main__":
    key = jax.random.PRNGKey(0)
    kp, kt, ki = jax.random.split(key, 3)
    params = init_params(kp)

    text = jax.random.randint(kt, (BATCH, TEXT_SEQ), 0, NUM_TEXT_TOKENS, dtype=jnp.int32)
    image = jax.random.randint(ki, (BATCH, VIS_SEQ), 0, NUM_VIS_TOKENS, dtype=jnp.int32)
    lengths = jnp.array([TEXT_SEQ, 5], dtype=jnp.int32)
    text_mask = jnp.arange(TEXT_SEQ)[None, :] < lengths[:, None]   # (B, TEXT_SEQ) bool

    sim = clip_forward(params, text, image, text_mask)
    sim = jax.block_until_ready(sim)
    assert sim.shape == (BATCH, BATCH) and sim.dtype == jnp.float32
    # TODO(synk): return_loss=True path (cross-entropy over sim) not implemented in-kernel.
    print("KERNEL_OK")
</pallas_src>

<mosaic_0001>
module attributes {stable_mosaic.version = 11 : i64} {
  func.func @_clip_kernel(%arg0: memref<16x32xf32, #tpu.memory_space<vmem>>, %arg1: memref<16x16xf32, #tpu.memory_space<vmem>>, %arg2: memref<2x16xf32, #tpu.memory_space<vmem>>, %arg3: memref<2x1x32xf32, #tpu.memory_space<vmem>>, %arg4: memref<2x1x32xf32, #tpu.memory_space<vmem>>, %arg5: memref<2x12x32x8xf32, #tpu.memory_space<vmem>>, %arg6: memref<2x4x8x32xf32, #tpu.memory_space<vmem>>, %arg7: memref<2x1x32xf32, #tpu.memory_space<vmem>>, %arg8: memref<2x1x32xf32, #tpu.memory_space<vmem>>, %arg9: memref<2x1x32xf32, #tpu.memory_space<vmem>>, %arg10: memref<2x32x128xf32, #tpu.memory_space<vmem>>, %arg11: memref<2x1x128xf32, #tpu.memory_space<vmem>>, %arg12: memref<2x128x32xf32, #tpu.memory_space<vmem>>, %arg13: memref<2x1x32xf32, #tpu.memory_space<vmem>>, %arg14: memref<1x32xf32, #tpu.memory_space<vmem>>, %arg15: memref<1x32xf32, #tpu.memory_space<vmem>>, %arg16: memref<32x32xf32, #tpu.memory_space<vmem>>, %arg17: memref<32x32xf32, #tpu.memory_space<vmem>>, %arg18: memref<2x32xf32, #tpu.memory_space<vmem>>, %arg19: memref<2x1x32xf32, #tpu.memory_space<vmem>>, %arg20: memref<2x1x32xf32, #tpu.memory_space<vmem>>, %arg21: memref<2x12x32x8xf32, #tpu.memory_space<vmem>>, %arg22: memref<2x4x8x32xf32, #tpu.memory_space<vmem>>, %arg23: memref<2x1x32xf32, #tpu.memory_space<vmem>>, %arg24: memref<2x1x32xf32, #tpu.memory_space<vmem>>, %arg25: memref<2x1x32xf32, #tpu.memory_space<vmem>>, %arg26: memref<2x32x128xf32, #tpu.memory_space<vmem>>, %arg27: memref<2x1x128xf32, #tpu.memory_space<vmem>>, %arg28: memref<2x128x32xf32, #tpu.memory_space<vmem>>, %arg29: memref<2x1x32xf32, #tpu.memory_space<vmem>>, %arg30: memref<1x32xf32, #tpu.memory_space<vmem>>, %arg31: memref<1x32xf32, #tpu.memory_space<vmem>>, %arg32: memref<2x2xf32, #tpu.memory_space<vmem>>) attributes {dimension_semantics = [], scalar_prefetch = 0 : i64, scratch_operands = 0 : i64, tpu.core_type = #tpu.core_type<tc>} {
    %c0 = arith.constant 0 : index
    %c0_0 = arith.constant 0 : index
    %0 = vector.load %arg0[%c0, %c0_0] : memref<16x32xf32, #tpu.memory_space<vmem>>, vector<16x32xf32>
    %c0_1 = arith.constant 0 : index
    %c0_2 = arith.constant 0 : index
    %1 = vector.load %arg1[%c0_1, %c0_2] : memref<16x16xf32, #tpu.memory_space<vmem>>, vector<16x16xf32>
    %2 = vector.shape_cast %1 : vector<16x16xf32> to vector<1x16x16xf32>
    %3 = vector.shape_cast %2 : vector<1x16x16xf32> to vector<1x16x16xf32>
    %4 = vector.broadcast %3 : vector<1x16x16xf32> to vector<4x16x16xf32>
    %c0_3 = arith.constant 0 : index
    %c0_4 = arith.constant 0 : index
    %c0_5 = arith.constant 0 : index
    %5 = vector.load %arg3[%c0_3, %c0_4, %c0_5] : memref<2x1x32xf32, #tpu.memory_space<vmem>>, vector<1x1x32xf32>
    %6 = vector.shape_cast %5 : vector<1x1x32xf32> to vector<1x32xf32>
    %c0_6 = arith.constant 0 : index
    %c0_7 = arith.constant 0 : index
    %c0_8 = arith.constant 0 : index
    %7 = vector.load %arg4[%c0_6, %c0_7, %c0_8] : memref<2x1x32xf32, #tpu.memory_space<vmem>>, vector<1x1x32xf32>
    %8 = vector.shape_cast %7 : vector<1x1x32xf32> to vector<1x32xf32>
    %cst = arith.constant dense<0.000000e+00> : vector<16xf32>
    %9 = vector.multi_reduction <add>, %0, %cst [1] : vector<16x32xf32> to vector<16xf32>
    %10 = vector.shape_cast %9 : vector<16xf32> to vector<16x1xf32>
    %cst_9 = arith.constant 3.200000e+01 : f32
    %11 = vector.broadcast %cst_9 : f32 to vector<16x1xf32>
    %12 = arith.divf %10, %11 : vector<16x1xf32>
    %13 = vector.broadcast %12 : vector<16x1xf32> to vector<16x32xf32>
    %14 = arith.subf %0, %13 : vector<16x32xf32>
    %15 = arith.mulf %14, %14 : vector<16x32xf32>
    %cst_10 = arith.constant dense<0.000000e+00> : vector<16xf32>
    %16 = vector.multi_reduction <add>, %15, %cst_10 [1] : vector<16x32xf32> to vector<16xf32>
    %17 = vector.shape_cast %16 : vector<16xf32> to vector<16x1xf32>
    %cst_11 = arith.constant 3.200000e+01 : f32
    %18 = vector.broadcast %cst_11 : f32 to vector<16x1xf32>
    %19 = arith.divf %17, %18 : vector<16x1xf32>
    %cst_12 = arith.constant 9.99999974E-6 : f32
    %20 = vector.broadcast %cst_12 : f32 to vector<16x1xf32>
    %21 = arith.addf %19, %20 : vector<16x1xf32>
    %22 = math.rsqrt %21 : vector<16x1xf32>
    %23 = vector.broadcast %22 : vector<16x1xf32> to vector<16x32xf32>
    %24 = arith.mulf %14, %23 : vector<16x32xf32>
    %25 = vector.broadcast %6 : vector<1x32xf32> to vector<16x32xf32>
    %26 = arith.mulf %24, %25 : vector<16x32xf32>
    %27 = vector.broadcast %8 : vector<1x32xf32> to vector<16x32xf32>
    %28 = arith.addf %26, %27 : vector<16x32xf32>
    %29 = vector.shape_cast %28 : vector<16x32xf32> to vector<1x16x32xf32>
    %30 = vector.shape_cast %29 : vector<1x16x32xf32> to vector<1x16x32xf32>
    %31 = vector.broadcast %30 : vector<1x16x32xf32> to vector<12x16x32xf32>
    %c0_13 = arith.constant 0 : index
    %c0_14 = arith.constant 0 : index
    %c0_15 = arith.constant 0 : index
    %c0_16 = arith.constant 0 : index
    %32 = vector.load %arg5[%c0_13, %c0_14, %c0_15, %c0_16] : memref<2x12x32x8xf32, #tpu.memory_space<vmem>>, vector<1x12x32x8xf32>
    %33 = vector.shape_cast %32 : vector<1x12x32x8xf32> to vector<12x32x8xf32>
    "tpu.trace_start"() <{level = 10 : i32, message = "bmd,bdk->bmk"}> : () -> ()
    %cst_17 = arith.constant dense<0.000000e+00> : vector<12x16x8xf32>
    %34 = tpu.matmul %31, %33, %cst_17 {dimension_numbers = #tpu.dot_dimension_numbers<[2], [1], [1], [2], [0, 0, 0, 1, 1, 2], [0], [0]>} : vector<12x16x32xf32>, vector<12x32x8xf32>, vector<12x16x8xf32> -> vector<12x16x8xf32>
    "tpu.trace_stop"() : () -> ()
    %35 = vector.extract_strided_slice %34 {offsets = [0, 0, 0], sizes = [4, 16, 8], strides = [1, 1, 1]} : vector<12x16x8xf32> to vector<4x16x8xf32>
    %36 = vector.extract_strided_slice %34 {offsets = [4, 0, 0], sizes = [4, 16, 8], strides = [1, 1, 1]} : vector<12x16x8xf32> to vector<4x16x8xf32>
    %37 = vector.extract_strided_slice %34 {offsets = [8, 0, 0], sizes = [4, 16, 8], strides = [1, 1, 1]} : vector<12x16x8xf32> to vector<4x16x8xf32>
    "tpu.trace_start"() <{level = 10 : i32, message = "hqd,hkd->hqk"}> : () -> ()
    %cst_18 = arith.constant dense<0.000000e+00> : vector<4x16x16xf32>
    %38 = tpu.matmul %35, %36, %cst_18 {dimension_numbers = #tpu.dot_dimension_numbers<[2], [2], [1], [1], [0, 0, 0, 1, 1, 1], [0], [0]>} : vector<4x16x8xf32>, vector<4x16x8xf32>, vector<4x16x16xf32> -> vector<4x16x16xf32>
    "tpu.trace_stop"() : () -> ()
    %cst_19 = arith.constant 0.353553385 : f32
    %39 = vector.broadcast %cst_19 : f32 to vector<4x16x16xf32>
    %40 = arith.mulf %38, %39 : vector<4x16x16xf32>
    %41 = arith.addf %40, %4 : vector<4x16x16xf32>
    %cst_20 = arith.constant dense<0xFF800000> : vector<4x16xf32>
    %42 = vector.multi_reduction <maximumf>, %41, %cst_20 [2] : vector<4x16x16xf32> to vector<4x16xf32>
    %43 = vector.shape_cast %42 : vector<4x16xf32> to vector<4x16x1xf32>
    %44 = vector.broadcast %43 : vector<4x16x1xf32> to vector<4x16x16xf32>
    %45 = arith.subf %41, %44 : vector<4x16x16xf32>
    %46 = math.exp %45 : vector<4x16x16xf32>
    %cst_21 = arith.constant dense<0.000000e+00> : vector<4x16xf32>
    %47 = vector.multi_reduction <add>, %46, %cst_21 [2] : vector<4x16x16xf32> to vector<4x16xf32>
    %48 = vector.shape_cast %47 : vector<4x16xf32> to vector<4x16x1xf32>
    %49 = tpu.reciprocal %48 {approx = true} : vector<4x16x1xf32> -> vector<4x16x1xf32>
    %50 = vector.broadcast %49 : vector<4x16x1xf32> to vector<4x16x16xf32>
    %51 = arith.mulf %46, %50 : vector<4x16x16xf32>
    "tpu.trace_start"() <{level = 10 : i32, message = "hqk,hkd->hqd"}> : () -> ()
    %cst_22 = arith.constant dense<0.000000e+00> : vector<4x16x8xf32>
    %52 = tpu.matmul %51, %37, %cst_22 {dimension_numbers = #tpu.dot_dimension_numbers<[2], [1], [1], [2], [0, 0, 0, 1, 1, 2], [0], [0]>} : vector<4x16x16xf32>, vector<4x16x8xf32>, vector<4x16x8xf32> -> vector<4x16x8xf32>
    "tpu.trace_stop"() : () -> ()
    %c0_23 = arith.constant 0 : index
    %c0_24 = arith.constant 0 : index
    %c0_25 = arith.constant 0 : index
    %c0_26 = arith.constant 0 : index
    %53 = vector.load %arg6[%c0_23, %c0_24, %c0_25, %c0_26] : memref<2x4x8x32xf32, #tpu.memory_space<vmem>>, vector<1x4x8x32xf32>
    %54 = vector.shape_cast %53 : vector<1x4x8x32xf32> to vector<4x8x32xf32>
    "tpu.trace_start"() <{level = 10 : i32, message = "hqd,hde->hqe"}> : () -> ()
    %cst_27 = arith.constant dense<0.000000e+00> : vector<4x16x32xf32>
    %55 = tpu.matmul %52, %54, %cst_27 {dimension_numbers = #tpu.dot_dimension_numbers<[2], [1], [1], [2], [0, 0, 0, 1, 1, 2], [0], [0]>} : vector<4x16x8xf32>, vector<4x8x32xf32>, vector<4x16x32xf32> -> vector<4x16x32xf32>
    "tpu.trace_stop"() : () -> ()
    %56 = vector.extract_strided_slice %55 {offsets = [0, 0, 0], sizes = [1, 16, 32], strides = [1, 1, 1]} : vector<4x16x32xf32> to vector<1x16x32xf32>
    %57 = vector.shape_cast %56 : vector<1x16x32xf32> to vector<16x32xf32>
    %58 = vector.extract_strided_slice %55 {offsets = [1, 0, 0], sizes = [1, 16, 32], strides = [1, 1, 1]} : vector<4x16x32xf32> to vector<1x16x32xf32>
    %59 = vector.shape_cast %58 : vector<1x16x32xf32> to vector<16x32xf32>
    %60 = arith.addf %57, %59 : vector<16x32xf32>
    %61 = vector.extract_strided_slice %55 {offsets = [2, 0, 0], sizes = [1, 16, 32], strides = [1, 1, 1]} : vector<4x16x32xf32> to vector<1x16x32xf32>
    %62 = vector.shape_cast %61 : vector<1x16x32xf32> to vector<16x32xf32>
    %63 = arith.addf %60, %62 : vector<16x32xf32>
    %64 = vector.extract_strided_slice %55 {offsets = [3, 0, 0], sizes = [1, 16, 32], strides = [1, 1, 1]} : vector<4x16x32xf32> to vector<1x16x32xf32>
    %65 = vector.shape_cast %64 : vector<1x16x32xf32> to vector<16x32xf32>
    %66 = arith.addf %63, %65 : vector<16x32xf32>
    %67 = arith.addf %0, %66 : vector<16x32xf32>
    %c0_28 = arith.constant 0 : index
    %c0_29 = arith.constant 0 : index
    %c0_30 = arith.constant 0 : index
    %68 = vector.load %arg7[%c0_28, %c0_29, %c0_30] : memref<2x1x32xf32, #tpu.memory_space<vmem>>, vector<1x1x32xf32>
    %69 = vector.shape_cast %68 : vector<1x1x32xf32> to vector<1x32xf32>
    %70 = vector.broadcast %69 : vector<1x32xf32> to vector<16x32xf32>
    %71 = arith.addf %67, %70 : vector<16x32xf32>
    %c0_31 = arith.constant 0 : index
    %c0_32 = arith.constant 0 : index
    %c0_33 = arith.constant 0 : index
    %72 = vector.load %arg8[%c0_31, %c0_32, %c0_33] : memref<2x1x32xf32, #tpu.memory_space<vmem>>, vector<1x1x32xf32>
    %73 = vector.shape_cast %72 : vector<1x1x32xf32> to vector<1x32xf32>
    %c0_34 = arith.constant 0 : index
    %c0_35 = arith.constant 0 : index
    %c0_36 = arith.constant 0 : index
    %74 = vector.load %arg9[%c0_34, %c0_35, %c0_36] : memref<2x1x32xf32, #tpu.memory_space<vmem>>, vector<1x1x32xf32>
    %75 = vector.shape_cast %74 : vector<1x1x32xf32> to vector<1x32xf32>
    %cst_37 = arith.constant dense<0.000000e+00> : vector<16xf32>
    %76 = vector.multi_reduction <add>, %71, %cst_37 [1] : vector<16x32xf32> to vector<16xf32>
    %77 = vector.shape_cast %76 : vector<16xf32> to vector<16x1xf32>
    %cst_38 = arith.constant 3.200000e+01 : f32
    %78 = vector.broadcast %cst_38 : f32 to vector<16x1xf32>
    %79 = arith.divf %77, %78 : vector<16x1xf32>
    %80 = vector.broadcast %79 : vector<16x1xf32> to vector<16x32xf32>
    %81 = arith.subf %71, %80 : vector<16x32xf32>
    %82 = arith.mulf %81, %81 : vector<16x32xf32>
    %cst_39 = arith.constant dense<0.000000e+00> : vector<16xf32>
    %83 = vector.multi_reduction <add>, %82, %cst_39 [1] : vector<16x32xf32> to vector<16xf32>
    %84 = vector.shape_cast %83 : vector<16xf32> to vector<16x1xf32>
    %cst_40 = arith.constant 3.200000e+01 : f32
    %85 = vector.broadcast %cst_40 : f32 to vector<16x1xf32>
    %86 = arith.divf %84, %85 : vector<16x1xf32>
    %cst_41 = arith.constant 9.99999974E-6 : f32
    %87 = vector.broadcast %cst_41 : f32 to vector<16x1xf32>
    %88 = arith.addf %86, %87 : vector<16x1xf32>
    %89 = math.rsqrt %88 : vector<16x1xf32>
    %90 = vector.broadcast %89 : vector<16x1xf32> to vector<16x32xf32>
    %91 = arith.mulf %81, %90 : vector<16x32xf32>
    %92 = vector.broadcast %73 : vector<1x32xf32> to vector<16x32xf32>
    %93 = arith.mulf %91, %92 : vector<16x32xf32>
    %94 = vector.broadcast %75 : vector<1x32xf32> to vector<16x32xf32>
    %95 = arith.addf %93, %94 : vector<16x32xf32>
    %c0_42 = arith.constant 0 : index
    %c0_43 = arith.constant 0 : index
    %c0_44 = arith.constant 0 : index
    %96 = vector.load %arg10[%c0_42, %c0_43, %c0_44] : memref<2x32x128xf32, #tpu.memory_space<vmem>>, vector<1x32x128xf32>
    %97 = vector.shape_cast %96 : vector<1x32x128xf32> to vector<32x128xf32>
    %cst_45 = arith.constant dense<0.000000e+00> : vector<16x128xf32>
    %98 = tpu.matmul %95, %97, %cst_45 {dimension_numbers = #tpu.dot_dimension_numbers<[1], [0], [0], [1], [0, 0, 1, 1], [], []>} : vector<16x32xf32>, vector<32x128xf32>, vector<16x128xf32> -> vector<16x128xf32>
    %c0_46 = arith.constant 0 : index
    %c0_47 = arith.constant 0 : index
    %c0_48 = arith.constant 0 : index
    %99 = vector.load %arg11[%c0_46, %c0_47, %c0_48] : memref<2x1x128xf32, #tpu.memory_space<vmem>>, vector<1x1x128xf32>
    %100 = vector.shape_cast %99 : vector<1x1x128xf32> to vector<1x128xf32>
    %101 = vector.broadcast %100 : vector<1x128xf32> to vector<16x128xf32>
    %102 = arith.addf %98, %101 : vector<16x128xf32>
    %103 = arith.mulf %102, %102 : vector<16x128xf32>
    %104 = arith.mulf %102, %103 : vector<16x128xf32>
    %cst_49 = arith.constant 4.471500e-02 : f32
    %105 = vector.broadcast %cst_49 : f32 to vector<16x128xf32>
    %106 = arith.mulf %105, %104 : vector<16x128xf32>
    %107 = arith.addf %102, %106 : vector<16x128xf32>
    %cst_50 = arith.constant 0.797884583 : f32
    %108 = vector.broadcast %cst_50 : f32 to vector<16x128xf32>
    %109 = arith.mulf %108, %107 : vector<16x128xf32>
    %110 = math.tanh %109 : vector<16x128xf32>
    %cst_51 = arith.constant 1.000000e+00 : f32
    %111 = vector.broadcast %cst_51 : f32 to vector<16x128xf32>
    %112 = arith.addf %111, %110 : vector<16x128xf32>
    %cst_52 = arith.constant 5.000000e-01 : f32
    %113 = vector.broadcast %cst_52 : f32 to vector<16x128xf32>
    %114 = arith.mulf %113, %112 : vector<16x128xf32>
    %115 = arith.mulf %102, %114 : vector<16x128xf32>
    %c0_53 = arith.constant 0 : index
    %c0_54 = arith.constant 0 : index
    %c0_55 = arith.constant 0 : index
    %116 = vector.load %arg12[%c0_53, %c0_54, %c0_55] : memref<2x128x32xf32, #tpu.memory_space<vmem>>, vector<1x128x32xf32>
    %117 = vector.shape_cast %116 : vector<1x128x32xf32> to vector<128x32xf32>
    %cst_56 = arith.constant dense<0.000000e+00> : vector<16x32xf32>
    %118 = tpu.matmul %115, %117, %cst_56 {dimension_numbers = #tpu.dot_dimension_numbers<[1], [0], [0], [1], [0, 0, 1, 1], [], []>} : vector<16x128xf32>, vector<128x32xf32>, vector<16x32xf32> -> vector<16x32xf32>
    %119 = arith.addf %71, %118 : vector<16x32xf32>
    %c0_57 = arith.constant 0 : index
    %c0_58 = arith.constant 0 : index
    %c0_59 = arith.constant 0 : index
    %120 = vector.load %arg13[%c0_57, %c0_58, %c0_59] : memref<2x1x32xf32, #tpu.memory_space<vmem>>, vector<1x1x32xf32>
    %121 = vector.shape_cast %120 : vector<1x1x32xf32> to vector<1x32xf32>
    %122 = vector.broadcast %121 : vector<1x32xf32> to vector<16x32xf32>
    %123 = arith.addf %119, %122 : vector<16x32xf32>
    %c1 = arith.constant 1 : index
    %c0_60 = arith.constant 0 : index
    %c0_61 = arith.constant 0 : index
    %124 = vector.load %arg3[%c1, %c0_60, %c0_61] : memref<2x1x32xf32, #tpu.memory_space<vmem>>, vector<1x1x32xf32>
    %125 = vector.shape_cast %124 : vector<1x1x32xf32> to vector<1x32xf32>
    %c1_62 = arith.constant 1 : index
    %c0_63 = arith.constant 0 : index
    %c0_64 = arith.constant 0 : index
    %126 = vector.load %arg4[%c1_62, %c0_63, %c0_64] : memref<2x1x32xf32, #tpu.memory_space<vmem>>, vector<1x1x32xf32>
    %127 = vector.shape_cast %126 : vector<1x1x32xf32> to vector<1x32xf32>
    %cst_65 = arith.constant dense<0.000000e+00> : vector<16xf32>
    %128 = vector.multi_reduction <add>, %123, %cst_65 [1] : vector<16x32xf32> to vector<16xf32>
    %129 = vector.shape_cast %128 : vector<16xf32> to vector<16x1xf32>
    %cst_66 = arith.constant 3.200000e+01 : f32
    %130 = vector.broadcast %cst_66 : f32 to vector<16x1xf32>
    %131 = arith.divf %129, %130 : vector<16x1xf32>
    %132 = vector.broadcast %131 : vector<16x1xf32> to vector<16x32xf32>
    %133 = arith.subf %123, %132 : vector<16x32xf32>
    %134 = arith.mulf %133, %133 : vector<16x32xf32>
    %cst_67 = arith.constant dense<0.000000e+00> : vector<16xf32>
    %135 = vector.multi_reduction <add>, %134, %cst_67 [1] : vector<16x32xf32> to vector<16xf32>
    %136 = vector.shape_cast %135 : vector<16xf32> to vector<16x1xf32>
    %cst_68 = arith.constant 3.200000e+01 : f32
    %137 = vector.broadcast %cst_68 : f32 to vector<16x1xf32>
    %138 = arith.divf %136, %137 : vector<16x1xf32>
    %cst_69 = arith.constant 9.99999974E-6 : f32
    %139 = vector.broadcast %cst_69 : f32 to vector<16x1xf32>
    %140 = arith.addf %138, %139 : vector<16x1xf32>
    %141 = math.rsqrt %140 : vector<16x1xf32>
    %142 = vector.broadcast %141 : vector<16x1xf32> to vector<16x32xf32>
    %143 = arith.mulf %133, %142 : vector<16x32xf32>
    %144 = vector.broadcast %125 : vector<1x32xf32> to vector<16x32xf32>
    %145 = arith.mulf %143, %144 : vector<16x32xf32>
    %146 = vector.broadcast %127 : vector<1x32xf32> to vector<16x32xf32>
    %147 = arith.addf %145, %146 : vector<16x32xf32>
    %148 = vector.shape_cast %147 : vector<16x32xf32> to vector<1x16x32xf32>
    %149 = vector.shape_cast %148 : vector<1x16x32xf32> to vector<1x16x32xf32>
    %150 = vector.broadcast %149 : vector<1x16x32xf32> to vector<12x16x32xf32>
    %c1_70 = arith.constant 1 : index
    %c0_71 = arith.constant 0 : index
    %c0_72 = arith.constant 0 : index
    %c0_73 = arith.constant 0 : index
    %151 = vector.load %arg5[%c1_70, %c0_71, %c0_72, %c0_73] : memref<2x12x32x8xf32, #tpu.memory_space<vmem>>, vector<1x12x32x8xf32>
    %152 = vector.shape_cast %151 : vector<1x12x32x8xf32> to vector<12x32x8xf32>
    "tpu.trace_start"() <{level = 10 : i32, message = "bmd,bdk->bmk"}> : () -> ()
    %cst_74 = arith.constant dense<0.000000e+00> : vector<12x16x8xf32>
    %153 = tpu.matmul %150, %152, %cst_74 {dimension_numbers = #tpu.dot_dimension_numbers<[2], [1], [1], [2], [0, 0, 0, 1, 1, 2], [0], [0]>} : vector<12x16x32xf32>, vector<12x32x8xf32>, vector<12x16x8xf32> -> vector<12x16x8xf32>
    "tpu.trace_stop"() : () -> ()
    %154 = vector.extract_strided_slice %153 {offsets = [0, 0, 0], sizes = [4, 16, 8], strides = [1, 1, 1]} : vector<12x16x8xf32> to vector<4x16x8xf32>
    %155 = vector.extract_strided_slice %153 {offsets = [4, 0, 0], sizes = [4, 16, 8], strides = [1, 1, 1]} : vector<12x16x8xf32> to vector<4x16x8xf32>
    %156 = vector.extract_strided_slice %153 {offsets = [8, 0, 0], sizes = [4, 16, 8], strides = [1, 1, 1]} : vector<12x16x8xf32> to vector<4x16x8xf32>
    "tpu.trace_start"() <{level = 10 : i32, message = "hqd,hkd->hqk"}> : () -> ()
    %cst_75 = arith.constant dense<0.000000e+00> : vector<4x16x16xf32>
    %157 = tpu.matmul %154, %155, %cst_75 {dimension_numbers = #tpu.dot_dimension_numbers<[2], [2], [1], [1], [0, 0, 0, 1, 1, 1], [0], [0]>} : vector<4x16x8xf32>, vector<4x16x8xf32>, vector<4x16x16xf32> -> vector<4x16x16xf32>
    "tpu.trace_stop"() : () -> ()
    %cst_76 = arith.constant 0.353553385 : f32
    %158 = vector.broadcast %cst_76 : f32 to vector<4x16x16xf32>
    %159 = arith.mulf %157, %158 : vector<4x16x16xf32>
    %160 = arith.addf %159, %4 : vector<4x16x16xf32>
    %cst_77 = arith.constant dense<0xFF800000> : vector<4x16xf32>
    %161 = vector.multi_reduction <maximumf>, %160, %cst_77 [2] : vector<4x16x16xf32> to vector<4x16xf32>
    %162 = vector.shape_cast %161 : vector<4x16xf32> to vector<4x16x1xf32>
    %163 = vector.broadcast %162 : vector<4x16x1xf32> to vector<4x16x16xf32>
    %164 = arith.subf %160, %163 : vector<4x16x16xf32>
    %165 = math.exp %164 : vector<4x16x16xf32>
    %cst_78 = arith.constant dense<0.000000e+00> : vector<4x16xf32>
    %166 = vector.multi_reduction <add>, %165, %cst_78 [2] : vector<4x16x16xf32> to vector<4x16xf32>
    %167 = vector.shape_cast %166 : vector<4x16xf32> to vector<4x16x1xf32>
    %168 = tpu.reciprocal %167 {approx = true} : vector<4x16x1xf32> -> vector<4x16x1xf32>
    %169 = vector.broadcast %168 : vector<4x16x1xf32> to vector<4x16x16xf32>
    %170 = arith.mulf %165, %169 : vector<4x16x16xf32>
    "tpu.trace_start"() <{level = 10 : i32, message = "hqk,hkd->hqd"}> : () -> ()
    %cst_79 = arith.constant dense<0.000000e+00> : vector<4x16x8xf32>
    %171 = tpu.matmul %170, %156, %cst_79 {dimension_numbers = #tpu.dot_dimension_numbers<[2], [1], [1], [2], [0, 0, 0, 1, 1, 2], [0], [0]>} : vector<4x16x16xf32>, vector<4x16x8xf32>, vector<4x16x8xf32> -> vector<4x16x8xf32>
    "tpu.trace_stop"() : () -> ()
    %c1_80 = arith.constant 1 : index
    %c0_81 = arith.constant 0 : index
    %c0_82 = arith.constant 0 : index
    %c0_83 = arith.constant 0 : index
    %172 = vector.load %arg6[%c1_80, %c0_81, %c0_82, %c0_83] : memref<2x4x8x32xf32, #tpu.memory_space<vmem>>, vector<1x4x8x32xf32>
    %173 = vector.shape_cast %172 : vector<1x4x8x32xf32> to vector<4x8x32xf32>
    "tpu.trace_start"() <{level = 10 : i32, message = "hqd,hde->hqe"}> : () -> ()
    %cst_84 = arith.constant dense<0.000000e+00> : vector<4x16x32xf32>
    %174 = tpu.matmul %171, %173, %cst_84 {dimension_numbers = #tpu.dot_dimension_numbers<[2], [1], [1], [2], [0, 0, 0, 1, 1, 2], [0], [0]>} : vector<4x16x8xf32>, vector<4x8x32xf32>, vector<4x16x32xf32> -> vector<4x16x32xf32>
    "tpu.trace_stop"() : () -> ()
    %175 = vector.extract_strided_slice %174 {offsets = [0, 0, 0], sizes = [1, 16, 32], strides = [1, 1, 1]} : vector<4x16x32xf32> to vector<1x16x32xf32>
    %176 = vector.shape_cast %175 : vector<1x16x32xf32> to vector<16x32xf32>
    %177 = vector.extract_strided_slice %174 {offsets = [1, 0, 0], sizes = [1, 16, 32], strides = [1, 1, 1]} : vector<4x16x32xf32> to vector<1x16x32xf32>
    %178 = vector.shape_cast %177 : vector<1x16x32xf32> to vector<16x32xf32>
    %179 = arith.addf %176, %178 : vector<16x32xf32>
    %180 = vector.extract_strided_slice %174 {offsets = [2, 0, 0], sizes = [1, 16, 32], strides = [1, 1, 1]} : vector<4x16x32xf32> to vector<1x16x32xf32>
    %181 = vector.shape_cast %180 : vector<1x16x32xf32> to vector<16x32xf32>
    %182 = arith.addf %179, %181 : vector<16x32xf32>
    %183 = vector.extract_strided_slice %174 {offsets = [3, 0, 0], sizes = [1, 16, 32], strides = [1, 1, 1]} : vector<4x16x32xf32> to vector<1x16x32xf32>
    %184 = vector.shape_cast %183 : vector<1x16x32xf32> to vector<16x32xf32>
    %185 = arith.addf %182, %184 : vector<16x32xf32>
    %186 = arith.addf %123, %185 : vector<16x32xf32>
    %c1_85 = arith.constant 1 : index
    %c0_86 = arith.constant 0 : index
    %c0_87 = arith.constant 0 : index
    %187 = vector.load %arg7[%c1_85, %c0_86, %c0_87] : memref<2x1x32xf32, #tpu.memory_space<vmem>>, vector<1x1x32xf32>
    %188 = vector.shape_cast %187 : vector<1x1x32xf32> to vector<1x32xf32>
    %189 = vector.broadcast %188 : vector<1x32xf32> to vector<16x32xf32>
    %190 = arith.addf %186, %189 : vector<16x32xf32>
    %c1_88 = arith.constant 1 : index
    %c0_89 = arith.constant 0 : index
    %c0_90 = arith.constant 0 : index
    %191 = vector.load %arg8[%c1_88, %c0_89, %c0_90] : memref<2x1x32xf32, #tpu.memory_space<vmem>>, vector<1x1x32xf32>
    %192 = vector.shape_cast %191 : vector<1x1x32xf32> to vector<1x32xf32>
    %c1_91 = arith.constant 1 : index
    %c0_92 = arith.constant 0 : index
    %c0_93 = arith.constant 0 : index
    %193 = vector.load %arg9[%c1_91, %c0_92, %c0_93] : memref<2x1x32xf32, #tpu.memory_space<vmem>>, vector<1x1x32xf32>
    %194 = vector.shape_cast %193 : vector<1x1x32xf32> to vector<1x32xf32>
    %cst_94 = arith.constant dense<0.000000e+00> : vector<16xf32>
    %195 = vector.multi_reduction <add>, %190, %cst_94 [1] : vector<16x32xf32> to vector<16xf32>
    %196 = vector.shape_cast %195 : vector<16xf32> to vector<16x1xf32>
    %cst_95 = arith.constant 3.200000e+01 : f32
    %197 = vector.broadcast %cst_95 : f32 to vector<16x1xf32>
    %198 = arith.divf %196, %197 : vector<16x1xf32>
    %199 = vector.broadcast %198 : vector<16x1xf32> to vector<16x32xf32>
    %200 = arith.subf %190, %199 : vector<16x32xf32>
    %201 = arith.mulf %200, %200 : vector<16x32xf32>
    %cst_96 = arith.constant dense<0.000000e+00> : vector<16xf32>
    %202 = vector.multi_reduction <add>, %201, %cst_96 [1] : vector<16x32xf32> to vector<16xf32>
    %203 = vector.shape_cast %202 : vector<16xf32> to vector<16x1xf32>
    %cst_97 = arith.constant 3.200000e+01 : f32
    %204 = vector.broadcast %cst_97 : f32 to vector<16x1xf32>
    %205 = arith.divf %203, %204 : vector<16x1xf32>
    %cst_98 = arith.constant 9.99999974E-6 : f32
    %206 = vector.broadcast %cst_98 : f32 to vector<16x1xf32>
    %207 = arith.addf %205, %206 : vector<16x1xf32>
    %208 = math.rsqrt %207 : vector<16x1xf32>
    %209 = vector.broadcast %208 : vector<16x1xf32> to vector<16x32xf32>
    %210 = arith.mulf %200, %209 : vector<16x32xf32>
    %211 = vector.broadcast %192 : vector<1x32xf32> to vector<16x32xf32>
    %212 = arith.mulf %210, %211 : vector<16x32xf32>
    %213 = vector.broadcast %194 : vector<1x32xf32> to vector<16x32xf32>
    %214 = arith.addf %212, %213 : vector<16x32xf32>
    %c1_99 = arith.constant 1 : index
    %c0_100 = arith.constant 0 : index
    %c0_101 = arith.constant 0 : index
    %215 = vector.load %arg10[%c1_99, %c0_100, %c0_101] : memref<2x32x128xf32, #tpu.memory_space<vmem>>, vector<1x32x128xf32>
    %216 = vector.shape_cast %215 : vector<1x32x128xf32> to vector<32x128xf32>
    %cst_102 = arith.constant dense<0.000000e+00> : vector<16x128xf32>
    %217 = tpu.matmul %214, %216, %cst_102 {dimension_numbers = #tpu.dot_dimension_numbers<[1], [0], [0], [1], [0, 0, 1, 1], [], []>} : vector<16x32xf32>, vector<32x128xf32>, vector<16x128xf32> -> vector<16x128xf32>
    %c1_103 = arith.constant 1 : index
    %c0_104 = arith.constant 0 : index
    %c0_105 = arith.constant 0 : index
    %218 = vector.load %arg11[%c1_103, %c0_104, %c0_105] : memref<2x1x128xf32, #tpu.memory_space<vmem>>, vector<1x1x128xf32>
    %219 = vector.shape_cast %218 : vector<1x1x128xf32> to vector<1x128xf32>
    %220 = vector.broadcast %219 : vector<1x128xf32> to vector<16x128xf32>
    %221 = arith.addf %217, %220 : vector<16x128xf32>
    %222 = arith.mulf %221, %221 : vector<16x128xf32>
    %223 = arith.mulf %221, %222 : vector<16x128xf32>
    %cst_106 = arith.constant 4.471500e-02 : f32
    %224 = vector.broadcast %cst_106 : f32 to vector<16x128xf32>
    %225 = arith.mulf %224, %223 : vector<16x128xf32>
    %226 = arith.addf %221, %225 : vector<16x128xf32>
    %cst_107 = arith.constant 0.797884583 : f32
    %227 = vector.broadcast %cst_107 : f32 to vector<16x128xf32>
    %228 = arith.mulf %227, %226 : vector<16x128xf32>
    %229 = math.tanh %228 : vector<16x128xf32>
    %cst_108 = arith.constant 1.000000e+00 : f32
    %230 = vector.broadcast %cst_108 : f32 to vector<16x128xf32>
    %231 = arith.addf %230, %229 : vector<16x128xf32>
    %cst_109 = arith.constant 5.000000e-01 : f32
    %232 = vector.broadcast %cst_109 : f32 to vector<16x128xf32>
    %233 = arith.mulf %232, %231 : vector<16x128xf32>
    %234 = arith.mulf %221, %233 : vector<16x128xf32>
    %c1_110 = arith.constant 1 : index
    %c0_111 = arith.constant 0 : index
    %c0_112 = arith.constant 0 : index
    %235 = vector.load %arg12[%c1_110, %c0_111, %c0_112] : memref<2x128x32xf32, #tpu.memory_space<vmem>>, vector<1x128x32xf32>
    %236 = vector.shape_cast %235 : vector<1x128x32xf32> to vector<128x32xf32>
    %cst_113 = arith.constant dense<0.000000e+00> : vector<16x32xf32>
    %237 = tpu.matmul %234, %236, %cst_113 {dimension_numbers = #tpu.dot_dimension_numbers<[1], [0], [0], [1], [0, 0, 1, 1], [], []>} : vector<16x128xf32>, vector<128x32xf32>, vector<16x32xf32> -> vector<16x32xf32>
    %238 = arith.addf %190, %237 : vector<16x32xf32>
    %c1_114 = arith.constant 1 : index
    %c0_115 = arith.constant 0 : index
    %c0_116 = arith.constant 0 : index
    %239 = vector.load %arg13[%c1_114, %c0_115, %c0_116] : memref<2x1x32xf32, #tpu.memory_space<vmem>>, vector<1x1x32xf32>
    %240 = vector.shape_cast %239 : vector<1x1x32xf32> to vector<1x32xf32>
    %241 = vector.broadcast %240 : vector<1x32xf32> to vector<16x32xf32>
    %242 = arith.addf %238, %241 : vector<16x32xf32>
    %c0_117 = arith.constant 0 : index
    %c0_118 = arith.constant 0 : index
    %243 = vector.load %arg14[%c0_117, %c0_118] : memref<1x32xf32, #tpu.memory_space<vmem>>, vector<1x32xf32>
    %c0_119 = arith.constant 0 : index
    %c0_120 = arith.constant 0 : index
    %244 = vector.load %arg15[%c0_119, %c0_120] : memref<1x32xf32, #tpu.memory_space<vmem>>, vector<1x32xf32>
    %cst_121 = arith.constant dense<0.000000e+00> : vector<16xf32>
    %245 = vector.multi_reduction <add>, %242, %cst_121 [1] : vector<16x32xf32> to vector<16xf32>
    %246 = vector.shape_cast %245 : vector<16xf32> to vector<16x1xf32>
    %cst_122 = arith.constant 3.200000e+01 : f32
    %247 = vector.broadcast %cst_122 : f32 to vector<16x1xf32>
    %248 = arith.divf %246, %247 : vector<16x1xf32>
    %249 = vector.broadcast %248 : vector<16x1xf32> to vector<16x32xf32>
    %250 = arith.subf %242, %249 : vector<16x32xf32>
    %251 = arith.mulf %250, %250 : vector<16x32xf32>
    %cst_123 = arith.constant dense<0.000000e+00> : vector<16xf32>
    %252 = vector.multi_reduction <add>, %251, %cst_123 [1] : vector<16x32xf32> to vector<16xf32>
    %253 = vector.shape_cast %252 : vector<16xf32> to vector<16x1xf32>
    %cst_124 = arith.constant 3.200000e+01 : f32
    %254 = vector.broadcast %cst_124 : f32 to vector<16x1xf32>
    %255 = arith.divf %253, %254 : vector<16x1xf32>
    %cst_125 = arith.constant 9.99999974E-6 : f32
    %256 = vector.broadcast %cst_125 : f32 to vector<16x1xf32>
    %257 = arith.addf %255, %256 : vector<16x1xf32>
    %258 = math.rsqrt %257 : vector<16x1xf32>
    %259 = vector.broadcast %258 : vector<16x1xf32> to vector<16x32xf32>
    %260 = arith.mulf %250, %259 : vector<16x32xf32>
    %261 = vector.broadcast %243 : vector<1x32xf32> to vector<16x32xf32>
    %262 = arith.mulf %260, %261 : vector<16x32xf32>
    %263 = vector.broadcast %244 : vector<1x32xf32> to vector<16x32xf32>
    %264 = arith.addf %262, %263 : vector<16x32xf32>
    %c0_126 = arith.constant 0 : index
    %c0_127 = arith.constant 0 : index
    %265 = vector.load %arg2[%c0_126, %c0_127] : memref<2x16xf32, #tpu.memory_space<vmem>>, vector<2x16xf32>
    %cst_128 = arith.constant dense<0.000000e+00> : vector<2x32xf32>
    %266 = tpu.matmul %265, %264, %cst_128 {dimension_numbers = #tpu.dot_dimension_numbers<[1], [0], [0], [1], [0, 0, 1, 1], [], []>} : vector<2x16xf32>, vector<16x32xf32>, vector<2x32xf32> -> vector<2x32xf32>
    %c0_129 = arith.constant 0 : index
    %c0_130 = arith.constant 0 : index
    %267 = vector.load %arg16[%c0_129, %c0_130] : memref<32x32xf32, #tpu.memory_space<vmem>>, vector<32x32xf32>
    %c0_131 = arith.constant 0 : index
    %c0_132 = arith.constant 0 : index
    %268 = vector.load %arg17[%c0_131, %c0_132] : memref<32x32xf32, #tpu.memory_space<vmem>>, vector<32x32xf32>
    %269 = vector.shape_cast %268 : vector<32x32xf32> to vector<1x32x32xf32>
    %270 = vector.shape_cast %269 : vector<1x32x32xf32> to vector<1x32x32xf32>
    %271 = vector.broadcast %270 : vector<1x32x32xf32> to vector<4x32x32xf32>
    %c0_133 = arith.constant 0 : index
    %c0_134 = arith.constant 0 : index
    %c0_135 = arith.constant 0 : index
    %272 = vector.load %arg19[%c0_133, %c0_134, %c0_135] : memref<2x1x32xf32, #tpu.memory_space<vmem>>, vector<1x1x32xf32>
    %273 = vector.shape_cast %272 : vector<1x1x32xf32> to vector<1x32xf32>
    %c0_136 = arith.constant 0 : index
    %c0_137 = arith.constant 0 : index
    %c0_138 = arith.constant 0 : index
    %274 = vector.load %arg20[%c0_136, %c0_137, %c0_138] : memref<2x1x32xf32, #tpu.memory_space<vmem>>, vector<1x1x32xf32>
    %275 = vector.shape_cast %274 : vector<1x1x32xf32> to vector<1x32xf32>
    %cst_139 = arith.constant dense<0.000000e+00> : vector<32xf32>
    %276 = vector.multi_reduction <add>, %267, %cst_139 [1] : vector<32x32xf32> to vector<32xf32>
    %277 = vector.shape_cast %276 : vector<32xf32> to vector<32x1xf32>
    %cst_140 = arith.constant 3.200000e+01 : f32
    %278 = vector.broadcast %cst_140 : f32 to vector<32x1xf32>
    %279 = arith.divf %277, %278 : vector<32x1xf32>
    %280 = vector.broadcast %279 : vector<32x1xf32> to vector<32x32xf32>
    %281 = arith.subf %267, %280 : vector<32x32xf32>
    %282 = arith.mulf %281, %281 : vector<32x32xf32>
    %cst_141 = arith.constant dense<0.000000e+00> : vector<32xf32>
    %283 = vector.multi_reduction <add>, %282, %cst_141 [1] : vector<32x32xf32> to vector<32xf32>
    %284 = vector.shape_cast %283 : vector<32xf32> to vector<32x1xf32>
    %cst_142 = arith.constant 3.200000e+01 : f32
    %285 = vector.broadcast %cst_142 : f32 to vector<32x1xf32>
    %286 = arith.divf %284, %285 : vector<32x1xf32>
    %cst_143 = arith.constant 9.99999974E-6 : f32
    %287 = vector.broadcast %cst_143 : f32 to vector<32x1xf32>
    %288 = arith.addf %286, %287 : vector<32x1xf32>
    %289 = math.rsqrt %288 : vector<32x1xf32>
    %290 = vector.broadcast %289 : vector<32x1xf32> to vector<32x32xf32>
    %291 = arith.mulf %281, %290 : vector<32x32xf32>
    %292 = vector.broadcast %273 : vector<1x32xf32> to vector<32x32xf32>
    %293 = arith.mulf %291, %292 : vector<32x32xf32>
    %294 = vector.broadcast %275 : vector<1x32xf32> to vector<32x32xf32>
    %295 = arith.addf %293, %294 : vector<32x32xf32>
    %296 = vector.shape_cast %295 : vector<32x32xf32> to vector<1x32x32xf32>
    %297 = vector.shape_cast %296 : vector<1x32x32xf32> to vector<1x32x32xf32>
    %298 = vector.broadcast %297 : vector<1x32x32xf32> to vector<12x32x32xf32>
    %c0_144 = arith.constant 0 : index
    %c0_145 = arith.constant 0 : index
    %c0_146 = arith.constant 0 : index
    %c0_147 = arith.constant 0 : index
    %299 = vector.load %arg21[%c0_144, %c0_145, %c0_146, %c0_147] : memref<2x12x32x8xf32, #tpu.memory_space<vmem>>, vector<1x12x32x8xf32>
    %300 = vector.shape_cast %299 : vector<1x12x32x8xf32> to vector<12x32x8xf32>
    "tpu.trace_start"() <{level = 10 : i32, message = "bmd,bdk->bmk"}> : () -> ()
    %cst_148 = arith.constant dense<0.000000e+00> : vector<12x32x8xf32>
    %301 = tpu.matmul %298, %300, %cst_148 {dimension_numbers = #tpu.dot_dimension_numbers<[2], [1], [1], [2], [0, 0, 0, 1, 1, 2], [0], [0]>} : vector<12x32x32xf32>, vector<12x32x8xf32>, vector<12x32x8xf32> -> vector<12x32x8xf32>
    "tpu.trace_stop"() : () -> ()
    %302 = vector.extract_strided_slice %301 {offsets = [0, 0, 0], sizes = [4, 32, 8], strides = [1, 1, 1]} : vector<12x32x8xf32> to vector<4x32x8xf32>
    %303 = vector.extract_strided_slice %301 {offsets = [4, 0, 0], sizes = [4, 32, 8], strides = [1, 1, 1]} : vector<12x32x8xf32> to vector<4x32x8xf32>
    %304 = vector.extract_strided_slice %301 {offsets = [8, 0, 0], sizes = [4, 32, 8], strides = [1, 1, 1]} : vector<12x32x8xf32> to vector<4x32x8xf32>
    "tpu.trace_start"() <{level = 10 : i32, message = "hqd,hkd->hqk"}> : () -> ()
    %cst_149 = arith.constant dense<0.000000e+00> : vector<4x32x32xf32>
    %305 = tpu.matmul %302, %303, %cst_149 {dimension_numbers = #tpu.dot_dimension_numbers<[2], [2], [1], [1], [0, 0, 0, 1, 1, 1], [0], [0]>} : vector<4x32x8xf32>, vector<4x32x8xf32>, vector<4x32x32xf32> -> vector<4x32x32xf32>
    "tpu.trace_stop"() : () -> ()
    %cst_150 = arith.constant 0.353553385 : f32
    %306 = vector.broadcast %cst_150 : f32 to vector<4x32x32xf32>
    %307 = arith.mulf %305, %306 : vector<4x32x32xf32>
    %308 = arith.addf %307, %271 : vector<4x32x32xf32>
    %cst_151 = arith.constant dense<0xFF800000> : vector<4x32xf32>
    %309 = vector.multi_reduction <maximumf>, %308, %cst_151 [2] : vector<4x32x32xf32> to vector<4x32xf32>
    %310 = vector.shape_cast %309 : vector<4x32xf32> to vector<4x32x1xf32>
    %311 = vector.broadcast %310 : vector<4x32x1xf32> to vector<4x32x32xf32>
    %312 = arith.subf %308, %311 : vector<4x32x32xf32>
    %313 = math.exp %312 : vector<4x32x32xf32>
    %cst_152 = arith.constant dense<0.000000e+00> : vector<4x32xf32>
    %314 = vector.multi_reduction <add>, %313, %cst_152 [2] : vector<4x32x32xf32> to vector<4x32xf32>
    %315 = vector.shape_cast %314 : vector<4x32xf32> to vector<4x32x1xf32>
    %316 = tpu.reciprocal %315 {approx = true} : vector<4x32x1xf32> -> vector<4x32x1xf32>
    %317 = vector.broadcast %316 : vector<4x32x1xf32> to vector<4x32x32xf32>
    %318 = arith.mulf %313, %317 : vector<4x32x32xf32>
    "tpu.trace_start"() <{level = 10 : i32, message = "hqk,hkd->hqd"}> : () -> ()
    %cst_153 = arith.constant dense<0.000000e+00> : vector<4x32x8xf32>
    %319 = tpu.matmul %318, %304, %cst_153 {dimension_numbers = #tpu.dot_dimension_numbers<[2], [1], [1], [2], [0, 0, 0, 1, 1, 2], [0], [0]>} : vector<4x32x32xf32>, vector<4x32x8xf32>, vector<4x32x8xf32> -> vector<4x32x8xf32>
    "tpu.trace_stop"() : () -> ()
    %c0_154 = arith.constant 0 : index
    %c0_155 = arith.constant 0 : index
    %c0_156 = arith.constant 0 : index
    %c0_157 = arith.constant 0 : index
    %320 = vector.load %arg22[%c0_154, %c0_155, %c0_156, %c0_157] : memref<2x4x8x32xf32, #tpu.memory_space<vmem>>, vector<1x4x8x32xf32>
    %321 = vector.shape_cast %320 : vector<1x4x8x32xf32> to vector<4x8x32xf32>
    "tpu.trace_start"() <{level = 10 : i32, message = "hqd,hde->hqe"}> : () -> ()
    %cst_158 = arith.constant dense<0.000000e+00> : vector<4x32x32xf32>
    %322 = tpu.matmul %319, %321, %cst_158 {dimension_numbers = #tpu.dot_dimension_numbers<[2], [1], [1], [2], [0, 0, 0, 1, 1, 2], [0], [0]>} : vector<4x32x8xf32>, vector<4x8x32xf32>, vector<4x32x32xf32> -> vector<4x32x32xf32>
    "tpu.trace_stop"() : () -> ()
    %323 = vector.extract_strided_slice %322 {offsets = [0, 0, 0], sizes = [1, 32, 32], strides = [1, 1, 1]} : vector<4x32x32xf32> to vector<1x32x32xf32>
    %324 = vector.shape_cast %323 : vector<1x32x32xf32> to vector<32x32xf32>
    %325 = vector.extract_strided_slice %322 {offsets = [1, 0, 0], sizes = [1, 32, 32], strides = [1, 1, 1]} : vector<4x32x32xf32> to vector<1x32x32xf32>
    %326 = vector.shape_cast %325 : vector<1x32x32xf32> to vector<32x32xf32>
    %327 = arith.addf %324, %326 : vector<32x32xf32>
    %328 = vector.extract_strided_slice %322 {offsets = [2, 0, 0], sizes = [1, 32, 32], strides = [1, 1, 1]} : vector<4x32x32xf32> to vector<1x32x32xf32>
    %329 = vector.shape_cast %328 : vector<1x32x32xf32> to vector<32x32xf32>
    %330 = arith.addf %327, %329 : vector<32x32xf32>
    %331 = vector.extract_strided_slice %322 {offsets = [3, 0, 0], sizes = [1, 32, 32], strides = [1, 1, 1]} : vector<4x32x32xf32> to vector<1x32x32xf32>
    %332 = vector.shape_cast %331 : vector<1x32x32xf32> to vector<32x32xf32>
    %333 = arith.addf %330, %332 : vector<32x32xf32>
    %334 = arith.addf %267, %333 : vector<32x32xf32>
    %c0_159 = arith.constant 0 : index
    %c0_160 = arith.constant 0 : index
    %c0_161 = arith.constant 0 : index
    %335 = vector.load %arg23[%c0_159, %c0_160, %c0_161] : memref<2x1x32xf32, #tpu.memory_space<vmem>>, vector<1x1x32xf32>
    %336 = vector.shape_cast %335 : vector<1x1x32xf32> to vector<1x32xf32>
    %337 = vector.broadcast %336 : vector<1x32xf32> to vector<32x32xf32>
    %338 = arith.addf %334, %337 : vector<32x32xf32>
    %c0_162 = arith.constant 0 : index
    %c0_163 = arith.constant 0 : index
    %c0_164 = arith.constant 0 : index
    %339 = vector.load %arg24[%c0_162, %c0_163, %c0_164] : memref<2x1x32xf32, #tpu.memory_space<vmem>>, vector<1x1x32xf32>
    %340 = vector.shape_cast %339 : vector<1x1x32xf32> to vector<1x32xf32>
    %c0_165 = arith.constant 0 : index
    %c0_166 = arith.constant 0 : index
    %c0_167 = arith.constant 0 : index
    %341 = vector.load %arg25[%c0_165, %c0_166, %c0_167] : memref<2x1x32xf32, #tpu.memory_space<vmem>>, vector<1x1x32xf32>
    %342 = vector.shape_cast %341 : vector<1x1x32xf32> to vector<1x32xf32>
    %cst_168 = arith.constant dense<0.000000e+00> : vector<32xf32>
    %343 = vector.multi_reduction <add>, %338, %cst_168 [1] : vector<32x32xf32> to vector<32xf32>
    %344 = vector.shape_cast %343 : vector<32xf32> to vector<32x1xf32>
    %cst_169 = arith.constant 3.200000e+01 : f32
    %345 = vector.broadcast %cst_169 : f32 to vector<32x1xf32>
    %346 = arith.divf %344, %345 : vector<32x1xf32>
    %347 = vector.broadcast %346 : vector<32x1xf32> to vector<32x32xf32>
    %348 = arith.subf %338, %347 : vector<32x32xf32>
    %349 = arith.mulf %348, %348 : vector<32x32xf32>
    %cst_170 = arith.constant dense<0.000000e+00> : vector<32xf32>
    %350 = vector.multi_reduction <add>, %349, %cst_170 [1] : vector<32x32xf32> to vector<32xf32>
    %351 = vector.shape_cast %350 : vector<32xf32> to vector<32x1xf32>
    %cst_171 = arith.constant 3.200000e+01 : f32
    %352 = vector.broadcast %cst_171 : f32 to vector<32x1xf32>
    %353 = arith.divf %351, %352 : vector<32x1xf32>
    %cst_172 = arith.constant 9.99999974E-6 : f32
    %354 = vector.broadcast %cst_172 : f32 to vector<32x1xf32>
    %355 = arith.addf %353, %354 : vector<32x1xf32>
    %356 = math.rsqrt %355 : vector<32x1xf32>
    %357 = vector.broadcast %356 : vector<32x1xf32> to vector<32x32xf32>
    %358 = arith.mulf %348, %357 : vector<32x32xf32>
    %359 = vector.broadcast %340 : vector<1x32xf32> to vector<32x32xf32>
    %360 = arith.mulf %358, %359 : vector<32x32xf32>
    %361 = vector.broadcast %342 : vector<1x32xf32> to vector<32x32xf32>
    %362 = arith.addf %360, %361 : vector<32x32xf32>
    %c0_173 = arith.constant 0 : index
    %c0_174 = arith.constant 0 : index
    %c0_175 = arith.constant 0 : index
    %363 = vector.load %arg26[%c0_173, %c0_174, %c0_175] : memref<2x32x128xf32, #tpu.memory_space<vmem>>, vector<1x32x128xf32>
    %364 = vector.shape_cast %363 : vector<1x32x128xf32> to vector<32x128xf32>
    %cst_176 = arith.constant dense<0.000000e+00> : vector<32x128xf32>
    %365 = tpu.matmul %362, %364, %cst_176 {dimension_numbers = #tpu.dot_dimension_numbers<[1], [0], [0], [1], [0, 0, 1, 1], [], []>} : vector<32x32xf32>, vector<32x128xf32>, vector<32x128xf32> -> vector<32x128xf32>
    %c0_177 = arith.constant 0 : index
    %c0_178 = arith.constant 0 : index
    %c0_179 = arith.constant 0 : index
    %366 = vector.load %arg27[%c0_177, %c0_178, %c0_179] : memref<2x1x128xf32, #tpu.memory_space<vmem>>, vector<1x1x128xf32>
    %367 = vector.shape_cast %366 : vector<1x1x128xf32> to vector<1x128xf32>
    %368 = vector.broadcast %367 : vector<1x128xf32> to vector<32x128xf32>
    %369 = arith.addf %365, %368 : vector<32x128xf32>
    %370 = arith.mulf %369, %369 : vector<32x128xf32>
    %371 = arith.mulf %369, %370 : vector<32x128xf32>
    %cst_180 = arith.constant 4.471500e-02 : f32
    %372 = vector.broadcast %cst_180 : f32 to vector<32x128xf32>
    %373 = arith.mulf %372, %371 : vector<32x128xf32>
    %374 = arith.addf %369, %373 : vector<32x128xf32>
    %cst_181 = arith.constant 0.797884583 : f32
    %375 = vector.broadcast %cst_181 : f32 to vector<32x128xf32>
    %376 = arith.mulf %375, %374 : vector<32x128xf32>
    %377 = math.tanh %376 : vector<32x128xf32>
    %cst_182 = arith.constant 1.000000e+00 : f32
    %378 = vector.broadcast %cst_182 : f32 to vector<32x128xf32>
    %379 = arith.addf %378, %377 : vector<32x128xf32>
    %cst_183 = arith.constant 5.000000e-01 : f32
    %380 = vector.broadcast %cst_183 : f32 to vector<32x128xf32>
    %381 = arith.mulf %380, %379 : vector<32x128xf32>
    %382 = arith.mulf %369, %381 : vector<32x128xf32>
    %c0_184 = arith.constant 0 : index
    %c0_185 = arith.constant 0 : index
    %c0_186 = arith.constant 0 : index
    %383 = vector.load %arg28[%c0_184, %c0_185, %c0_186] : memref<2x128x32xf32, #tpu.memory_space<vmem>>, vector<1x128x32xf32>
    %384 = vector.shape_cast %383 : vector<1x128x32xf32> to vector<128x32xf32>
    %cst_187 = arith.constant dense<0.000000e+00> : vector<32x32xf32>
    %385 = tpu.matmul %382, %384, %cst_187 {dimension_numbers = #tpu.dot_dimension_numbers<[1], [0], [0], [1], [0, 0, 1, 1], [], []>} : vector<32x128xf32>, vector<128x32xf32>, vector<32x32xf32> -> vector<32x32xf32>
    %386 = arith.addf %338, %385 : vector<32x32xf32>
    %c0_188 = arith.constant 0 : index
    %c0_189 = arith.constant 0 : index
    %c0_190 = arith.constant 0 : index
    %387 = vector.load %arg29[%c0_188, %c0_189, %c0_190] : memref<2x1x32xf32, #tpu.memory_space<vmem>>, vector<1x1x32xf32>
    %388 = vector.shape_cast %387 : vector<1x1x32xf32> to vector<1x32xf32>
    %389 = vector.broadcast %388 : vector<1x32xf32> to vector<32x32xf32>
    %390 = arith.addf %386, %389 : vector<32x32xf32>
    %c1_191 = arith.constant 1 : index
    %c0_192 = arith.constant 0 : index
    %c0_193 = arith.constant 0 : index
    %391 = vector.load %arg19[%c1_191, %c0_192, %c0_193] : memref<2x1x32xf32, #tpu.memory_space<vmem>>, vector<1x1x32xf32>
    %392 = vector.shape_cast %391 : vector<1x1x32xf32> to vector<1x32xf32>
    %c1_194 = arith.constant 1 : index
    %c0_195 = arith.constant 0 : index
    %c0_196 = arith.constant 0 : index
    %393 = vector.load %arg20[%c1_194, %c0_195, %c0_196] : memref<2x1x32xf32, #tpu.memory_space<vmem>>, vector<1x1x32xf32>
    %394 = vector.shape_cast %393 : vector<1x1x32xf32> to vector<1x32xf32>
    %cst_197 = arith.constant dense<0.000000e+00> : vector<32xf32>
    %395 = vector.multi_reduction <add>, %390, %cst_197 [1] : vector<32x32xf32> to vector<32xf32>
    %396 = vector.shape_cast %395 : vector<32xf32> to vector<32x1xf32>
    %cst_198 = arith.constant 3.200000e+01 : f32
    %397 = vector.broadcast %cst_198 : f32 to vector<32x1xf32>
    %398 = arith.divf %396, %397 : vector<32x1xf32>
    %399 = vector.broadcast %398 : vector<32x1xf32> to vector<32x32xf32>
    %400 = arith.subf %390, %399 : vector<32x32xf32>
    %401 = arith.mulf %400, %400 : vector<32x32xf32>
    %cst_199 = arith.constant dense<0.000000e+00> : vector<32xf32>
    %402 = vector.multi_reduction <add>, %401, %cst_199 [1] : vector<32x32xf32> to vector<32xf32>
    %403 = vector.shape_cast %402 : vector<32xf32> to vector<32x1xf32>
    %cst_200 = arith.constant 3.200000e+01 : f32
    %404 = vector.broadcast %cst_200 : f32 to vector<32x1xf32>
    %405 = arith.divf %403, %404 : vector<32x1xf32>
    %cst_201 = arith.constant 9.99999974E-6 : f32
    %406 = vector.broadcast %cst_201 : f32 to vector<32x1xf32>
    %407 = arith.addf %405, %406 : vector<32x1xf32>
    %408 = math.rsqrt %407 : vector<32x1xf32>
    %409 = vector.broadcast %408 : vector<32x1xf32> to vector<32x32xf32>
    %410 = arith.mulf %400, %409 : vector<32x32xf32>
    %411 = vector.broadcast %392 : vector<1x32xf32> to vector<32x32xf32>
    %412 = arith.mulf %410, %411 : vector<32x32xf32>
    %413 = vector.broadcast %394 : vector<1x32xf32> to vector<32x32xf32>
    %414 = arith.addf %412, %413 : vector<32x32xf32>
    %415 = vector.shape_cast %414 : vector<32x32xf32> to vector<1x32x32xf32>
    %416 = vector.shape_cast %415 : vector<1x32x32xf32> to vector<1x32x32xf32>
    %417 = vector.broadcast %416 : vector<1x32x32xf32> to vector<12x32x32xf32>
    %c1_202 = arith.constant 1 : index
    %c0_203 = arith.constant 0 : index
    %c0_204 = arith.constant 0 : index
    %c0_205 = arith.constant 0 : index
    %418 = vector.load %arg21[%c1_202, %c0_203, %c0_204, %c0_205] : memref<2x12x32x8xf32, #tpu.memory_space<vmem>>, vector<1x12x32x8xf32>
    %419 = vector.shape_cast %418 : vector<1x12x32x8xf32> to vector<12x32x8xf32>
    "tpu.trace_start"() <{level = 10 : i32, message = "bmd,bdk->bmk"}> : () -> ()
    %cst_206 = arith.constant dense<0.000000e+00> : vector<12x32x8xf32>
    %420 = tpu.matmul %417, %419, %cst_206 {dimension_numbers = #tpu.dot_dimension_numbers<[2], [1], [1], [2], [0, 0, 0, 1, 1, 2], [0], [0]>} : vector<12x32x32xf32>, vector<12x32x8xf32>, vector<12x32x8xf32> -> vector<12x32x8xf32>
    "tpu.trace_stop"() : () -> ()
    %421 = vector.extract_strided_slice %420 {offsets = [0, 0, 0], sizes = [4, 32, 8], strides = [1, 1, 1]} : vector<12x32x8xf32> to vector<4x32x8xf32>
    %422 = vector.extract_strided_slice %420 {offsets = [4, 0, 0], sizes = [4, 32, 8], strides = [1, 1, 1]} : vector<12x32x8xf32> to vector<4x32x8xf32>
    %423 = vector.extract_strided_slice %420 {offsets = [8, 0, 0], sizes = [4, 32, 8], strides = [1, 1, 1]} : vector<12x32x8xf32> to vector<4x32x8xf32>
    "tpu.trace_start"() <{level = 10 : i32, message = "hqd,hkd->hqk"}> : () -> ()
    %cst_207 = arith.constant dense<0.000000e+00> : vector<4x32x32xf32>
    %424 = tpu.matmul %421, %422, %cst_207 {dimension_numbers = #tpu.dot_dimension_numbers<[2], [2], [1], [1], [0, 0, 0, 1, 1, 1], [0], [0]>} : vector<4x32x8xf32>, vector<4x32x8xf32>, vector<4x32x32xf32> -> vector<4x32x32xf32>
    "tpu.trace_stop"() : () -> ()
    %cst_208 = arith.constant 0.353553385 : f32
    %425 = vector.broadcast %cst_208 : f32 to vector<4x32x32xf32>
    %426 = arith.mulf %424, %425 : vector<4x32x32xf32>
    %427 = arith.addf %426, %271 : vector<4x32x32xf32>
    %cst_209 = arith.constant dense<0xFF800000> : vector<4x32xf32>
    %428 = vector.multi_reduction <maximumf>, %427, %cst_209 [2] : vector<4x32x32xf32> to vector<4x32xf32>
    %429 = vector.shape_cast %428 : vector<4x32xf32> to vector<4x32x1xf32>
    %430 = vector.broadcast %429 : vector<4x32x1xf32> to vector<4x32x32xf32>
    %431 = arith.subf %427, %430 : vector<4x32x32xf32>
    %432 = math.exp %431 : vector<4x32x32xf32>
    %cst_210 = arith.constant dense<0.000000e+00> : vector<4x32xf32>
    %433 = vector.multi_reduction <add>, %432, %cst_210 [2] : vector<4x32x32xf32> to vector<4x32xf32>
    %434 = vector.shape_cast %433 : vector<4x32xf32> to vector<4x32x1xf32>
    %435 = tpu.reciprocal %434 {approx = true} : vector<4x32x1xf32> -> vector<4x32x1xf32>
    %436 = vector.broadcast %435 : vector<4x32x1xf32> to vector<4x32x32xf32>
    %437 = arith.mulf %432, %436 : vector<4x32x32xf32>
    "tpu.trace_start"() <{level = 10 : i32, message = "hqk,hkd->hqd"}> : () -> ()
    %cst_211 = arith.constant dense<0.000000e+00> : vector<4x32x8xf32>
    %438 = tpu.matmul %437, %423, %cst_211 {dimension_numbers = #tpu.dot_dimension_numbers<[2], [1], [1], [2], [0, 0, 0, 1, 1, 2], [0], [0]>} : vector<4x32x32xf32>, vector<4x32x8xf32>, vector<4x32x8xf32> -> vector<4x32x8xf32>
    "tpu.trace_stop"() : () -> ()
    %c1_212 = arith.constant 1 : index
    %c0_213 = arith.constant 0 : index
    %c0_214 = arith.constant 0 : index
    %c0_215 = arith.constant 0 : index
    %439 = vector.load %arg22[%c1_212, %c0_213, %c0_214, %c0_215] : memref<2x4x8x32xf32, #tpu.memory_space<vmem>>, vector<1x4x8x32xf32>
    %440 = vector.shape_cast %439 : vector<1x4x8x32xf32> to vector<4x8x32xf32>
    "tpu.trace_start"() <{level = 10 : i32, message = "hqd,hde->hqe"}> : () -> ()
    %cst_216 = arith.constant dense<0.000000e+00> : vector<4x32x32xf32>
    %441 = tpu.matmul %438, %440, %cst_216 {dimension_numbers = #tpu.dot_dimension_numbers<[2], [1], [1], [2], [0, 0, 0, 1, 1, 2], [0], [0]>} : vector<4x32x8xf32>, vector<4x8x32xf32>, vector<4x32x32xf32> -> vector<4x32x32xf32>
    "tpu.trace_stop"() : () -> ()
    %442 = vector.extract_strided_slice %441 {offsets = [0, 0, 0], sizes = [1, 32, 32], strides = [1, 1, 1]} : vector<4x32x32xf32> to vector<1x32x32xf32>
    %443 = vector.shape_cast %442 : vector<1x32x32xf32> to vector<32x32xf32>
    %444 = vector.extract_strided_slice %441 {offsets = [1, 0, 0], sizes = [1, 32, 32], strides = [1, 1, 1]} : vector<4x32x32xf32> to vector<1x32x32xf32>
    %445 = vector.shape_cast %444 : vector<1x32x32xf32> to vector<32x32xf32>
    %446 = arith.addf %443, %445 : vector<32x32xf32>
    %447 = vector.extract_strided_slice %441 {offsets = [2, 0, 0], sizes = [1, 32, 32], strides = [1, 1, 1]} : vector<4x32x32xf32> to vector<1x32x32xf32>
    %448 = vector.shape_cast %447 : vector<1x32x32xf32> to vector<32x32xf32>
    %449 = arith.addf %446, %448 : vector<32x32xf32>
    %450 = vector.extract_strided_slice %441 {offsets = [3, 0, 0], sizes = [1, 32, 32], strides = [1, 1, 1]} : vector<4x32x32xf32> to vector<1x32x32xf32>
    %451 = vector.shape_cast %450 : vector<1x32x32xf32> to vector<32x32xf32>
    %452 = arith.addf %449, %451 : vector<32x32xf32>
    %453 = arith.addf %390, %452 : vector<32x32xf32>
    %c1_217 = arith.constant 1 : index
    %c0_218 = arith.constant 0 : index
    %c0_219 = arith.constant 0 : index
    %454 = vector.load %arg23[%c1_217, %c0_218, %c0_219] : memref<2x1x32xf32, #tpu.memory_space<vmem>>, vector<1x1x32xf32>
    %455 = vector.shape_cast %454 : vector<1x1x32xf32> to vector<1x32xf32>
    %456 = vector.broadcast %455 : vector<1x32xf32> to vector<32x32xf32>
    %457 = arith.addf %453, %456 : vector<32x32xf32>
    %c1_220 = arith.constant 1 : index
    %c0_221 = arith.constant 0 : index
    %c0_222 = arith.constant 0 : index
    %458 = vector.load %arg24[%c1_220, %c0_221, %c0_222] : memref<2x1x32xf32, #tpu.memory_space<vmem>>, vector<1x1x32xf32>
    %459 = vector.shape_cast %458 : vector<1x1x32xf32> to vector<1x32xf32>
    %c1_223 = arith.constant 1 : index
    %c0_224 = arith.constant 0 : index
    %c0_225 = arith.constant 0 : index
    %460 = vector.load %arg25[%c1_223, %c0_224, %c0_225] : memref<2x1x32xf32, #tpu.memory_space<vmem>>, vector<1x1x32xf32>
    %461 = vector.shape_cast %460 : vector<1x1x32xf32> to vector<1x32xf32>
    %cst_226 = arith.constant dense<0.000000e+00> : vector<32xf32>
    %462 = vector.multi_reduction <add>, %457, %cst_226 [1] : vector<32x32xf32> to vector<32xf32>
    %463 = vector.shape_cast %462 : vector<32xf32> to vector<32x1xf32>
    %cst_227 = arith.constant 3.200000e+01 : f32
    %464 = vector.broadcast %cst_227 : f32 to vector<32x1xf32>
    %465 = arith.divf %463, %464 : vector<32x1xf32>
    %466 = vector.broadcast %465 : vector<32x1xf32> to vector<32x32xf32>
    %467 = arith.subf %457, %466 : vector<32x32xf32>
    %468 = arith.mulf %467, %467 : vector<32x32xf32>
    %cst_228 = arith.constant dense<0.000000e+00> : vector<32xf32>
    %469 = vector.multi_reduction <add>, %468, %cst_228 [1] : vector<32x32xf32> to vector<32xf32>
    %470 = vector.shape_cast %469 : vector<32xf32> to vector<32x1xf32>
    %cst_229 = arith.constant 3.200000e+01 : f32
    %471 = vector.broadcast %cst_229 : f32 to vector<32x1xf32>
    %472 = arith.divf %470, %471 : vector<32x1xf32>
    %cst_230 = arith.constant 9.99999974E-6 : f32
    %473 = vector.broadcast %cst_230 : f32 to vector<32x1xf32>
    %474 = arith.addf %472, %473 : vector<32x1xf32>
    %475 = math.rsqrt %474 : vector<32x1xf32>
    %476 = vector.broadcast %475 : vector<32x1xf32> to vector<32x32xf32>
    %477 = arith.mulf %467, %476 : vector<32x32xf32>
    %478 = vector.broadcast %459 : vector<1x32xf32> to vector<32x32xf32>
    %479 = arith.mulf %477, %478 : vector<32x32xf32>
    %480 = vector.broadcast %461 : vector<1x32xf32> to vector<32x32xf32>
    %481 = arith.addf %479, %480 : vector<32x32xf32>
    %c1_231 = arith.constant 1 : index
    %c0_232 = arith.constant 0 : index
    %c0_233 = arith.constant 0 : index
    %482 = vector.load %arg26[%c1_231, %c0_232, %c0_233] : memref<2x32x128xf32, #tpu.memory_space<vmem>>, vector<1x32x128xf32>
    %483 = vector.shape_cast %482 : vector<1x32x128xf32> to vector<32x128xf32>
    %cst_234 = arith.constant dense<0.000000e+00> : vector<32x128xf32>
    %484 = tpu.matmul %481, %483, %cst_234 {dimension_numbers = #tpu.dot_dimension_numbers<[1], [0], [0], [1], [0, 0, 1, 1], [], []>} : vector<32x32xf32>, vector<32x128xf32>, vector<32x128xf32> -> vector<32x128xf32>
    %c1_235 = arith.constant 1 : index
    %c0_236 = arith.constant 0 : index
    %c0_237 = arith.constant 0 : index
    %485 = vector.load %arg27[%c1_235, %c0_236, %c0_237] : memref<2x1x128xf32, #tpu.memory_space<vmem>>, vector<1x1x128xf32>
    %486 = vector.shape_cast %485 : vector<1x1x128xf32> to vector<1x128xf32>
    %487 = vector.broadcast %486 : vector<1x128xf32> to vector<32x128xf32>
    %488 = arith.addf %484, %487 : vector<32x128xf32>
    %489 = arith.mulf %488, %488 : vector<32x128xf32>
    %490 = arith.mulf %488, %489 : vector<32x128xf32>
    %cst_238 = arith.constant 4.471500e-02 : f32
    %491 = vector.broadcast %cst_238 : f32 to vector<32x128xf32>
    %492 = arith.mulf %491, %490 : vector<32x128xf32>
    %493 = arith.addf %488, %492 : vector<32x128xf32>
    %cst_239 = arith.constant 0.797884583 : f32
    %494 = vector.broadcast %cst_239 : f32 to vector<32x128xf32>
    %495 = arith.mulf %494, %493 : vector<32x128xf32>
    %496 = math.tanh %495 : vector<32x128xf32>
    %cst_240 = arith.constant 1.000000e+00 : f32
    %497 = vector.broadcast %cst_240 : f32 to vector<32x128xf32>
    %498 = arith.addf %497, %496 : vector<32x128xf32>
    %cst_241 = arith.constant 5.000000e-01 : f32
    %499 = vector.broadcast %cst_241 : f32 to vector<32x128xf32>
    %500 = arith.mulf %499, %498 : vector<32x128xf32>
    %501 = arith.mulf %488, %500 : vector<32x128xf32>
    %c1_242 = arith.constant 1 : index
    %c0_243 = arith.constant 0 : index
    %c0_244 = arith.constant 0 : index
    %502 = vector.load %arg28[%c1_242, %c0_243, %c0_244] : memref<2x128x32xf32, #tpu.memory_space<vmem>>, vector<1x128x32xf32>
    %503 = vector.shape_cast %502 : vector<1x128x32xf32> to vector<128x32xf32>
    %cst_245 = arith.constant dense<0.000000e+00> : vector<32x32xf32>
    %504 = tpu.matmul %501, %503, %cst_245 {dimension_numbers = #tpu.dot_dimension_numbers<[1], [0], [0], [1], [0, 0, 1, 1], [], []>} : vector<32x128xf32>, vector<128x32xf32>, vector<32x32xf32> -> vector<32x32xf32>
    %505 = arith.addf %457, %504 : vector<32x32xf32>
    %c1_246 = arith.constant 1 : index
    %c0_247 = arith.constant 0 : index
    %c0_248 = arith.constant 0 : index
    %506 = vector.load %arg29[%c1_246, %c0_247, %c0_248] : memref<2x1x32xf32, #tpu.memory_space<vmem>>, vector<1x1x32xf32>
    %507 = vector.shape_cast %506 : vector<1x1x32xf32> to vector<1x32xf32>
    %508 = vector.broadcast %507 : vector<1x32xf32> to vector<32x32xf32>
    %509 = arith.addf %505, %508 : vector<32x32xf32>
    %c0_249 = arith.constant 0 : index
    %c0_250 = arith.constant 0 : index
    %510 = vector.load %arg30[%c0_249, %c0_250] : memref<1x32xf32, #tpu.memory_space<vmem>>, vector<1x32xf32>
    %c0_251 = arith.constant 0 : index
    %c0_252 = arith.constant 0 : index
    %511 = vector.load %arg31[%c0_251, %c0_252] : memref<1x32xf32, #tpu.memory_space<vmem>>, vector<1x32xf32>
    %cst_253 = arith.constant dense<0.000000e+00> : vector<32xf32>
    %512 = vector.multi_reduction <add>, %509, %cst_253 [1] : vector<32x32xf32> to vector<32xf32>
    %513 = vector.shape_cast %512 : vector<32xf32> to vector<32x1xf32>
    %cst_254 = arith.constant 3.200000e+01 : f32
    %514 = vector.broadcast %cst_254 : f32 to vector<32x1xf32>
    %515 = arith.divf %513, %514 : vector<32x1xf32>
    %516 = vector.broadcast %515 : vector<32x1xf32> to vector<32x32xf32>
    %517 = arith.subf %509, %516 : vector<32x32xf32>
    %518 = arith.mulf %517, %517 : vector<32x32xf32>
    %cst_255 = arith.constant dense<0.000000e+00> : vector<32xf32>
    %519 = vector.multi_reduction <add>, %518, %cst_255 [1] : vector<32x32xf32> to vector<32xf32>
    %520 = vector.shape_cast %519 : vector<32xf32> to vector<32x1xf32>
    %cst_256 = arith.constant 3.200000e+01 : f32
    %521 = vector.broadcast %cst_256 : f32 to vector<32x1xf32>
    %522 = arith.divf %520, %521 : vector<32x1xf32>
    %cst_257 = arith.constant 9.99999974E-6 : f32
    %523 = vector.broadcast %cst_257 : f32 to vector<32x1xf32>
    %524 = arith.addf %522, %523 : vector<32x1xf32>
    %525 = math.rsqrt %524 : vector<32x1xf32>
    %526 = vector.broadcast %525 : vector<32x1xf32> to vector<32x32xf32>
    %527 = arith.mulf %517, %526 : vector<32x32xf32>
    %528 = vector.broadcast %510 : vector<1x32xf32> to vector<32x32xf32>
    %529 = arith.mulf %527, %528 : vector<32x32xf32>
    %530 = vector.broadcast %511 : vector<1x32xf32> to vector<32x32xf32>
    %531 = arith.addf %529, %530 : vector<32x32xf32>
    %c0_258 = arith.constant 0 : index
    %c0_259 = arith.constant 0 : index
    %532 = vector.load %arg18[%c0_258, %c0_259] : memref<2x32xf32, #tpu.memory_space<vmem>>, vector<2x32xf32>
    %cst_260 = arith.constant dense<0.000000e+00> : vector<2x32xf32>
    %533 = tpu.matmul %532, %531, %cst_260 {dimension_numbers = #tpu.dot_dimension_numbers<[1], [0], [0], [1], [0, 0, 1, 1], [], []>} : vector<2x32xf32>, vector<32x32xf32>, vector<2x32xf32> -> vector<2x32xf32>
    %cst_261 = arith.constant dense<0.000000e+00> : vector<2x2xf32>
    %534 = tpu.matmul %266, %533, %cst_261 {dimension_numbers = #tpu.dot_dimension_numbers<[1], [1], [0], [0], [0, 0, 1, 0], [], []>} : vector<2x32xf32>, vector<2x32xf32>, vector<2x2xf32> -> vector<2x2xf32>
    %cst_262 = arith.constant 0.176776692 : f32
    %535 = vector.broadcast %cst_262 : f32 to vector<2x2xf32>
    %536 = arith.mulf %534, %535 : vector<2x2xf32>
    %c0_263 = arith.constant 0 : index
    %c0_264 = arith.constant 0 : index
    %537 = vector.load %arg32[%c0_263, %c0_264] : memref<2x2xf32, #tpu.memory_space<vmem>>, vector<2x2xf32>
    tpu.vector_store %arg32[%c0_263, %c0_264], %536 {strides = array<i32>} : memref<2x2xf32, #tpu.memory_space<vmem>>, vector<2x2xf32>,
    return
  }
}

</mosaic_0001>

<bundles_post_ra>
// kernel: clip_forward.1
= control target key start
LH: loop header
LB: loop body
LE: loop exit
PB: predicated region body
PF: predicated region fallthrough
CT: control target
= control target key end

     0   :  { %s14874_s6 = smov 1   ;;  %s14875_s10 = smov 2   ;;  %s16692_s0 = inlined_call_operand.smem [shape: u32[33], index: -1, kind: input, shape index: {}] }
   0x1   :  { %s14918_s5 = sld [smem:[%s16692_s0]]   ;;  %s14876_s14 = smov 3  }
   0x2   :  { %s14923_s9 = sld [smem:[%s16692_s0 + %s14874_s6]]   ;;  %s14877_s18 = smov 4  }
   0x3   :  { %s14928_s13 = sld [smem:[%s16692_s0 + %s14875_s10]]   ;;  %s14878_s22 = smov 5  }
   0x4   :  { %s14933_s17 = sld [smem:[%s16692_s0 + %s14876_s14]]   ;;  %s14879_s26 = smov 6  }
   0x5   :  { %s14938_s21 = sld [smem:[%s16692_s0 + %s14877_s18]]   ;;  %s14880_s30 = smov 7  }
   0x6   :  { %s14943_s25 = sld [smem:[%s16692_s0 + %s14878_s22]]   ;;  %s14881_s4 = smov 8  }
   0x7   :  { %s14948_s29 = sld [smem:[%s16692_s0 + %s14879_s26]]   ;;  %s14882_s10 = smov 9  }
   0x8   :  { %s14953_s3 = sld [smem:[%s16692_s0 + %s14880_s30]]   ;;  %s14883_s15 = smov 10  }
   0x9   :  { %16704 = sst [smem:[#allocation5_spill]] %s14928_s13  ;;  %s14884_s20 = smov 11  }
   0xa   :  { %s14958_s8 = sld [smem:[%s16692_s0 + %s14881_s4]]   ;;  %s14885_s26 = smov 12  }
   0xb   :  { %s14963_s14 = sld [smem:[%s16692_s0 + %s14882_s10]]   ;;  %s14886_s1 = smov 13  }
   0xc   :  { %s14968_s19 = sld [smem:[%s16692_s0 + %s14883_s15]]   ;;  %s14887_s7 = smov 14  }
   0xd   :  { %s14973_s24 = sld [smem:[%s16692_s0 + %s14884_s20]]   ;;  %s14888_s15 = smov 15  }
   0xe   :  { %s14978_s30 = sld [smem:[%s16692_s0 + %s14885_s26]]   ;;  %s14889_s22 = smov 16  }
   0xf   :  { %s14983_s6 = sld [smem:[%s16692_s0 + %s14886_s1]]   ;;  %s14890_s28 = smov 17  }
  0x10   :  { %s14988_s12 = sld [smem:[%s16692_s0 + %s14887_s7]]   ;;  %s14891_s7 = smov 18  }
  0x11   :  { %s14993_s20 = sld [smem:[%s16692_s0 + %s14888_s15]]   ;;  %s14892_s15 = smov 19  }
  0x12   :  { %s14998_s27 = sld [smem:[%s16692_s0 + %s14889_s22]]   ;;  %s14893_s22 = smov 20  }
  0x13   :  { %s15003_s4 = sld [smem:[%s16692_s0 + %s14890_s28]]   ;;  %s14894_s28 = smov 21  }
  0x14   :  { %s15008_s13 = sld [smem:[%s16692_s0 + %s14891_s7]]   ;;  %s14895_s7 = smov 22  }
  0x16   :  { %16705 = sst [smem:[#allocation6_spill]] %s14988_s12 }
  0x17   :  { %16706 = sst [smem:[#allocation7_spill]] %s14993_s20 }
  0x18   :  { %s15013_s20 = sld [smem:[%s16692_s0 + %s14892_s15]]   ;;  %s14896_s15 = smov 23  }
  0x19   :  { %16707 = sst [smem:[#allocation8_spill]] %s15003_s4 }
  0x1a   :  { %16708 = sst [smem:[#allocation9_spill]] %s15008_s13 }
  0x1b   :  { %s15018_s12 = sld [smem:[%s16692_s0 + %s14893_s22]]   ;;  %s14897_s22 = smov 24  }
  0x1c   :  { %s15023_s4 = sld [smem:[%s16692_s0 + %s14894_s28]]   ;;  %s14898_s28 = smov 25  }
  0x1d   :  { %s15028_s13 = sld [smem:[%s16692_s0 + %s14895_s7]]   ;;  %s14899_s7 = smov 26  }
  0x1e   :  { %16709 = sst [smem:[#allocation10_spill]] %s15013_s20 }
  0x1f   :  { %s15033_s20 = sld [smem:[%s16692_s0 + %s14896_s15]]   ;;  %s14900_s15 = smov 27  }
  0x21   :  { %16710 = sst [smem:[#allocation11_spill]] %s15018_s12 }
  0x22   :  { %16711 = sst [smem:[#allocation12_spill]] %s15023_s4 }
  0x23   :  { %16712 = sst [smem:[#allocation13_spill]] %s15028_s13 }
  0x24   :  { %s15038_s12 = sld [smem:[%s16692_s0 + %s14897_s22]]   ;;  %s14901_s22 = smov 28  }
  0x25   :  { %16713 = sst [smem:[#allocation14_spill]] %s15033_s20 }
  0x26   :  { %s15043_s4 = sld [smem:[%s16692_s0 + %s14898_s28]]   ;;  %s14902_s28 = smov 29  }
  0x27   :  { %s15048_s13 = sld [smem:[%s16692_s0 + %s14899_s7]]   ;;  %s14903_s7 = smov 30  }
  0x28   :  { %s15053_s20 = sld [smem:[%s16692_s0 + %s14900_s15]]   ;;  %s14904_s15 = smov 31  }
  0x2a   :  { %16714 = sst [smem:[#allocation15_spill]] %s15038_s12 }
  0x2b   :  { %s15058_s12 = sld [smem:[%s16692_s0 + %s14901_s22]]   ;;  %s14905_s22 = smov 32  }
  0x2c   :  { %16715 = sst [smem:[#allocation16_spill]] %s15043_s4 }
  0x2d   :  { %16716 = sst [smem:[#allocation17_spill]] %s15048_s13 }
  0x2e   :  { %16717 = sst [smem:[#allocation18_spill]] %s15053_s20 }
  0x2f   :  { %s15063_s4 = sld [smem:[%s16692_s0 + %s14902_s28]]  }
  0x30   :  { %s15068_s13 = sld [smem:[%s16692_s0 + %s14903_s7]]  }
  0x31   :  { %16718 = sst [smem:[#allocation19_spill]] %s15058_s12 }
  0x32   :  { %s15073_s20 = sld [smem:[%s16692_s0 + %s14904_s15]]  }
  0x33   :  { %s15078_s12 = sld [smem:[%s16692_s0 + %s14905_s22]]  }
  0x34   :  { %v15081_v0 = vld [vmem:[%s14918_s5] sm:$0xff]  ;;  %vm141_vm0 = vcmask 261120   ;;  %v15084_v1 = vld [vmem:[%s14918_s5 + $0x8] sm:$0xff] }
  0x35   :  { %70 = vsyncpa [#allocation3], 0  ;;  %v142_v2 = vsel %vm141_vm0, %v15081_v0, 0.0  ;;  %v145_v3 = vsel %vm141_vm0, %v15084_v1, 0.0  ;;  %v185_v14 = vld [vmem:[%s14943_s25] sm:$0xff]  ;;  %v186_v15 = vld [vmem:[%s14943_s25 + $0x8] sm:$0xff] }
  0x36   :  { %143 = vadd.xlane.f32.xlu0 %v142_v2  ;;  %v189_v16 = vld [vmem:[%s14943_s25 + $0x20] sm:$0xff]  ;;  %v13699_v17 = vpack.c.bf16 %v186_v15, %v185_v14  ;;  %v190_v18 = vld [vmem:[%s14943_s25 + $0x28] sm:$0xff]  ;;  %v187_v20 = vld [vmem:[%s14943_s25 + $0x10] sm:$0xff]  ;;  %vm1139_vm1 = vcmask 64512   ;;  %vm1504_vm3 = vcmask 130048   ;;  %s16721_s0 = sld [smem:[#allocation12_spill]] }
  0x37   :  { %v13707_v19 = vpack.c.bf16 %v190_v18, %v189_v16  ;;  %v188_v21 = vld [vmem:[%s14943_s25 + $0x18] sm:$0xff]  ;;  %v191_v22 = vld [vmem:[%s14943_s25 + $0x30] sm:$0xff]  ;;  %v193_v26 = vld [vmem:[%s14943_s25 + $0x40] sm:$0xff]  ;;  %vm14907_vm4 = vmmov 0   ;;  %s16722_s5 = sld [smem:[#allocation6_spill]]  ;;  %vm11144_vm5 = vcmask 9216  }
  0x38   :  { %13700 = vmatprep.subr.bf16.mxu0 %v13699_v17  ;;  %v13703_v23 = vpack.c.bf16 %v188_v21, %v187_v20  ;;  %v192_v24 = vld [vmem:[%s14943_s25 + $0x38] sm:$0xff]  ;;  %v194_v27 = vld [vmem:[%s14943_s25 + $0x48] sm:$0xff]  ;;  %v197_v28 = vld [vmem:[%s14943_s25 + $0x60] sm:$0xff] }
  0x39   :  { %13708 = vmatprep.subr.bf16.mxu1 %v13707_v19  ;;  %13702 = vmatpush3.bf16.msra.mxu0 %v13699_v17  ;;  %v13711_v25 = vpack.c.bf16 %v192_v24, %v191_v22  ;;  %v13715_v29 = vpack.c.bf16 %v194_v27, %v193_v26  ;;  %v198_v30 = vld [vmem:[%s14943_s25 + $0x68] sm:$0xff]  ;;  %v11192_v39 = vld [vmem:[%s14933_s17] ss:$0 sm:$0xff]  ;;  %v195_v46 = vld [vmem:[%s14943_s25 + $0x50] sm:$0xff] }
  0x3a   :  { %146 = vadd.xlane.f32.xlu0 %v145_v3  ;;  %13710 = vmatpush3.bf16.msra.mxu1 %v13707_v19  ;;  %v13723_v31 = vpack.c.bf16 %v198_v30, %v197_v28  ;;  %v11193_v41 = vld [vmem:[%s14938_s21] ss:$0 sm:$0xff]  ;;  %v196_v48 = vld [vmem:[%s14943_s25 + $0x58] sm:$0xff]  ;;  %v199_v49 = vld [vmem:[%s14943_s25 + $0x70] sm:$0xff] }
  0x3b   :  { %13704 = vmatprep.subr.bf16.mxu0 %v13703_v23  ;;  %13712 = vmatprep.subr.bf16.mxu1 %v13711_v25  ;;  %v200_v50 = vld [vmem:[%s14943_s25 + $0x78] sm:$0xff]  ;;  %v201_v52 = vld [vmem:[%s14943_s25 + $0x80] sm:$0xff]  ;;  %v13719_v53 = vpack.c.bf16 %v196_v48, %v195_v46  ;;  %v202_v55 = vld [vmem:[%s14943_s25 + $0x88] sm:$0xff] }
  0x3c   :  { %v13727_v54 = vpack.c.bf16 %v200_v50, %v199_v49  ;;  %v205_v56 = vld [vmem:[%s14943_s25 + $0xa0] sm:$0xff]  ;;  %v206_v57 = vld [vmem:[%s14943_s25 + $0xa8] sm:$0xff]  ;;  %v13731_v58 = vpack.c.bf16 %v202_v55, %v201_v52  ;;  %v203_v60 = vld [vmem:[%s14943_s25 + $0x90] sm:$0xff] }
  0x3d   :  { %13706 = vmatpush3.bf16.msra.mxu0 %v13703_v23  ;;  %v13739_v59 = vpack.c.bf16 %v206_v57, %v205_v56  ;;  %v204_v61 = vld [vmem:[%s14943_s25 + $0x98] sm:$0xff]  ;;  %v207_v62 = vld [vmem:[%s14943_s25 + $0xb0] sm:$0xff]  ;;  %v217_v15 = vld [vmem:[%s14943_s25 + $0x100] sm:$0xff] }
  0x3e   :  { %13714 = vmatpush3.bf16.msra.mxu1 %v13711_v25  ;;  %13716 = vmatprep.subr.bf16.mxu0 %v13715_v29  ;;  %v208_v63 = vld [vmem:[%s14943_s25 + $0xb8] sm:$0xff]  ;;  %v13735_v2 = vpack.c.bf16 %v204_v61, %v203_v60  ;;  %v218_v16 = vld [vmem:[%s14943_s25 + $0x108] sm:$0xff]  ;;  %v221_v18 = vld [vmem:[%s14943_s25 + $0x120] sm:$0xff] }
  0x3f   :  { %13724 = vmatprep.subr.bf16.mxu1 %v13723_v31  ;;  %v13743_v3 = vpack.c.bf16 %v208_v63, %v207_v62  ;;  %v222_v19 = vld [vmem:[%s14943_s25 + $0x128] sm:$0xff]  ;;  %v13763_v20 = vpack.c.bf16 %v218_v16, %v217_v15  ;;  %v219_v22 = vld [vmem:[%s14943_s25 + $0x110] sm:$0xff]  ;;  %v220_v23 = vld [vmem:[%s14943_s25 + $0x118] sm:$0xff] }
  0x40   :  { %v13771_v21 = vpack.c.bf16 %v222_v19, %v221_v18  ;;  %v223_v24 = vld [vmem:[%s14943_s25 + $0x130] sm:$0xff]  ;;  %v224_v25 = vld [vmem:[%s14943_s25 + $0x138] sm:$0xff]  ;;  %v13767_v26 = vpack.c.bf16 %v220_v23, %v219_v22  ;;  %v225_v27 = vld [vmem:[%s14943_s25 + $0x140] sm:$0xff] }
  0x41   :  { %v226_v28 = vld [vmem:[%s14943_s25 + $0x148] sm:$0xff]  ;;  %v229_v30 = vld [vmem:[%s14943_s25 + $0x160] sm:$0xff]  ;;  %vm15200_vm2 = vmpackc.low %vm1139_vm1, %vm1139_vm1 }
  0x42   :  { %v137_v16 = vld [vmem:[%s14923_s9] sm:$0xff] }
  0xc3   :  { %v144_v4 = vpop.xlane.xlu0 %143 }
  0xc4   :  { %v149_v5 = vmul.f32 0.03125, %v144_v4  ;;  %v209_v4 = vld [vmem:[%s14943_s25 + $0xc0] sm:$0xff] }
  0xc6   :  { %v151_v6 = vsub.f32 %v15081_v0, %v149_v5  ;;  %v210_v5 = vld [vmem:[%s14943_s25 + $0xc8] sm:$0xff] }
  0xc7   :  { %v147_v7 = vpop.xlane.xlu0 %146 }
  0xc8   :  { %v150_v8 = vmul.f32 0.03125, %v147_v7  ;;  %v153_v9 = vmul.f32 %v151_v6, %v151_v6  ;;  %v214_v7 = vld [vmem:[%s14943_s25 + $0xe8] sm:$0xff] }
  0xca   :  { %v152_v10 = vsub.f32 %v15084_v1, %v150_v8  ;;  %v155_v11 = vsel %vm141_vm0, %v153_v9, 0.0  ;;  %v13747_v8 = vpack.c.bf16 %v210_v5, %v209_v4 }
  0xcb   :  { %156 = vadd.xlane.f32.xlu1 %v155_v11  ;;  %v212_v11 = vld [vmem:[%s14943_s25 + $0xd8] sm:$0xff] }
  0xcc   :  { %v154_v12 = vmul.f32 %v152_v10, %v152_v10 }
  0xce   :  { %v158_v13 = vsel %vm141_vm0, %v154_v12, 0.0  ;;  %v215_v12 = vld [vmem:[%s14943_s25 + $0xf0] sm:$0xff] }
  0xcf   :  { %159 = vadd.xlane.f32.xlu1 %v158_v13  ;;  %v216_v13 = vld [vmem:[%s14943_s25 + $0xf8] sm:$0xff] }
  0xd0   :  { %v13759_v17 = vpack.c.bf16 %v216_v13, %v215_v12  ;;  %v138_v12 = vld [vmem:[%s14923_s9 + $0x8] sm:$0xff] }
 0x158   :  { %v157_v32 = vpop.xlane.xlu1 %156 }
 0x159   :  { %v161_v33 = vmul.f32 0.03125, %v157_v32  ;;  %v13779_v32 = vpack.c.bf16 %v226_v28, %v225_v27 }
 0x15b   :  { %v163_v34 = vadd.f32 1e-05, %v161_v33 }
 0x15c   :  { %v160_v35 = vpop.xlane.xlu1 %159 }
 0x15d   :  { %14564 = vrsqrt.f32 %v163_v34  ;;  %v162_v36 = vmul.f32 0.03125, %v160_v35  ;;  %v227_v34 = vld [vmem:[%s14943_s25 + $0x150] sm:$0xff]  ;;  %v228_v35 = vld [vmem:[%s14943_s25 + $0x158] sm:$0xff] }
 0x15f   :  { %v164_v37 = vadd.f32 1e-05, %v162_v36  ;;  %v231_v36 = vld [vmem:[%s14943_s25 + $0x170] sm:$0xff] }
 0x161   :  { %14566 = vrsqrt.f32 %v164_v37  ;;  %v232_v37 = vld [vmem:[%s14943_s25 + $0x178] sm:$0xff] }
 0x167   :  { %v14565_v38 = vpop.eup %14564 }
 0x168   :  { %v167_v40 = vmul.f32 %v14565_v38, %v151_v6  ;;  %v213_v6 = vld [vmem:[%s14943_s25 + $0xe0] sm:$0xff]  ;;  %v13783_v38 = vpack.c.bf16 %v228_v35, %v227_v34 }
 0x169   :  { %v13755_v9 = vpack.c.bf16 %v214_v7, %v213_v6 }
 0x16a   :  { %v175_v42 = vmul.f32 %v11192_v39, %v167_v40 }
 0x16b   :  { %v14567_v43 = vpop.eup %14566 }
 0x16c   :  { %v15108_v44 = vadd.f32 %v11193_v41, %v175_v42  ;;  %v168_v45 = vmul.f32 %v14567_v43, %v152_v10  ;;  %v211_v10 = vld [vmem:[%s14943_s25 + $0xd0] sm:$0xff] }
 0x16d   :  { %v13751_v14 = vpack.c.bf16 %v212_v11, %v211_v10 }
 0x16e   :  { %v176_v47 = vmul.f32 %v11192_v39, %v168_v45  ;;  %12448 = vmatprep.mubr.msk.f32.mxu0 %vm141_vm0, %v15108_v44  ;;  %12459 = vmatprep.mubr.msk.f32.mxu1 %vm141_vm0, %v15108_v44  ;;  %v13791_v39 = vpack.c.bf16 %v232_v37, %v231_v36 }
 0x170   :  { %v15118_v51 = vadd.f32 %v11193_v41, %v176_v47 }
 0x172   :  { %12449 = vmatmul.mubr.msk.f32.vlgmr.msra.gmra.mrb[0].mxu0 %vm141_vm0, %v15118_v51  ;;  %12460 = vmatmul.mubr.msk.f32.vlgmr.msra.gmra.mrb[0].mxu1 %vm141_vm0, %v15118_v51 }
 0x173   :  { %13718 = vmatpush3.bf16.msra.mxu0 %v13715_v29  ;;  %13726 = vmatpush3.bf16.msra.mxu1 %v13723_v31  ;;  %v13775_v29 = vpack.c.bf16 %v224_v25, %v223_v24  ;;  %v230_v31 = vld [vmem:[%s14943_s25 + $0x168] sm:$0xff] }
 0x174   :  { %12470 = vmatprep.mubr.msk.f32.mxu0 %vm141_vm0, %v15108_v44  ;;  %12481 = vmatprep.mubr.msk.f32.mxu1 %vm141_vm0, %v15108_v44  ;;  %v13787_v33 = vpack.c.bf16 %v230_v31, %v229_v30 }
 0x175   :  { %13720 = vmatprep.subr.bf16.mxu0 %v13719_v53  ;;  %13728 = vmatprep.subr.bf16.mxu1 %v13727_v54 }
 0x177   :  { %13722 = vmatpush3.bf16.msra.mxu0 %v13719_v53  ;;  %13730 = vmatpush3.bf16.msra.mxu1 %v13727_v54 }
 0x178   :  { %13732 = vmatprep.subr.bf16.mxu0 %v13731_v58  ;;  %13740 = vmatprep.subr.bf16.mxu1 %v13739_v59 }
 0x17a   :  { %12471 = vmatmul.mubr.msk.f32.vlgmr.msra.gmra.mrb[2].mxu0 %vm141_vm0, %v15118_v51  ;;  %12482 = vmatmul.mubr.msk.f32.vlgmr.msra.gmra.mrb[2].mxu1 %vm141_vm0, %v15118_v51 }
 0x17b   :  { %13734 = vmatpush3.bf16.msra.mxu0 %v13731_v58  ;;  %12492 = vmatprep.mubr.msk.f32.mxu0 %vm141_vm0, %v15108_v44 }
 0x17c   :  { %13742 = vmatpush3.bf16.msra.mxu1 %v13739_v59  ;;  %12503 = vmatprep.mubr.msk.f32.mxu1 %vm141_vm0, %v15108_v44 }
 0x17d   :  { %13736 = vmatprep.subr.bf16.mxu0 %v13735_v2  ;;  %13744 = vmatprep.subr.bf16.mxu1 %v13743_v3 }
 0x17f   :  { %13738 = vmatpush3.bf16.msra.mxu0 %v13735_v2 }
 0x180   :  { %13746 = vmatpush3.bf16.msra.mxu1 %v13743_v3  ;;  %13748 = vmatprep.subr.bf16.mxu0 %v13747_v8 }
 0x181   :  { %13756 = vmatprep.subr.bf16.mxu1 %v13755_v9 }
 0x182   :  { %12493 = vmatmul.mubr.msk.f32.vlgmr.msra.gmra.mrb[4].mxu0 %vm141_vm0, %v15118_v51 }
 0x183   :  { %12504 = vmatmul.mubr.msk.f32.vlgmr.msra.gmra.mrb[4].mxu1 %vm141_vm0, %v15118_v51  ;;  %13750 = vmatpush3.bf16.msra.mxu0 %v13747_v8 }
 0x184   :  { %12514 = vmatprep.mubr.msk.f32.mxu0 %vm141_vm0, %v15108_v44  ;;  %13758 = vmatpush3.bf16.msra.mxu1 %v13755_v9 }
 0x185   :  { %12525 = vmatprep.mubr.msk.f32.mxu1 %vm141_vm0, %v15108_v44  ;;  %13752 = vmatprep.subr.bf16.mxu0 %v13751_v14 }
 0x186   :  { %13760 = vmatprep.subr.bf16.mxu1 %v13759_v17 }
 0x187   :  { %13754 = vmatpush3.bf16.msra.mxu0 %v13751_v14 }
 0x188   :  { %13762 = vmatpush3.bf16.msra.mxu1 %v13759_v17  ;;  %13764 = vmatprep.subr.bf16.mxu0 %v13763_v20 }
 0x189   :  { %13772 = vmatprep.subr.bf16.mxu1 %v13771_v21 }
 0x18a   :  { %12515 = vmatmul.mubr.msk.f32.vlgmr.msra.gmra.mrb[6].mxu0 %vm141_vm0, %v15118_v51 }
 0x18b   :  { %12526 = vmatmul.mubr.msk.f32.vlgmr.msra.gmra.mrb[6].mxu1 %vm141_vm0, %v15118_v51  ;;  %13766 = vmatpush3.bf16.msra.mxu0 %v13763_v20 }
 0x18c   :  { %12536 = vmatprep.mubr.msk.f32.mxu0 %vm141_vm0, %v15108_v44  ;;  %13774 = vmatpush3.bf16.msra.mxu1 %v13771_v21 }
 0x18d   :  { %12547 = vmatprep.mubr.msk.f32.mxu1 %vm141_vm0, %v15108_v44  ;;  %13768 = vmatprep.subr.bf16.mxu0 %v13767_v26 }
 0x18e   :  { %13776 = vmatprep.subr.bf16.mxu1 %v13775_v29 }
 0x18f   :  { %13770 = vmatpush3.bf16.msra.mxu0 %v13767_v26 }
 0x190   :  { %13778 = vmatpush3.bf16.msra.mxu1 %v13775_v29  ;;  %13780 = vmatprep.subr.bf16.mxu0 %v13779_v32 }
 0x191   :  { %13788 = vmatprep.subr.bf16.mxu1 %v13787_v33 }
 0x192   :  { %12537 = vmatmul.mubr.msk.f32.vlgmr.msra.gmra.mrb[8].mxu0 %vm141_vm0, %v15118_v51 }
 0x193   :  { %12548 = vmatmul.mubr.msk.f32.vlgmr.msra.gmra.mrb[8].mxu1 %vm141_vm0, %v15118_v51  ;;  %13782 = vmatpush3.bf16.msra.mxu0 %v13779_v32 }
 0x194   :  { %12558 = vmatprep.mubr.msk.f32.mxu0 %vm141_vm0, %v15108_v44  ;;  %13790 = vmatpush3.bf16.msra.mxu1 %v13787_v33 }
 0x195   :  { %12569 = vmatprep.mubr.msk.f32.mxu1 %vm141_vm0, %v15108_v44  ;;  %13784 = vmatprep.subr.bf16.mxu0 %v13783_v38 }
 0x196   :  { %13792 = vmatprep.subr.bf16.mxu1 %v13791_v39 }
 0x197   :  { %13786 = vmatpush3.bf16.msra.mxu0 %v13783_v38 }
 0x198   :  { %13794 = vmatpush3.bf16.msra.mxu1 %v13791_v39 }
 0x19a   :  { %12559 = vmatmul.mubr.msk.f32.vlgmr.msra.gmra.mrb[10].mxu0 %vm141_vm0, %v15118_v51 }
 0x19b   :  { %12570 = vmatmul.mubr.msk.f32.vlgmr.msra.gmra.mrb[10].mxu1 %vm141_vm0, %v15118_v51 }
 0x245   :  { %v12450_v40 = vpop.f32.mrb[0].mxu0  ;;  %v12461_v41 = vpop.f32.mrb[0].mxu1 }
 0x246   :  { %v305_v42 = vpop.f32.mrb[1].mxu0  ;;  %v380_v43 = vpop.f32.mrb[1].mxu1 }
 0x247   :  { %12576 = vmatprep.mubr.msk.f32.mxu0 %vm1139_vm1, %v305_v42  ;;  %12583 = vmatprep.mubr.msk.f32.mxu1 %vm1139_vm1, %v380_v43 }
 0x24d   :  { %v12472_v44 = vpop.f32.mrb[2].mxu0  ;;  %v12483_v45 = vpop.f32.mrb[2].mxu1 }
 0x24e   :  { %v455_v46 = vpop.f32.mrb[3].mxu0  ;;  %v530_v47 = vpop.f32.mrb[3].mxu1 }
 0x255   :  { %v12494_v48 = vpop.f32.mrb[4].mxu0 }
 0x256   :  { %v12505_v49 = vpop.f32.mrb[4].mxu1  ;;  %v605_v50 = vpop.f32.mrb[5].mxu0 }
 0x257   :  { %v13795_v52 = vpack.c.bf16 %v12494_v48, %v605_v50  ;;  %v680_v53 = vpop.f32.mrb[5].mxu1 }
 0x258   :  { %v13801_v54 = vpack.c.bf16 %v12505_v49, %v680_v53 }
 0x259   :  { %13797 = vmatprep.subr.msk.bf16.mxu0 %vm15200_vm2, %v13795_v52 }
 0x25a   :  { %13803 = vmatprep.subr.msk.bf16.mxu1 %vm15200_vm2, %v13801_v54  ;;  %13800 = vmatpush3.bf16.xpose.msk.msra.mxu0 %vm15200_vm2, %v13795_v52 }
 0x25b   :  { %13806 = vmatpush3.bf16.xpose.msk.msra.mxu1 %vm15200_vm2, %v13801_v54 }
 0x25d   :  { %v12516_v55 = vpop.f32.mrb[6].mxu0 }
 0x25e   :  { %v12527_v56 = vpop.f32.mrb[6].mxu1  ;;  %v755_v57 = vpop.f32.mrb[7].mxu0 }
 0x25f   :  { %v13807_v58 = vpack.c.bf16 %v12516_v55, %v755_v57  ;;  %v830_v59 = vpop.f32.mrb[7].mxu1 }
 0x260   :  { %v13813_v60 = vpack.c.bf16 %v12527_v56, %v830_v59 }
 0x261   :  { %12577 = vmatmul.mubr.msk.f32.vlgmr.msra.gmra.mrb[12].mxu0 %vm1139_vm1, %v12450_v40  ;;  %13809 = vmatprep.subr.msk.bf16.mxu0 %vm15200_vm2, %v13807_v58 }
 0x262   :  { %12584 = vmatmul.mubr.msk.f32.vlgmr.msra.gmra.mrb[12].mxu1 %vm1139_vm1, %v12461_v41  ;;  %13815 = vmatprep.subr.msk.bf16.mxu1 %vm15200_vm2, %v13813_v60 }
 0x263   :  { %13812 = vmatpush3.bf16.xpose.msk.msra.mxu0 %vm15200_vm2, %v13807_v58  ;;  %12590 = vmatprep.mubr.msk.f32.mxu0 %vm1139_vm1, %v455_v46 }
 0x264   :  { %13818 = vmatpush3.bf16.xpose.msk.msra.mxu1 %vm15200_vm2, %v13813_v60  ;;  %12597 = vmatprep.mubr.msk.f32.mxu1 %vm1139_vm1, %v530_v47 }
 0x265   :  { %v12538_v61 = vpop.f32.mrb[8].mxu0 }
 0x266   :  { %v12549_v62 = vpop.f32.mrb[8].mxu1  ;;  %v905_v63 = vpop.f32.mrb[9].mxu0 }
 0x267   :  { %v13819_v2 = vpack.c.bf16 %v12538_v61, %v905_v63  ;;  %v980_v3 = vpop.f32.mrb[9].mxu1 }
 0x268   :  { %v13823_v4 = vpack.c.bf16 %v12549_v62, %v980_v3 }
 0x269   :  { %13820 = vmatprep.subr.bf16.mxu0 %v13819_v2 }
 0x26a   :  { %12591 = vmatmul.mubr.msk.f32.vlgmr.msra.gmra.mrb[14].mxu0 %vm1139_vm1, %v12472_v44  ;;  %13824 = vmatprep.subr.bf16.mxu1 %v13823_v4 }
 0x26b   :  { %12598 = vmatmul.mubr.msk.f32.vlgmr.msra.gmra.mrb[14].mxu1 %vm1139_vm1, %v12483_v45  ;;  %13822 = vmatpush3.bf16.msra.mxu0 %v13819_v2 }
 0x26c   :  { %13826 = vmatpush3.bf16.msra.mxu1 %v13823_v4 }
 0x26d   :  { %v12560_v5 = vpop.f32.mrb[10].mxu0 }
 0x26e   :  { %v12571_v6 = vpop.f32.mrb[10].mxu1  ;;  %v1055_v7 = vpop.f32.mrb[11].mxu0 }
 0x26f   :  { %v15226_v8 = vpack.c.bf16 %v12560_v5, %v1055_v7  ;;  %v1130_v9 = vpop.f32.mrb[11].mxu1 }
 0x270   :  { %v15228_v10 = vpack.c.bf16 %v12571_v6, %v1130_v9 }
 0x271   :  { %13828 = vmatprep.subr.bf16.mxu0 %v15226_v8 }
 0x272   :  { %13832 = vmatprep.subr.bf16.mxu1 %v15228_v10 }
 0x334   :  { %v12578_v11 = vpop.f32.mrb[12].mxu0 }
 0x335   :  { %v1489_v13 = vmul.f32 0.35355338, %v12578_v11  ;;  %v12585_v14 = vpop.f32.mrb[12].mxu1  ;;  %v1218_v15 = vpop.f32.mrb[13].mxu0 }
 0x336   :  { %v1491_v17 = vmul.f32 0.35355338, %v12585_v14  ;;  %v1488_v18 = vmul.f32 0.35355338, %v1218_v15  ;;  %v1305_v19 = vpop.f32.mrb[13].mxu1 }
 0x337   :  { %v1490_v20 = vmul.f32 0.35355338, %v1305_v19  ;;  %v1497_v21 = vadd.f32 %v1489_v13, %v138_v12 }
 0x338   :  { %v1496_v22 = vadd.f32 %v1488_v18, %v137_v16  ;;  %v1499_v24 = vadd.f32 %v1491_v17, %v138_v12 }
 0x339   :  { %v1508_v23 = vsel %vm1504_vm3, %v1497_v21, -inf  ;;  %v1498_v26 = vadd.f32 %v1490_v20, %v137_v16 }
 0x33a   :  { %1509 = vmax.xlane.f32.xlu1 %v1508_v23  ;;  %v1505_v25 = vsel %vm1504_vm3, %v1496_v22, -inf  ;;  %v1514_v28 = vsel %vm1504_vm3, %v1499_v24, -inf }
 0x33b   :  { %1506 = vmax.xlane.f32.xlu0 %v1505_v25  ;;  %v1511_v32 = vsel %vm1504_vm3, %v1498_v26, -inf }
 0x33d   :  { %v12592_v27 = vpop.f32.mrb[14].mxu0 }
 0x33e   :  { %v1493_v29 = vmul.f32 0.35355338, %v12592_v27  ;;  %v12599_v30 = vpop.f32.mrb[14].mxu1  ;;  %v1392_v31 = vpop.f32.mrb[15].mxu0  ;;  %1515 = vmax.xlane.f32.xlu1 %v1514_v28 }
 0x33f   :  { %v1495_v33 = vmul.f32 0.35355338, %v12599_v30  ;;  %v1492_v34 = vmul.f32 0.35355338, %v1392_v31  ;;  %v1479_v35 = vpop.f32.mrb[15].mxu1  ;;  %1512 = vmax.xlane.f32.xlu0 %v1511_v32 }
 0x340   :  { %v1494_v36 = vmul.f32 0.35355338, %v1479_v35  ;;  %v1501_v37 = vadd.f32 %v1493_v29, %v138_v12 }
 0x341   :  { %v1500_v38 = vadd.f32 %v1492_v34, %v137_v16  ;;  %v1503_v40 = vadd.f32 %v1495_v33, %v138_v12 }
 0x342   :  { %v1520_v39 = vsel %vm1504_vm3, %v1501_v37, -inf  ;;  %v1502_v42 = vadd.f32 %v1494_v36, %v137_v16 }
 0x343   :  { %1521 = vmax.xlane.f32.xlu1 %v1520_v39  ;;  %v1517_v41 = vsel %vm1504_vm3, %v1500_v38, -inf  ;;  %v1526_v43 = vsel %vm1504_vm3, %v1503_v40, -inf  ;;  %v1917_v39 = vld [vmem:[%s14948_s29] sm:$0xff] }
 0x344   :  { %1518 = vmax.xlane.f32.xlu0 %v1517_v41  ;;  %v1523_v44 = vsel %vm1504_vm3, %v1502_v42, -inf }
 0x347   :  { %1527 = vmax.xlane.f32.xlu1 %v1526_v43 }
 0x348   :  { %1524 = vmax.xlane.f32.xlu0 %v1523_v44 }
 0x3c7   :  { %v1510_v45 = vpop.xlane.xlu1 %1509 }
 0x3c8   :  { %v1530_v46 = vsub.f32 %v1497_v21, %v1510_v45  ;;  %v1507_v47 = vpop.xlane.xlu0 %1506 }
 0x3c9   :  { %v1529_v48 = vsub.f32 %v1496_v22, %v1507_v47 }
 0x3ca   :  { %v1539_v49 = vmul.f32 1.442695, %v1530_v46 }
 0x3cb   :  { %v1537_v50 = vmul.f32 1.442695, %v1529_v48  ;;  %v1516_v52 = vpop.xlane.xlu1 %1515 }
 0x3cc   :  { %14568 = vpow2.f32 %v1539_v49  ;;  %v1532_v53 = vsub.f32 %v1499_v24, %v1516_v52  ;;  %v1513_v54 = vpop.xlane.xlu0 %1512 }
 0x3cd   :  { %14570 = vpow2.f32 %v1537_v50  ;;  %v1531_v55 = vsub.f32 %v1498_v26, %v1513_v54  ;;  %v1918_v50 = vld [vmem:[%s14948_s29 + $0x8] sm:$0xff] }
 0x3ce   :  { %v1543_v56 = vmul.f32 1.442695, %v1532_v53  ;;  %v1919_v53 = vld [vmem:[%s14948_s29 + $0x10] sm:$0xff] }
 0x3cf   :  { %v1541_v57 = vmul.f32 1.442695, %v1531_v55 }
 0x3d0   :  { %14572 = vpow2.f32 %v1543_v56  ;;  %v1522_v58 = vpop.xlane.xlu1 %1521 }
 0x3d1   :  { %14574 = vpow2.f32 %v1541_v57  ;;  %v1534_v59 = vsub.f32 %v1501_v37, %v1522_v58  ;;  %v1519_v60 = vpop.xlane.xlu0 %1518  ;;  %v1920_v58 = vld [vmem:[%s14948_s29 + $0x18] sm:$0xff] }
 0x3d2   :  { %v1533_v61 = vsub.f32 %v1500_v38, %v1519_v60 }
 0x3d3   :  { %v1547_v62 = vmul.f32 1.442695, %v1534_v59 }
 0x3d4   :  { %v1545_v63 = vmul.f32 1.442695, %v1533_v61  ;;  %v1528_v2 = vpop.xlane.xlu1 %1527 }
 0x3d5   :  { %14576 = vpow2.f32 %v1547_v62  ;;  %v1536_v3 = vsub.f32 %v1503_v40, %v1528_v2  ;;  %v1525_v4 = vpop.xlane.xlu0 %1524  ;;  %v11250_v62 = vld [vmem:[%s14953_s3] ss:$0 sm:$0xff] }
 0x3d6   :  { %v14569_v5 = vpop.eup %14568  ;;  %14578 = vpow2.f32 %v1545_v63  ;;  %v1535_v6 = vsub.f32 %v1502_v42, %v1525_v4 }
 0x3d7   :  { %v14571_v7 = vpop.eup %14570  ;;  %v1551_v9 = vmul.f32 1.442695, %v1536_v3  ;;  %v1556_v11 = vsel %vm1504_vm3, %v14569_v5, 0.0 }
 0x3d8   :  { %v1549_v12 = vmul.f32 1.442695, %v1535_v6  ;;  %1557 = vadd.xlane.f32.xlu1 %v1556_v11  ;;  %v1553_v13 = vsel %vm1504_vm3, %v14571_v7, 0.0 }
 0x3d9   :  { %14580 = vpow2.f32 %v1551_v9  ;;  %1554 = vadd.xlane.f32.xlu0 %v1553_v13 }
 0x3da   :  { %v14573_v14 = vpop.eup %14572  ;;  %14582 = vpow2.f32 %v1549_v12 }
 0x3db   :  { %v14575_v15 = vpop.eup %14574  ;;  %v1562_v16 = vsel %vm1504_vm3, %v14573_v14, 0.0 }
 0x3dc   :  { %1563 = vadd.xlane.f32.xlu1 %v1562_v16  ;;  %v1559_v17 = vsel %vm1504_vm3, %v14575_v15, 0.0 }
 0x3dd   :  { %1560 = vadd.xlane.f32.xlu0 %v1559_v17 }
 0x3df   :  { %v14577_v18 = vpop.eup %14576 }
 0x3e0   :  { %v14579_v19 = vpop.eup %14578  ;;  %v1568_v20 = vsel %vm1504_vm3, %v14577_v18, 0.0 }
 0x3e1   :  { %1569 = vadd.xlane.f32.xlu1 %v1568_v20  ;;  %v1565_v21 = vsel %vm1504_vm3, %v14579_v19, 0.0  ;;  %v2308_v20 = vld [vmem:[%s14968_s19 + $0x10] sm:$0xff] }
 0x3e2   :  { %1566 = vadd.xlane.f32.xlu0 %v1565_v21 }
 0x3e3   :  { %v14581_v22 = vpop.eup %14580 }
 0x3e4   :  { %v14583_v23 = vpop.eup %14582  ;;  %v1574_v24 = vsel %vm1504_vm3, %v14581_v22, 0.0 }
 0x3e5   :  { %1575 = vadd.xlane.f32.xlu1 %v1574_v24  ;;  %v1571_v25 = vsel %vm1504_vm3, %v14583_v23, 0.0 }
 0x3e6   :  { %1572 = vadd.xlane.f32.xlu0 %v1571_v25 }
 0x465   :  { %v1558_v26 = vpop.xlane.xlu1 %1557 }
 0x466   :  { %14584 = vrcp.f32 %v1558_v26  ;;  %v1555_v27 = vpop.xlane.xlu0 %1554 }
 0x467   :  { %14586 = vrcp.f32 %v1555_v27 }
 0x469   :  { %v1564_v28 = vpop.xlane.xlu1 %1563 }
 0x46a   :  { %14588 = vrcp.f32 %v1564_v28  ;;  %v1561_v29 = vpop.xlane.xlu0 %1560 }
 0x46b   :  { %14590 = vrcp.f32 %v1561_v29 }
 0x46e   :  { %v1570_v30 = vpop.xlane.xlu1 %1569 }
 0x46f   :  { %14592 = vrcp.f32 %v1570_v30  ;;  %v1567_v31 = vpop.xlane.xlu0 %1566 }
 0x470   :  { %v14585_v32 = vpop.eup %14584  ;;  %14594 = vrcp.f32 %v1567_v31  ;;  %v11251_v31 = vld [vmem:[%s14958_s8] ss:$0 sm:$0xff] }
 0x471   :  { %v14587_v33 = vpop.eup %14586  ;;  %v1586_v37 = vmul.f32 %v14585_v32, %v14569_v5 }
 0x472   :  { %v1576_v34 = vpop.xlane.xlu1 %1575  ;;  %v1585_v35 = vmul.f32 %v14587_v33, %v14571_v7 }
 0x473   :  { %14596 = vrcp.f32 %v1576_v34  ;;  %v1573_v36 = vpop.xlane.xlu0 %1572 }
 0x474   :  { %v14589_v38 = vpop.eup %14588  ;;  %14598 = vrcp.f32 %v1573_v36  ;;  %12604 = vmatprep.mubr.msk.f32.mxu0 %vm1504_vm3, %v1585_v35  ;;  %v11252_v35 = vld [vmem:[%s14963_s14] ss:$0 sm:$0xff] }
 0x475   :  { %v14591_v40 = vpop.eup %14590  ;;  %12605 = vmatmul.mubr.msk.f32.vlgmr.msra.gmra.mrb[16].mxu0 %vm1504_vm3, %v1586_v37  ;;  %v1588_v42 = vmul.f32 %v14589_v38, %v14573_v14 }
 0x476   :  { %13830 = vmatpush3.bf16.msra.mxu0 %v15226_v8  ;;  %v1587_v41 = vmul.f32 %v14591_v40, %v14575_v15  ;;  %v2416_v40 = vld [vmem:[%s14978_s30] sm:$0xff] }
 0x477   :  { %12628 = vmatprep.subr.mxu0 %v1917_v39 }
 0x478   :  { %12611 = vmatprep.mubr.msk.f32.mxu1 %vm1504_vm3, %v1587_v41  ;;  %v2417_v41 = vld [vmem:[%s14978_s30 + $0x8] sm:$0xff] }
 0x479   :  { %v14593_v43 = vpop.eup %14592  ;;  %12612 = vmatmul.mubr.msk.f32.vlgmr.msra.gmra.mrb[16].mxu1 %vm1504_vm3, %v1588_v42  ;;  %v13843_v42 = vpack.c.bf16 %v2417_v41, %v2416_v40 }
 0x47a   :  { %v14595_v44 = vpop.eup %14594  ;;  %13834 = vmatpush3.bf16.msra.mxu1 %v15228_v10  ;;  %v1590_v46 = vmul.f32 %v14593_v43, %v14577_v18  ;;  %v2306_v18 = vld [vmem:[%s14968_s19] sm:$0xff]  ;;  %v2418_v43 = vld [vmem:[%s14978_s30 + $0x10] sm:$0xff] }
 0x47b   :  { %v1589_v45 = vmul.f32 %v14595_v44, %v14579_v19  ;;  %v2307_v19 = vld [vmem:[%s14968_s19 + $0x8] sm:$0xff]  ;;  %v2419_v44 = vld [vmem:[%s14978_s30 + $0x18] sm:$0xff] }
 0x47c   :  { %v13835_v21 = vpack.c.bf16 %v2307_v19, %v2306_v18 }
 0x47d   :  { %v14597_v47 = vpop.eup %14596  ;;  %12618 = vmatprep.mubr.msk.f32.mxu0 %vm1504_vm3, %v1589_v45  ;;  %v13847_v45 = vpack.c.bf16 %v2419_v44, %v2418_v43  ;;  %v11261_v43 = vld [vmem:[%s14943_s25 + $0x180] sm:$0xff]  ;;  %v11262_v44 = vld [vmem:[%s14943_s25 + $0x188] sm:$0xff] }
 0x47e   :  { %v14599_v48 = vpop.eup %14598  ;;  %12619 = vmatmul.mubr.msk.f32.vlgmr.msra.gmra.mrb[18].mxu0 %vm1504_vm3, %v1590_v46  ;;  %v1592_v49 = vmul.f32 %v14597_v47, %v14581_v22  ;;  %v2309_v22 = vld [vmem:[%s14968_s19 + $0x18] sm:$0xff]  ;;  %13836 = vmatprep.subr.bf16.mxu1 %v13835_v21  ;;  %v2420_v46 = vld [vmem:[%s14978_s30 + $0x20] sm:$0xff]  ;;  %v2421_v47 = vld [vmem:[%s14978_s30 + $0x28] sm:$0xff] }
 0x47f   :  { %v1591_v8 = vmul.f32 %v14599_v48, %v14583_v23  ;;  %12629 = vmatpush3.msra.mxu0 %v1917_v39  ;;  %v13839_v23 = vpack.c.bf16 %v2309_v22, %v2308_v20  ;;  %v13851_v48 = vpack.c.bf16 %v2421_v47, %v2420_v46  ;;  %v13875_v46 = vpack.c.bf16 %v11262_v44, %v11261_v43  ;;  %v11278_v47 = vld [vmem:[%s14943_s25 + $0x208] sm:$0xff]  ;;  %v11304_v43 = vld [vmem:[%s14943_s25 + $0x2d8] sm:$0xff] }
 0x480   :  { %12633 = vmatprep.subr.mxu0 %v1918_v50 }
 0x481   :  { %12625 = vmatprep.mubr.msk.f32.mxu1 %vm1504_vm3, %v1591_v8  ;;  %v2422_v8 = vld [vmem:[%s14978_s30 + $0x30] sm:$0xff] }
 0x482   :  { %12626 = vmatmul.mubr.msk.f32.vlgmr.msra.gmra.mrb[18].mxu1 %vm1504_vm3, %v1592_v49  ;;  %v2423_v49 = vld [vmem:[%s14978_s30 + $0x38] sm:$0xff] }
 0x483   :  { %13838 = vmatpush3.bf16.msra.mxu1 %v13835_v21 }
 0x484   :  { %13840 = vmatprep.subr.bf16.mxu1 %v13839_v23 }
 0x487   :  { %13842 = vmatpush3.bf16.msra.mxu1 %v13839_v23 }
 0x488   :  { %13844 = vmatprep.subr.bf16.mxu1 %v13843_v42 }
 0x548   :  { %v12606_v10 = vpop.f32.mrb[16].mxu0 }
 0x549   :  { %v1665_v52 = vpop.f32.mrb[17].mxu0 }
 0x54a   :  { %12630 = vmatprep.mubr.msk.f32.mxu0 %vm1139_vm1, %v1665_v52  ;;  %v2425_v52 = vld [vmem:[%s14978_s30 + $0x48] sm:$0xff] }
 0x54b   :  { %12631 = vmatmul.mubr.msk.f32.vlgmr.msra.gmra.mrb[20].mxu0 %vm1139_vm1, %v12606_v10  ;;  %v2424_v10 = vld [vmem:[%s14978_s30 + $0x40] sm:$0xff] }
 0x54c   :  { %v12613_v54 = vpop.f32.mrb[16].mxu1  ;;  %12634 = vmatpush3.msra.mxu0 %v1918_v50  ;;  %v13855_v50 = vpack.c.bf16 %v2423_v49, %v2422_v8  ;;  %v11263_v8 = vld [vmem:[%s14943_s25 + $0x190] sm:$0xff]  ;;  %v11264_v49 = vld [vmem:[%s14943_s25 + $0x198] sm:$0xff] }
 0x54d   :  { %v1746_v55 = vpop.f32.mrb[17].mxu1  ;;  %12638 = vmatprep.subr.mxu0 %v1919_v53 }
 0x54e   :  { %12635 = vmatprep.mubr.msk.f32.mxu0 %vm1139_vm1, %v1746_v55  ;;  %v2427_v55 = vld [vmem:[%s14978_s30 + $0x58] sm:$0xff] }
 0x551   :  { %v12620_v56 = vpop.f32.mrb[18].mxu0 }
 0x552   :  { %v1827_v57 = vpop.f32.mrb[19].mxu0 }
 0x553   :  { %12636 = vmatmul.mubr.msk.f32.vlgmr.msra.gmra.mrb[20].mxu0 %vm1139_vm1, %v12613_v54  ;;  %v13859_v54 = vpack.c.bf16 %v2425_v52, %v2424_v10  ;;  %v13879_v10 = vpack.c.bf16 %v11264_v49, %v11263_v8  ;;  %v11280_v52 = vld [vmem:[%s14943_s25 + $0x218] sm:$0xff]  ;;  %v11283_v8 = vld [vmem:[%s14943_s25 + $0x230] sm:$0xff] }
 0x554   :  { %12639 = vmatpush3.msra.mxu0 %v1919_v53  ;;  %12640 = vmatprep.mubr.msk.f32.mxu0 %vm1139_vm1, %v1827_v57  ;;  %v2426_v53 = vld [vmem:[%s14978_s30 + $0x50] sm:$0xff]  ;;  %v2428_v57 = vld [vmem:[%s14978_s30 + $0x60] sm:$0xff]  ;;  %v11284_v49 = vld [vmem:[%s14943_s25 + $0x238] sm:$0xff] }
 0x555   :  { %v12627_v59 = vpop.f32.mrb[18].mxu1  ;;  %12643 = vmatprep.subr.mxu0 %v1920_v58 }
 0x556   :  { %v1908_v60 = vpop.f32.mrb[19].mxu1 }
 0x55b   :  { %12641 = vmatmul.mubr.msk.f32.vlgmr.msra.gmra.mrb[20].mxu0 %vm1139_vm1, %v12620_v56  ;;  %v13863_v56 = vpack.c.bf16 %v2427_v55, %v2426_v53  ;;  %v11266_v55 = vld [vmem:[%s14943_s25 + $0x1a8] sm:$0xff] }
 0x55c   :  { %12644 = vmatpush3.msra.mxu0 %v1920_v58  ;;  %12645 = vmatprep.mubr.msk.f32.mxu0 %vm1139_vm1, %v1908_v60  ;;  %v2429_v58 = vld [vmem:[%s14978_s30 + $0x68] sm:$0xff]  ;;  %v2430_v60 = vld [vmem:[%s14978_s30 + $0x70] sm:$0xff] }
 0x55d   :  { %13876 = vmatprep.subr.bf16.mxu0 %v13875_v46 }
 0x563   :  { %12646 = vmatmul.mubr.msk.f32.vlgmr.msra.gmra.mrb[20].mxu0 %vm1139_vm1, %v12627_v59  ;;  %v13867_v59 = vpack.c.bf16 %v2429_v58, %v2428_v57  ;;  %v11286_v58 = vld [vmem:[%s14943_s25 + $0x248] sm:$0xff] }
 0x564   :  { %13878 = vmatpush3.bf16.msra.mxu0 %v13875_v46  ;;  %v11282_v46 = vld [vmem:[%s14943_s25 + $0x228] sm:$0xff] }
 0x565   :  { %13880 = vmatprep.subr.bf16.mxu0 %v13879_v10 }
 0x568   :  { %13882 = vmatpush3.bf16.msra.mxu0 %v13879_v10  ;;  %v11289_v10 = vld [vmem:[%s14943_s25 + $0x260] sm:$0xff] }
 0x636   :  { %v12647_v61 = vpop.f32.mrb[20].mxu0 }
 0x637   :  { %v2252_v63 = vadd.f32 %v12647_v61, %v15084_v1  ;;  %v2236_v2 = vpop.f32.mrb[21].mxu0  ;;  %v2431_v61 = vld [vmem:[%s14978_s30 + $0x78] sm:$0xff] }
 0x638   :  { %v2251_v3 = vadd.f32 %v2236_v2, %v15081_v0 }
 0x639   :  { %v15275_v4 = vadd.f32 %v11250_v62, %v2252_v63  ;;  %v11253_v63 = vld [vmem:[%s14973_s24] ss:$0 sm:$0xff] }
 0x63a   :  { %v15277_v5 = vadd.f32 %v11250_v62, %v2251_v3  ;;  %v13871_v62 = vpack.c.bf16 %v2431_v61, %v2430_v60 }
 0x63b   :  { %v2267_v6 = vsel %vm141_vm0, %v15275_v4, 0.0 }
 0x63c   :  { %2268 = vadd.xlane.f32.xlu1 %v2267_v6  ;;  %v2264_v7 = vsel %vm141_vm0, %v15277_v5, 0.0 }
 0x63d   :  { %2265 = vadd.xlane.f32.xlu0 %v2264_v7 }
 0x6c9   :  { %v2269_v9 = vpop.xlane.xlu1 %2268 }
 0x6ca   :  { %v2271_v1 = vmul.f32 0.03125, %v2269_v9  ;;  %v2266_v11 = vpop.xlane.xlu0 %2265 }
 0x6cb   :  { %v2270_v0 = vmul.f32 0.03125, %v2266_v11 }
 0x6cc   :  { %v2273_v12 = vsub.f32 %v15275_v4, %v2271_v1 }
 0x6cd   :  { %v2272_v13 = vsub.f32 %v15277_v5, %v2270_v0 }
 0x6ce   :  { %v2275_v14 = vmul.f32 %v2273_v12, %v2273_v12 }
 0x6cf   :  { %v2274_v15 = vmul.f32 %v2272_v13, %v2272_v13 }
 0x6d0   :  { %v2279_v16 = vsel %vm141_vm0, %v2275_v14, 0.0 }
 0x6d1   :  { %2280 = vadd.xlane.f32.xlu1 %v2279_v16  ;;  %v2276_v17 = vsel %vm141_vm0, %v2274_v15, 0.0 }
 0x6d2   :  { %2277 = vadd.xlane.f32.xlu0 %v2276_v17 }
 0x75e   :  { %v2281_v24 = vpop.xlane.xlu1 %2280 }
 0x75f   :  { %v2283_v25 = vmul.f32 0.03125, %v2281_v24  ;;  %v2278_v26 = vpop.xlane.xlu0 %2277 }
 0x760   :  { %v2282_v27 = vmul.f32 0.03125, %v2278_v26 }
 0x761   :  { %v2285_v28 = vadd.f32 1e-05, %v2283_v25 }
 0x762   :  { %v2284_v29 = vadd.f32 1e-05, %v2282_v27  ;;  %v11256_v27 = vld [vmem:[%s14983_s6] ss:$0 sm:$0xff] }
 0x763   :  { %14600 = vrsqrt.f32 %v2285_v28 }
 0x764   :  { %14602 = vrsqrt.f32 %v2284_v29 }
 0x76d   :  { %v14601_v30 = vpop.eup %14600 }
 0x76e   :  { %v14603_v32 = vpop.eup %14602  ;;  %v2289_v33 = vmul.f32 %v14601_v30, %v2273_v12 }
 0x76f   :  { %v2288_v34 = vmul.f32 %v14603_v32, %v2272_v13 }
 0x770   :  { %v2297_v36 = vmul.f32 %v11251_v31, %v2289_v33 }
 0x771   :  { %v2296_v37 = vmul.f32 %v11251_v31, %v2288_v34 }
 0x772   :  { %v2305_v39 = vadd.f32 %v11252_v35, %v2297_v36 }
 0x773   :  { %v2304_v38 = vadd.f32 %v11252_v35, %v2296_v37 }
 0x775   :  { %12656 = vmatprep.mubr.msk.f32.mxu1 %vm141_vm0, %v2304_v38 }
 0x776   :  { %12657 = vmatmul.mubr.msk.f32.vlgmr.msra.gmra.mrb[20].mxu1 %vm141_vm0, %v2305_v39 }
 0x777   :  { %13846 = vmatpush3.bf16.msra.mxu1 %v13843_v42 }
 0x778   :  { %13848 = vmatprep.subr.bf16.mxu1 %v13847_v45 }
 0x77b   :  { %13850 = vmatpush3.bf16.msra.mxu1 %v13847_v45  ;;  %v11277_v45 = vld [vmem:[%s14943_s25 + $0x200] sm:$0xff] }
 0x77c   :  { %13852 = vmatprep.subr.bf16.mxu1 %v13851_v48 }
 0x77f   :  { %13854 = vmatpush3.bf16.msra.mxu1 %v13851_v48  ;;  %v13907_v48 = vpack.c.bf16 %v11278_v47, %v11277_v45  ;;  %v11281_v45 = vld [vmem:[%s14943_s25 + $0x220] sm:$0xff] }
 0x780   :  { %13856 = vmatprep.subr.bf16.mxu1 %v13855_v50 }
 0x783   :  { %13858 = vmatpush3.bf16.msra.mxu1 %v13855_v50  ;;  %v11279_v50 = vld [vmem:[%s14943_s25 + $0x210] sm:$0xff] }
 0x784   :  { %13860 = vmatprep.subr.bf16.mxu1 %v13859_v54  ;;  %v13911_v53 = vpack.c.bf16 %v11280_v52, %v11279_v50  ;;  %v13919_v50 = vpack.c.bf16 %v11284_v49, %v11283_v8  ;;  %v11290_v52 = vld [vmem:[%s14943_s25 + $0x268] sm:$0xff] }
 0x787   :  { %13862 = vmatpush3.bf16.msra.mxu1 %v13859_v54  ;;  %v11265_v54 = vld [vmem:[%s14943_s25 + $0x1a0] sm:$0xff] }
 0x788   :  { %13864 = vmatprep.subr.bf16.mxu1 %v13863_v56  ;;  %v13883_v57 = vpack.c.bf16 %v11266_v55, %v11265_v54  ;;  %v11291_v54 = vld [vmem:[%s14943_s25 + $0x270] sm:$0xff]  ;;  %v11292_v55 = vld [vmem:[%s14943_s25 + $0x278] sm:$0xff] }
 0x78a   :  { %13884 = vmatprep.subr.bf16.mxu0 %v13883_v57 }
 0x78b   :  { %13866 = vmatpush3.bf16.msra.mxu1 %v13863_v56  ;;  %v11285_v56 = vld [vmem:[%s14943_s25 + $0x240] sm:$0xff] }
 0x78c   :  { %13868 = vmatprep.subr.bf16.mxu1 %v13867_v59 }
 0x78f   :  { %13870 = vmatpush3.bf16.msra.mxu1 %v13867_v59  ;;  %v13923_v59 = vpack.c.bf16 %v11286_v58, %v11285_v56  ;;  %v13935_v56 = vpack.c.bf16 %v11292_v55, %v11291_v54  ;;  %v11298_v58 = vld [vmem:[%s14943_s25 + $0x2a8] sm:$0xff] }
 0x790   :  { %13872 = vmatprep.subr.bf16.mxu1 %v13871_v62 }
 0x793   :  { %13874 = vmatpush3.bf16.msra.mxu1 %v13871_v62 }
 0x794   :  { %13908 = vmatprep.subr.bf16.mxu1 %v13907_v48 }
 0x849   :  { %v12658_v2 = vpop.f32.mrb[20].mxu1 }
 0x84a   :  { %v2395_v3 = vadd.f32 %v12658_v2, %v11253_v63  ;;  %v2389_v6 = vpop.f32.mrb[21].mxu1 }
 0x84b   :  { %v2390_v7 = vadd.f32 %v11253_v63, %v2389_v6 }
 0x84c   :  { %v2399_v9 = vmul.f32 %v2395_v3, %v2395_v3 }
 0x84d   :  { %v2398_v1 = vmul.f32 %v2390_v7, %v2390_v7 }
 0x84e   :  { %v2401_v11 = vmul.f32 %v2399_v9, %v2395_v3 }
 0x84f   :  { %v2400_v0 = vmul.f32 %v2398_v1, %v2390_v7 }
 0x850   :  { %v2403_v12 = vmul.f32 0.044715, %v2401_v11 }
 0x851   :  { %v2402_v13 = vmul.f32 0.044715, %v2400_v0  ;;  %v11260_v0 = vld [vmem:[%s14938_s21 + $0x1] ss:$0 sm:$0xff]  ;;  %s16725_s21 = sld [smem:[#allocation11_spill]] }
 0x852   :  { %v2405_v14 = vadd.f32 %v2403_v12, %v2395_v3 }
 0x853   :  { %v2404_v15 = vadd.f32 %v2402_v13, %v2390_v7 }
 0x854   :  { %v2407_v16 = vmul.f32 0.7978846, %v2405_v14  ;;  %v11267_v14 = vld [vmem:[%s14943_s25 + $0x1b0] sm:$0xff] }
 0x855   :  { %v2406_v17 = vmul.f32 0.7978846, %v2404_v15  ;;  %v11268_v15 = vld [vmem:[%s14943_s25 + $0x1b8] sm:$0xff] }
 0x856   :  { %14604 = vtanh.f32 %v2407_v16  ;;  %v11287_v16 = vld [vmem:[%s14943_s25 + $0x250] sm:$0xff] }
 0x857   :  { %14606 = vtanh.f32 %v2406_v17  ;;  %v11288_v17 = vld [vmem:[%s14943_s25 + $0x258] sm:$0xff] }
 0x860   :  { %v14605_v18 = vpop.eup %14604 }
 0x861   :  { %v14607_v19 = vpop.eup %14606  ;;  %v2411_v20 = vadd.f32 1.0, %v14605_v18 }
 0x862   :  { %v2410_v21 = vadd.f32 1.0, %v14607_v19 }
 0x863   :  { %v2413_v22 = vmul.f32 0.5, %v2411_v20  ;;  %v11269_v20 = vld [vmem:[%s14943_s25 + $0x1c0] sm:$0xff] }
 0x864   :  { %v2412_v23 = vmul.f32 0.5, %v2410_v21  ;;  %v13887_v21 = vpack.c.bf16 %v11268_v15, %v11267_v14 }
 0x865   :  { %v2415_v25 = vmul.f32 %v2413_v22, %v2395_v3  ;;  %v13927_v22 = vpack.c.bf16 %v11288_v17, %v11287_v16 }
 0x866   :  { %v2414_v24 = vmul.f32 %v2412_v23, %v2390_v7  ;;  %v11259_v7 = vld [vmem:[%s14933_s17 + $0x1] ss:$0 sm:$0xff]  ;;  %v11270_v23 = vld [vmem:[%s14943_s25 + $0x1c8] sm:$0xff]  ;;  %s16724_s17 = sld [smem:[#allocation10_spill]] }
 0x868   :  { %12691 = vmatprep.mubr.f32.mxu1 %v2414_v24  ;;  %v11293_v24 = vld [vmem:[%s14943_s25 + $0x280] sm:$0xff] }
 0x869   :  { %12692 = vmatmul.mubr.f32.vlgmr.msra.gmra.mrb[22].mxu1 %v2415_v25  ;;  %v11294_v25 = vld [vmem:[%s14943_s25 + $0x288] sm:$0xff] }
 0x86a   :  { %13910 = vmatpush3.bf16.msra.mxu1 %v13907_v48  ;;  %v13915_v48 = vpack.c.bf16 %v11282_v46, %v11281_v45  ;;  %v14840_v45 = vld [vmem:[%s14923_s9 + $0x8] sm:$0xff] }
 0x86b   :  { %13912 = vmatprep.subr.bf16.mxu1 %v13911_v53 }
 0x86e   :  { %13914 = vmatpush3.bf16.msra.mxu1 %v13911_v53  ;;  %v13931_v53 = vpack.c.bf16 %v11290_v52, %v11289_v10 }
 0x86f   :  { %13924 = vmatprep.subr.bf16.mxu1 %v13923_v59 }
 0x93c   :  { %v12693_v26 = vpop.f32.mrb[22].mxu1 }
 0x93d   :  { %v2508_v28 = vadd.f32 %v12693_v26, %v15275_v4  ;;  %v2498_v29 = vpop.f32.mrb[23].mxu1  ;;  %v13891_v26 = vpack.c.bf16 %v11270_v23, %v11269_v20 }
 0x93e   :  { %v2507_v30 = vadd.f32 %v2498_v29, %v15277_v5  ;;  %v11272_v29 = vld [vmem:[%s14943_s25 + $0x1d8] sm:$0xff] }
 0x93f   :  { %v15315_v31 = vadd.f32 %v11256_v27, %v2508_v28  ;;  %v11271_v28 = vld [vmem:[%s14943_s25 + $0x1d0] sm:$0xff] }
 0x940   :  { %v15317_v32 = vadd.f32 %v11256_v27, %v2507_v30  ;;  %v13939_v27 = vpack.c.bf16 %v11294_v25, %v11293_v24  ;;  %v11295_v30 = vld [vmem:[%s14943_s25 + $0x290] sm:$0xff] }
 0x941   :  { %v2525_v33 = vsel %vm141_vm0, %v15315_v31, 0.0 }
 0x942   :  { %2526 = vadd.xlane.f32.xlu1 %v2525_v33  ;;  %v2522_v34 = vsel %vm141_vm0, %v15317_v32, 0.0  ;;  %v11296_v33 = vld [vmem:[%s14943_s25 + $0x298] sm:$0xff] }
 0x943   :  { %2523 = vadd.xlane.f32.xlu0 %v2522_v34  ;;  %v13895_v34 = vpack.c.bf16 %v11272_v29, %v11271_v28 }
 0x9cf   :  { %v2527_v35 = vpop.xlane.xlu1 %2526 }
 0x9d0   :  { %v2529_v4 = vmul.f32 0.03125, %v2527_v35  ;;  %v2524_v36 = vpop.xlane.xlu0 %2523  ;;  %v13943_v35 = vpack.c.bf16 %v11296_v33, %v11295_v30 }
 0x9d1   :  { %v2528_v5 = vmul.f32 0.03125, %v2524_v36  ;;  %v11274_v36 = vld [vmem:[%s14943_s25 + $0x1e8] sm:$0xff] }
 0x9d2   :  { %v2531_v37 = vsub.f32 %v15315_v31, %v2529_v4  ;;  %v11273_v4 = vld [vmem:[%s14943_s25 + $0x1e0] sm:$0xff] }
 0x9d3   :  { %v2530_v38 = vsub.f32 %v15317_v32, %v2528_v5  ;;  %v11301_v5 = vld [vmem:[%s14943_s25 + $0x2c0] sm:$0xff] }
 0x9d4   :  { %v2533_v39 = vmul.f32 %v2531_v37, %v2531_v37 }
 0x9d5   :  { %v2532_v40 = vmul.f32 %v2530_v38, %v2530_v38 }
 0x9d6   :  { %v2537_v41 = vsel %vm141_vm0, %v2533_v39, 0.0 }
 0x9d7   :  { %2538 = vadd.xlane.f32.xlu1 %v2537_v41  ;;  %v2534_v42 = vsel %vm141_vm0, %v2532_v40, 0.0  ;;  %v11275_v40 = vld [vmem:[%s14943_s25 + $0x1f0] sm:$0xff]  ;;  %v11276_v41 = vld [vmem:[%s14943_s25 + $0x1f8] sm:$0xff] }
 0x9d8   :  { %2535 = vadd.xlane.f32.xlu0 %v2534_v42  ;;  %v11303_v42 = vld [vmem:[%s14943_s25 + $0x2d0] sm:$0xff]  ;;  %v13903_v44 = vpack.c.bf16 %v11276_v41, %v11275_v40 }
 0x9d9   :  { %v13959_v47 = vpack.c.bf16 %v11304_v43, %v11303_v42 }
 0xa64   :  { %v2539_v60 = vpop.xlane.xlu1 %2538 }
 0xa65   :  { %v2541_v61 = vmul.f32 0.03125, %v2539_v60  ;;  %v2536_v62 = vpop.xlane.xlu0 %2535  ;;  %v11299_v60 = vld [vmem:[%s14943_s25 + $0x2b0] sm:$0xff] }
 0xa66   :  { %v2540_v63 = vmul.f32 0.03125, %v2536_v62 }
 0xa67   :  { %v2543_v2 = vadd.f32 1e-05, %v2541_v61  ;;  %v11300_v61 = vld [vmem:[%s14943_s25 + $0x2b8] sm:$0xff] }
 0xa68   :  { %v2542_v3 = vadd.f32 1e-05, %v2540_v63  ;;  %v13951_v62 = vpack.c.bf16 %v11300_v61, %v11299_v60  ;;  %v11305_v63 = vld [vmem:[%s14943_s25 + $0x2e0] sm:$0xff] }
 0xa69   :  { %14608 = vrsqrt.f32 %v2543_v2  ;;  %v11306_v2 = vld [vmem:[%s14943_s25 + $0x2e8] sm:$0xff] }
 0xa6a   :  { %14610 = vrsqrt.f32 %v2542_v3  ;;  %v13963_v3 = vpack.c.bf16 %v11306_v2, %v11305_v63 }
 0xa73   :  { %v14609_v6 = vpop.eup %14608 }
 0xa74   :  { %v14611_v9 = vpop.eup %14610  ;;  %v2547_v1 = vmul.f32 %v14609_v6, %v2531_v37  ;;  %v11302_v37 = vld [vmem:[%s14943_s25 + $0x2c8] sm:$0xff]  ;;  %v11307_v6 = vld [vmem:[%s14943_s25 + $0x2f0] sm:$0xff] }
 0xa75   :  { %v2546_v11 = vmul.f32 %v14611_v9, %v2530_v38  ;;  %v13899_v38 = vpack.c.bf16 %v11274_v36, %v11273_v4  ;;  %v13955_v39 = vpack.c.bf16 %v11302_v37, %v11301_v5 }
 0xa76   :  { %v2555_v12 = vmul.f32 %v11259_v7, %v2547_v1 }
 0xa77   :  { %v2554_v13 = vmul.f32 %v11259_v7, %v2546_v11  ;;  %v11308_v7 = vld [vmem:[%s14943_s25 + $0x2f8] sm:$0xff] }
 0xa78   :  { %v15347_v19 = vadd.f32 %v11260_v0, %v2555_v12  ;;  %v13967_v9 = vpack.c.bf16 %v11308_v7, %v11307_v6 }
 0xa79   :  { %v15345_v18 = vadd.f32 %v11260_v0, %v2554_v13 }
 0xa7b   :  { %12702 = vmatprep.mubr.msk.f32.mxu0 %vm141_vm0, %v15345_v18  ;;  %12746 = vmatprep.mubr.msk.f32.mxu1 %vm141_vm0, %v15345_v18 }
 0xa7c   :  { %12703 = vmatmul.mubr.msk.f32.vlgmr.msra.gmra.mrb[22].mxu0 %vm141_vm0, %v15347_v19  ;;  %12747 = vmatmul.mubr.msk.f32.vlgmr.msra.gmra.mrb[24].mxu1 %vm141_vm0, %v15347_v19 }
 0xa7d   :  { %13886 = vmatpush3.bf16.msra.mxu0 %v13883_v57  ;;  %13926 = vmatpush3.bf16.msra.mxu1 %v13923_v59  ;;  %v11297_v57 = vld [vmem:[%s14943_s25 + $0x2a0] sm:$0xff]  ;;  %s16726_s25 = sld [smem:[#allocation5_spill]] }
 0xa7e   :  { %12713 = vmatprep.mubr.msk.f32.mxu0 %vm141_vm0, %v15345_v18  ;;  %12768 = vmatprep.mubr.msk.f32.mxu1 %vm141_vm0, %v15345_v18  ;;  %v13947_v59 = vpack.c.bf16 %v11298_v58, %v11297_v57 }
 0xa7f   :  { %13888 = vmatprep.subr.bf16.mxu0 %v13887_v21  ;;  %13928 = vmatprep.subr.bf16.mxu1 %v13927_v22 }
 0xa81   :  { %13890 = vmatpush3.bf16.msra.mxu0 %v13887_v21  ;;  %13930 = vmatpush3.bf16.msra.mxu1 %v13927_v22 }
 0xa82   :  { %13892 = vmatprep.subr.bf16.mxu0 %v13891_v26  ;;  %13940 = vmatprep.subr.bf16.mxu1 %v13939_v27 }
 0xa84   :  { %12714 = vmatmul.mubr.msk.f32.vlgmr.msra.gmra.mrb[24].mxu0 %vm141_vm0, %v15347_v19  ;;  %12769 = vmatmul.mubr.msk.f32.vlgmr.msra.gmra.mrb[26].mxu1 %vm141_vm0, %v15347_v19 }
 0xa85   :  { %13894 = vmatpush3.bf16.msra.mxu0 %v13891_v26  ;;  %12724 = vmatprep.mubr.msk.f32.mxu0 %vm141_vm0, %v15345_v18 }
 0xa86   :  { %13942 = vmatpush3.bf16.msra.mxu1 %v13939_v27  ;;  %12790 = vmatprep.mubr.msk.f32.mxu1 %vm141_vm0, %v15345_v18 }
 0xa87   :  { %13896 = vmatprep.subr.bf16.mxu0 %v13895_v34  ;;  %13944 = vmatprep.subr.bf16.mxu1 %v13943_v35 }
 0xa89   :  { %13898 = vmatpush3.bf16.msra.mxu0 %v13895_v34 }
 0xa8a   :  { %13946 = vmatpush3.bf16.msra.mxu1 %v13943_v35  ;;  %13900 = vmatprep.subr.bf16.mxu0 %v13899_v38 }
 0xa8b   :  { %13956 = vmatprep.subr.bf16.mxu1 %v13955_v39 }
 0xa8c   :  { %12725 = vmatmul.mubr.msk.f32.vlgmr.msra.gmra.mrb[26].mxu0 %vm141_vm0, %v15347_v19 }
 0xa8d   :  { %12791 = vmatmul.mubr.msk.f32.vlgmr.msra.gmra.mrb[28].mxu1 %vm141_vm0, %v15347_v19  ;;  %13902 = vmatpush3.bf16.msra.mxu0 %v13899_v38 }
 0xa8e   :  { %12735 = vmatprep.mubr.msk.f32.mxu0 %vm141_vm0, %v15345_v18  ;;  %13958 = vmatpush3.bf16.msra.mxu1 %v13955_v39 }
 0xa8f   :  { %12812 = vmatprep.mubr.msk.f32.mxu1 %vm141_vm0, %v15345_v18  ;;  %13904 = vmatprep.subr.bf16.mxu0 %v13903_v44 }
 0xa90   :  { %13960 = vmatprep.subr.bf16.mxu1 %v13959_v47 }
 0xa91   :  { %13906 = vmatpush3.bf16.msra.mxu0 %v13903_v44 }
 0xa92   :  { %13962 = vmatpush3.bf16.msra.mxu1 %v13959_v47  ;;  %13916 = vmatprep.subr.bf16.mxu0 %v13915_v48  ;;  %v14841_v47 = vld [vmem:[%s14923_s9] sm:$0xff]  ;;  %s16723_s9 = sld [smem:[#allocation7_spill]] }
 0xa94   :  { %12736 = vmatmul.mubr.msk.f32.vlgmr.msra.gmra.mrb[28].mxu0 %vm141_vm0, %v15347_v19 }
 0xa95   :  { %12813 = vmatmul.mubr.msk.f32.vlgmr.msra.gmra.mrb[30].mxu1 %vm141_vm0, %v15347_v19  ;;  %13918 = vmatpush3.bf16.msra.mxu0 %v13915_v48 }
 0xa96   :  { %12757 = vmatprep.mubr.msk.f32.mxu0 %vm141_vm0, %v15345_v18  ;;  %13920 = vmatprep.subr.bf16.mxu0 %v13919_v50 }
 0xa99   :  { %13922 = vmatpush3.bf16.msra.mxu0 %v13919_v50 }
 0xa9a   :  { %13932 = vmatprep.subr.bf16.mxu0 %v13931_v53 }
 0xa9c   :  { %12758 = vmatmul.mubr.msk.f32.vlgmr.msra.gmra.mrb[30].mxu0 %vm141_vm0, %v15347_v19 }
 0xa9d   :  { %13934 = vmatpush3.bf16.msra.mxu0 %v13931_v53  ;;  %12779 = vmatprep.mubr.msk.f32.mxu0 %vm141_vm0, %v15345_v18 }
 0xa9e   :  { %13936 = vmatprep.subr.bf16.mxu0 %v13935_v56 }
 0xaa1   :  { %13938 = vmatpush3.bf16.msra.mxu0 %v13935_v56 }
 0xaa2   :  { %13948 = vmatprep.subr.bf16.mxu0 %v13947_v59 }
 0xaa4   :  { %12780 = vmatmul.mubr.msk.f32.vlgmr.msra.gmra.mrb[32].mxu0 %vm141_vm0, %v15347_v19 }
 0xaa5   :  { %13950 = vmatpush3.bf16.msra.mxu0 %v13947_v59  ;;  %12801 = vmatprep.mubr.msk.f32.mxu0 %vm141_vm0, %v15345_v18 }
 0xaa6   :  { %13952 = vmatprep.subr.bf16.mxu0 %v13951_v62 }
 0xaa9   :  { %13954 = vmatpush3.bf16.msra.mxu0 %v13951_v62 }
 0xaaa   :  { %13964 = vmatprep.subr.bf16.mxu0 %v13963_v3 }
 0xaac   :  { %12802 = vmatmul.mubr.msk.f32.vlgmr.msra.gmra.mrb[34].mxu0 %vm141_vm0, %v15347_v19 }
 0xaad   :  { %13966 = vmatpush3.bf16.msra.mxu0 %v13963_v3  ;;  %12823 = vmatprep.mubr.msk.f32.mxu0 %vm141_vm0, %v15345_v18 }
 0xaae   :  { %13968 = vmatprep.subr.bf16.mxu0 %v13967_v9 }
 0xab1   :  { %13970 = vmatpush3.bf16.msra.mxu0 %v13967_v9 }
 0xab4   :  { %12824 = vmatmul.mubr.msk.f32.vlgmr.msra.gmra.mrb[36].mxu0 %vm141_vm0, %v15347_v19 }
 0xb4f   :  { %v12704_v1 = vpop.f32.mrb[22].mxu0  ;;  %v12748_v11 = vpop.f32.mrb[24].mxu1 }
 0xb50   :  { %v2685_v0 = vpop.f32.mrb[23].mxu0  ;;  %v2985_v12 = vpop.f32.mrb[25].mxu1 }
 0xb51   :  { %v13971_v13 = vpack.c.bf16 %v12748_v11, %v2985_v12  ;;  %12830 = vmatprep.mubr.msk.f32.mxu1 %vm1139_vm1, %v2685_v0 }
 0xb53   :  { %13973 = vmatprep.subr.msk.bf16.mxu1 %vm15200_vm2, %v13971_v13 }
 0xb54   :  { %13976 = vmatpush3.bf16.xpose.msk.msra.mxu1 %vm15200_vm2, %v13971_v13 }
 0xb57   :  { %v12715_v14 = vpop.f32.mrb[24].mxu0  ;;  %v12770_v15 = vpop.f32.mrb[26].mxu1 }
 0xb58   :  { %v2760_v16 = vpop.f32.mrb[25].mxu0  ;;  %v3135_v17 = vpop.f32.mrb[27].mxu1 }
 0xb59   :  { %v13983_v18 = vpack.c.bf16 %v12770_v15, %v3135_v17  ;;  %12837 = vmatprep.mubr.msk.f32.mxu0 %vm1139_vm1, %v2760_v16 }
 0xb5b   :  { %13985 = vmatprep.subr.msk.bf16.mxu1 %vm15200_vm2, %v13983_v18  ;;  %12831 = vmatmul.mubr.msk.f32.vlgmr.msra.gmra.mrb[32].mxu1 %vm1139_vm1, %v12704_v1 }
 0xb5c   :  { %13988 = vmatpush3.bf16.xpose.msk.msra.mxu1 %vm15200_vm2, %v13983_v18 }
 0xb5f   :  { %v12726_v19 = vpop.f32.mrb[26].mxu0 }
 0xb60   :  { %v12792_v20 = vpop.f32.mrb[28].mxu1  ;;  %v2835_v21 = vpop.f32.mrb[27].mxu0 }
 0xb61   :  { %v3285_v22 = vpop.f32.mrb[29].mxu1  ;;  %12844 = vmatprep.mubr.msk.f32.mxu1 %vm1139_vm1, %v2835_v21 }
 0xb62   :  { %v13995_v23 = vpack.c.bf16 %v12792_v20, %v3285_v22 }
 0xb63   :  { %12845 = vmatmul.mubr.msk.f32.vlgmr.msra.gmra.mrb[34].mxu1 %vm1139_vm1, %v12726_v19 }
 0xb64   :  { %13996 = vmatprep.subr.bf16.mxu1 %v13995_v23 }
 0xb65   :  { %13998 = vmatpush3.bf16.msra.mxu1 %v13995_v23 }
 0xb67   :  { %v12737_v24 = vpop.f32.mrb[28].mxu0 }
 0xb68   :  { %v12814_v25 = vpop.f32.mrb[30].mxu1  ;;  %v2910_v26 = vpop.f32.mrb[29].mxu0 }
 0xb69   :  { %v3435_v27 = vpop.f32.mrb[31].mxu1 }
 0xb6a   :  { %v14003_v28 = vpack.c.bf16 %v12814_v25, %v3435_v27 }
 0xb6f   :  { %v12759_v29 = vpop.f32.mrb[30].mxu0 }
 0xb70   :  { %v3060_v30 = vpop.f32.mrb[31].mxu0 }
 0xb71   :  { %v13977_v33 = vpack.c.bf16 %v12759_v29, %v3060_v30 }
 0xb73   :  { %13979 = vmatprep.subr.msk.bf16.mxu0 %vm15200_vm2, %v13977_v33 }
 0xb74   :  { %13982 = vmatpush3.bf16.xpose.msk.msra.mxu0 %vm15200_vm2, %v13977_v33 }
 0xb77   :  { %v12781_v34 = vpop.f32.mrb[32].mxu0 }
 0xb78   :  { %v3210_v35 = vpop.f32.mrb[33].mxu0 }
 0xb79   :  { %v13989_v4 = vpack.c.bf16 %v12781_v34, %v3210_v35 }
 0xb7b   :  { %12838 = vmatmul.mubr.msk.f32.vlgmr.msra.gmra.mrb[38].mxu0 %vm1139_vm1, %v12715_v14  ;;  %13991 = vmatprep.subr.msk.bf16.mxu0 %vm15200_vm2, %v13989_v4 }
 0xb7c   :  { %13994 = vmatpush3.bf16.xpose.msk.msra.mxu0 %vm15200_vm2, %v13989_v4  ;;  %12851 = vmatprep.mubr.msk.f32.mxu0 %vm1139_vm1, %v2910_v26 }
 0xb7d   :  { %14004 = vmatprep.subr.bf16.mxu0 %v14003_v28 }
 0xb7f   :  { %v12803_v36 = vpop.f32.mrb[34].mxu0 }
 0xb80   :  { %v3360_v5 = vpop.f32.mrb[35].mxu0 }
 0xb81   :  { %v15452_v37 = vpack.c.bf16 %v12803_v36, %v3360_v5 }
 0xb83   :  { %12852 = vmatmul.mubr.msk.f32.vlgmr.msra.gmra.mrb[40].mxu0 %vm1139_vm1, %v12737_v24  ;;  %14000 = vmatprep.subr.bf16.mxu1 %v15452_v37 }
 0xb84   :  { %14006 = vmatpush3.bf16.msra.mxu0 %v14003_v28 }
 0xb87   :  { %v12825_v38 = vpop.f32.mrb[36].mxu0 }
 0xb88   :  { %v3510_v39 = vpop.f32.mrb[37].mxu0 }
 0xb89   :  { %v15456_v40 = vpack.c.bf16 %v12825_v38, %v3510_v39 }
 0xc2e   :  { %v12832_v41 = vpop.f32.mrb[32].mxu1 }
 0xc2f   :  { %v3868_v42 = vmul.f32 0.35355338, %v12832_v41  ;;  %v3597_v43 = vpop.f32.mrb[33].mxu1 }
 0xc30   :  { %v3867_v44 = vmul.f32 0.35355338, %v3597_v43 }
 0xc31   :  { %v3876_v46 = vadd.f32 %v14840_v45, %v3868_v42 }
 0xc32   :  { %v3875_v48 = vadd.f32 %v14841_v47, %v3867_v44 }
 0xc33   :  { %v3886_v8 = vsel %vm1504_vm3, %v3876_v46, -inf }
 0xc34   :  { %3887 = vmax.xlane.f32.xlu1 %v3886_v8  ;;  %v3883_v49 = vsel %vm1504_vm3, %v3875_v48, -inf }
 0xc35   :  { %3884 = vmax.xlane.f32.xlu0 %v3883_v49 }
 0xc36   :  { %v12846_v50 = vpop.f32.mrb[34].mxu1 }
 0xc37   :  { %v3771_v10 = vpop.f32.mrb[35].mxu1  ;;  %v3872_v53 = vmul.f32 0.35355338, %v12846_v50 }
 0xc38   :  { %v3871_v56 = vmul.f32 0.35355338, %v3771_v10 }
 0xc39   :  { %v3880_v61 = vadd.f32 %v14840_v45, %v3872_v53 }
 0xc3a   :  { %v3879_v63 = vadd.f32 %v14841_v47, %v3871_v56 }
 0xc3b   :  { %v3898_v7 = vsel %vm1504_vm3, %v3880_v61, -inf }
 0xc3c   :  { %v3895_v1 = vsel %vm1504_vm3, %v3879_v63, -inf }
 0xc4e   :  { %v12839_v52 = vpop.f32.mrb[38].mxu0 }
 0xc4f   :  { %v3870_v54 = vmul.f32 0.35355338, %v12839_v52  ;;  %v3684_v55 = vpop.f32.mrb[39].mxu0 }
 0xc50   :  { %v3869_v57 = vmul.f32 0.35355338, %v3684_v55 }
 0xc51   :  { %v3878_v58 = vadd.f32 %v14840_v45, %v3870_v54 }
 0xc52   :  { %v3877_v59 = vadd.f32 %v14841_v47, %v3869_v57 }
 0xc53   :  { %v3892_v60 = vsel %vm1504_vm3, %v3878_v58, -inf }
 0xc54   :  { %3893 = vmax.xlane.f32.xlu1 %v3892_v60  ;;  %v3889_v62 = vsel %vm1504_vm3, %v3877_v59, -inf }
 0xc55   :  { %3890 = vmax.xlane.f32.xlu0 %v3889_v62 }
 0xc56   :  { %v12853_v2 = vpop.f32.mrb[40].mxu0 }
 0xc57   :  { %v3874_v3 = vmul.f32 0.35355338, %v12853_v2  ;;  %v3858_v6 = vpop.f32.mrb[41].mxu0 }
 0xc58   :  { %v3873_v9 = vmul.f32 0.35355338, %v3858_v6  ;;  %3899 = vmax.xlane.f32.xlu1 %v3898_v7 }
 0xc59   :  { %3896 = vmax.xlane.f32.xlu0 %v3895_v1  ;;  %v3882_v11 = vadd.f32 %v14840_v45, %v3874_v3 }
 0xc5a   :  { %v3881_v0 = vadd.f32 %v14841_v47, %v3873_v9 }
 0xc5b   :  { %v3904_v12 = vsel %vm1504_vm3, %v3882_v11, -inf }
 0xc5c   :  { %3905 = vmax.xlane.f32.xlu1 %v3904_v12  ;;  %v3901_v13 = vsel %vm1504_vm3, %v3881_v0, -inf }
 0xc5d   :  { %3902 = vmax.xlane.f32.xlu0 %v3901_v13 }
 0xcc1   :  { %v3888_v14 = vpop.xlane.xlu1 %3887 }
 0xcc2   :  { %v3908_v15 = vsub.f32 %v3876_v46, %v3888_v14  ;;  %v3885_v16 = vpop.xlane.xlu0 %3884 }
 0xcc3   :  { %v3907_v17 = vsub.f32 %v3875_v48, %v3885_v16 }
 0xcc4   :  { %v3917_v18 = vmul.f32 1.442695, %v3908_v15 }
 0xcc5   :  { %v3915_v19 = vmul.f32 1.442695, %v3907_v17 }
 0xcc6   :  { %14612 = vpow2.f32 %v3917_v18  ;;  %v11357_v18 = vld [vmem:[%s14948_s29 + $0x20] sm:$0xff] }
 0xcc7   :  { %14614 = vpow2.f32 %v3915_v19  ;;  %12882 = vmatprep.subr.mxu0 %v11357_v18 }
 0xcd0   :  { %v14613_v20 = vpop.eup %14612 }
 0xcd1   :  { %v14615_v21 = vpop.eup %14614  ;;  %v3934_v22 = vsel %vm1504_vm3, %v14613_v20, 0.0 }
 0xcd2   :  { %3935 = vadd.xlane.f32.xlu1 %v3934_v22  ;;  %v3931_v23 = vsel %vm1504_vm3, %v14615_v21, 0.0 }
 0xcd3   :  { %3932 = vadd.xlane.f32.xlu0 %v3931_v23 }
 0xce1   :  { %v3894_v24 = vpop.xlane.xlu1 %3893 }
 0xce2   :  { %v3910_v25 = vsub.f32 %v3878_v58, %v3894_v24  ;;  %v3891_v26 = vpop.xlane.xlu0 %3890  ;;  %v11360_v24 = vld [vmem:[%s14948_s29 + $0x38] sm:$0xff] }
 0xce3   :  { %v3909_v27 = vsub.f32 %v3877_v59, %v3891_v26 }
 0xce4   :  { %v3921_v28 = vmul.f32 1.442695, %v3910_v25 }
 0xce5   :  { %v3919_v29 = vmul.f32 1.442695, %v3909_v27  ;;  %v3900_v30 = vpop.xlane.xlu1 %3899 }
 0xce6   :  { %14616 = vpow2.f32 %v3921_v28  ;;  %v3912_v33 = vsub.f32 %v3880_v61, %v3900_v30  ;;  %v3897_v34 = vpop.xlane.xlu0 %3896  ;;  %v11370_v30 = vld [vmem:[%s14953_s3 + $0x1] ss:$0 sm:$0xff]  ;;  %s16728_s3 = sld [smem:[#allocation13_spill]] }
 0xce7   :  { %14618 = vpow2.f32 %v3919_v29  ;;  %v3911_v35 = vsub.f32 %v3879_v63, %v3897_v34 }
 0xce8   :  { %v3925_v4 = vmul.f32 1.442695, %v3912_v33 }
 0xce9   :  { %v3923_v36 = vmul.f32 1.442695, %v3911_v35  ;;  %v3906_v5 = vpop.xlane.xlu1 %3905 }
 0xcea   :  { %14620 = vpow2.f32 %v3925_v4  ;;  %v3914_v38 = vsub.f32 %v3882_v11, %v3906_v5  ;;  %v3903_v39 = vpop.xlane.xlu0 %3902 }
 0xceb   :  { %14622 = vpow2.f32 %v3923_v36  ;;  %v3913_v41 = vsub.f32 %v3881_v0, %v3903_v39 }
 0xcec   :  { %v3929_v42 = vmul.f32 1.442695, %v3914_v38 }
 0xced   :  { %v3927_v43 = vmul.f32 1.442695, %v3913_v41 }
 0xcee   :  { %14624 = vpow2.f32 %v3929_v42 }
 0xcef   :  { %14626 = vpow2.f32 %v3927_v43 }
 0xcf0   :  { %v14617_v44 = vpop.eup %14616 }
 0xcf1   :  { %v14619_v45 = vpop.eup %14618  ;;  %v3940_v46 = vsel %vm1504_vm3, %v14617_v44, 0.0 }
 0xcf2   :  { %3941 = vadd.xlane.f32.xlu1 %v3940_v46  ;;  %v3937_v47 = vsel %vm1504_vm3, %v14619_v45, 0.0 }
 0xcf3   :  { %3938 = vadd.xlane.f32.xlu0 %v3937_v47 }
 0xcf4   :  { %v14621_v48 = vpop.eup %14620 }
 0xcf5   :  { %v14623_v8 = vpop.eup %14622  ;;  %v3946_v49 = vsel %vm1504_vm3, %v14621_v48, 0.0 }
 0xcf6   :  { %3947 = vadd.xlane.f32.xlu1 %v3946_v49  ;;  %v3943_v50 = vsel %vm1504_vm3, %v14623_v8, 0.0  ;;  %v11377_v49 = vld [vmem:[%s14968_s19 + $0x30] sm:$0xff] }
 0xcf7   :  { %3944 = vadd.xlane.f32.xlu0 %v3943_v50 }
 0xcf8   :  { %v14625_v10 = vpop.eup %14624 }
 0xcf9   :  { %v14627_v52 = vpop.eup %14626  ;;  %v3952_v53 = vsel %vm1504_vm3, %v14625_v10, 0.0 }
 0xcfa   :  { %3953 = vadd.xlane.f32.xlu1 %v3952_v53  ;;  %v3949_v54 = vsel %vm1504_vm3, %v14627_v52, 0.0 }
 0xcfb   :  { %3950 = vadd.xlane.f32.xlu0 %v3949_v54 }
 0xd5f   :  { %v3936_v55 = vpop.xlane.xlu1 %3935 }
 0xd60   :  { %14628 = vrcp.f32 %v3936_v55  ;;  %v3933_v56 = vpop.xlane.xlu0 %3932 }
 0xd61   :  { %14630 = vrcp.f32 %v3933_v56 }
 0xd6a   :  { %v14629_v57 = vpop.eup %14628 }
 0xd6b   :  { %v14631_v58 = vpop.eup %14630  ;;  %v3964_v60 = vmul.f32 %v14629_v57, %v14613_v20 }
 0xd6c   :  { %v3963_v59 = vmul.f32 %v14631_v58, %v14615_v21  ;;  %v11359_v21 = vld [vmem:[%s14948_s29 + $0x30] sm:$0xff] }
 0xd6e   :  { %12858 = vmatprep.mubr.msk.f32.mxu1 %vm1504_vm3, %v3963_v59 }
 0xd6f   :  { %12859 = vmatmul.mubr.msk.f32.vlgmr.msra.gmra.mrb[36].mxu1 %vm1504_vm3, %v3964_v60  ;;  %v11373_v60 = vld [vmem:[%s14958_s8 + $0x1] ss:$0 sm:$0xff]  ;;  %s16729_s8 = sld [smem:[#allocation14_spill]] }
 0xd70   :  { %14002 = vmatpush3.bf16.msra.mxu1 %v15452_v37 }
 0xd71   :  { %14008 = vmatprep.subr.bf16.mxu1 %v15456_v40 }
 0xd7f   :  { %v3942_v61 = vpop.xlane.xlu1 %3941 }
 0xd80   :  { %14632 = vrcp.f32 %v3942_v61  ;;  %v3939_v62 = vpop.xlane.xlu0 %3938 }
 0xd81   :  { %14634 = vrcp.f32 %v3939_v62 }
 0xd83   :  { %v3948_v63 = vpop.xlane.xlu1 %3947 }
 0xd84   :  { %14636 = vrcp.f32 %v3948_v63  ;;  %v3945_v2 = vpop.xlane.xlu0 %3944 }
 0xd85   :  { %14638 = vrcp.f32 %v3945_v2  ;;  %v11374_v2 = vld [vmem:[%s14963_s14 + $0x1] ss:$0 sm:$0xff]  ;;  %s16730_s14 = sld [smem:[#allocation17_spill]] }
 0xd87   :  { %v3954_v3 = vpop.xlane.xlu1 %3953 }
 0xd88   :  { %14640 = vrcp.f32 %v3954_v3  ;;  %v3951_v6 = vpop.xlane.xlu0 %3950 }
 0xd89   :  { %14642 = vrcp.f32 %v3951_v6 }
 0xd8a   :  { %v14633_v7 = vpop.eup %14632 }
 0xd8b   :  { %v14635_v9 = vpop.eup %14634  ;;  %v3966_v11 = vmul.f32 %v14633_v7, %v14617_v44 }
 0xd8c   :  { %v3965_v1 = vmul.f32 %v14635_v9, %v14619_v45 }
 0xd8e   :  { %v14637_v37 = vpop.eup %14636  ;;  %12865 = vmatprep.mubr.msk.f32.mxu1 %vm1504_vm3, %v3965_v1  ;;  %v11383_v1 = vld [vmem:[%s14978_s30 + $0x80] sm:$0xff] }
 0xd8f   :  { %v14639_v0 = vpop.eup %14638  ;;  %12866 = vmatmul.mubr.msk.f32.vlgmr.msra.gmra.mrb[38].mxu1 %vm1504_vm3, %v3966_v11  ;;  %v3968_v13 = vmul.f32 %v14637_v37, %v14621_v48  ;;  %v11375_v48 = vld [vmem:[%s14968_s19 + $0x20] sm:$0xff]  ;;  %v11384_v11 = vld [vmem:[%s14978_s30 + $0x88] sm:$0xff] }
 0xd90   :  { %14010 = vmatpush3.bf16.msra.mxu1 %v15456_v40  ;;  %v3967_v12 = vmul.f32 %v14639_v0, %v14623_v8  ;;  %v11358_v40 = vld [vmem:[%s14948_s29 + $0x28] sm:$0xff]  ;;  %v14019_v37 = vpack.c.bf16 %v11384_v11, %v11383_v1  ;;  %v11385_v0 = vld [vmem:[%s14978_s30 + $0x90] sm:$0xff]  ;;  %s16727_s29 = sld [smem:[#allocation8_spill]] }
 0xd91   :  { %v11376_v8 = vld [vmem:[%s14968_s19 + $0x28] sm:$0xff]  ;;  %v5024_v1 = vld [vmem:[%s14998_s27 + $0x10] sm:$0xff] }
 0xd92   :  { %v14641_v14 = vpop.eup %14640  ;;  %12872 = vmatprep.mubr.msk.f32.mxu0 %vm1504_vm3, %v3967_v12  ;;  %v14011_v50 = vpack.c.bf16 %v11376_v8, %v11375_v48  ;;  %v11386_v12 = vld [vmem:[%s14978_s30 + $0x98] sm:$0xff] }
 0xd93   :  { %v14643_v15 = vpop.eup %14642  ;;  %12873 = vmatmul.mubr.msk.f32.vlgmr.msra.gmra.mrb[42].mxu0 %vm1504_vm3, %v3968_v13  ;;  %v3970_v17 = vmul.f32 %v14641_v14, %v14625_v10  ;;  %v11378_v10 = vld [vmem:[%s14968_s19 + $0x38] sm:$0xff]  ;;  %v14023_v13 = vpack.c.bf16 %v11386_v12, %v11385_v0  ;;  %v11387_v14 = vld [vmem:[%s14978_s30 + $0xa0] sm:$0xff]  ;;  %s16731_s19 = sld [smem:[#allocation15_spill]] }
 0xd94   :  { %v3969_v16 = vmul.f32 %v14643_v15, %v14627_v52  ;;  %12883 = vmatpush3.msra.mxu0 %v11357_v18  ;;  %v14015_v52 = vpack.c.bf16 %v11378_v10, %v11377_v49  ;;  %14012 = vmatprep.subr.bf16.mxu1 %v14011_v50  ;;  %v11388_v15 = vld [vmem:[%s14978_s30 + $0xa8] sm:$0xff]  ;;  %v11390_v18 = vld [vmem:[%s14978_s30 + $0xb8] sm:$0xff] }
 0xd95   :  { %12887 = vmatprep.subr.mxu0 %v11358_v40 }
 0xd96   :  { %12879 = vmatprep.mubr.msk.f32.mxu1 %vm1504_vm3, %v3969_v16  ;;  %v14027_v16 = vpack.c.bf16 %v11388_v15, %v11387_v14 }
 0xd97   :  { %12880 = vmatmul.mubr.msk.f32.vlgmr.msra.gmra.mrb[40].mxu1 %vm1504_vm3, %v3970_v17  ;;  %v11389_v17 = vld [vmem:[%s14978_s30 + $0xb0] sm:$0xff] }
 0xd98   :  { %14014 = vmatpush3.bf16.msra.mxu1 %v14011_v50 }
 0xd99   :  { %14016 = vmatprep.subr.bf16.mxu1 %v14015_v52 }
 0xd9c   :  { %14018 = vmatpush3.bf16.msra.mxu1 %v14015_v52 }
 0xd9d   :  { %14020 = vmatprep.subr.bf16.mxu1 %v14019_v37 }
 0xe42   :  { %v12860_v19 = vpop.f32.mrb[36].mxu1 }
 0xe43   :  { %v4043_v20 = vpop.f32.mrb[37].mxu1 }
 0xe44   :  { %12884 = vmatprep.mubr.msk.f32.mxu0 %vm1139_vm1, %v4043_v20  ;;  %v11392_v20 = vld [vmem:[%s14978_s30 + $0xc8] sm:$0xff] }
 0xe45   :  { %12885 = vmatmul.mubr.msk.f32.vlgmr.msra.gmra.mrb[44].mxu0 %vm1139_vm1, %v12860_v19  ;;  %v11391_v19 = vld [vmem:[%s14978_s30 + $0xc0] sm:$0xff] }
 0xe46   :  { %12888 = vmatpush3.msra.mxu0 %v11358_v40  ;;  %v14031_v40 = vpack.c.bf16 %v11390_v18, %v11389_v17 }
 0xe47   :  { %12892 = vmatprep.subr.mxu0 %v11359_v21 }
 0xe62   :  { %v12867_v22 = vpop.f32.mrb[38].mxu1 }
 0xe63   :  { %v4124_v23 = vpop.f32.mrb[39].mxu1 }
 0xe64   :  { %12889 = vmatprep.mubr.msk.f32.mxu0 %vm1139_vm1, %v4124_v23  ;;  %v11394_v23 = vld [vmem:[%s14978_s30 + $0xd8] sm:$0xff] }
 0xe65   :  { %12890 = vmatmul.mubr.msk.f32.vlgmr.msra.gmra.mrb[44].mxu0 %vm1139_vm1, %v12867_v22  ;;  %v14035_v22 = vpack.c.bf16 %v11392_v20, %v11391_v19 }
 0xe66   :  { %v12874_v25 = vpop.f32.mrb[42].mxu0  ;;  %12893 = vmatpush3.msra.mxu0 %v11359_v21  ;;  %v11393_v21 = vld [vmem:[%s14978_s30 + $0xd0] sm:$0xff] }
 0xe67   :  { %v4205_v26 = vpop.f32.mrb[43].mxu0  ;;  %12897 = vmatprep.subr.mxu0 %v11360_v24 }
 0xe68   :  { %12894 = vmatprep.mubr.msk.f32.mxu0 %vm1139_vm1, %v4205_v26  ;;  %v11396_v26 = vld [vmem:[%s14978_s30 + $0xe8] sm:$0xff] }
 0xe6a   :  { %v12881_v27 = vpop.f32.mrb[40].mxu1 }
 0xe6b   :  { %v4286_v28 = vpop.f32.mrb[41].mxu1 }
 0xe6d   :  { %12895 = vmatmul.mubr.msk.f32.vlgmr.msra.gmra.mrb[44].mxu0 %vm1139_vm1, %v12874_v25  ;;  %v11395_v25 = vld [vmem:[%s14978_s30 + $0xe0] sm:$0xff] }
 0xe6e   :  { %12898 = vmatpush3.msra.mxu0 %v11360_v24  ;;  %12899 = vmatprep.mubr.msk.f32.mxu0 %vm1139_vm1, %v4286_v28  ;;  %v14039_v24 = vpack.c.bf16 %v11394_v23, %v11393_v21  ;;  %v11397_v28 = vld [vmem:[%s14978_s30 + $0xf0] sm:$0xff] }
 0xe75   :  { %12900 = vmatmul.mubr.msk.f32.vlgmr.msra.gmra.mrb[44].mxu0 %vm1139_vm1, %v12881_v27  ;;  %v14043_v27 = vpack.c.bf16 %v11396_v26, %v11395_v25 }
 0xf48   :  { %v12901_v29 = vpop.f32.mrb[44].mxu0 }
 0xf49   :  { %v4631_v33 = vadd.f32 %v12901_v29, %v15315_v31  ;;  %v4615_v34 = vpop.f32.mrb[45].mxu0  ;;  %v11398_v29 = vld [vmem:[%s14978_s30 + $0xf8] sm:$0xff]  ;;  %s16733_s30 = sld [smem:[#allocation19_spill]] }
 0xf4a   :  { %v4630_v35 = vadd.f32 %v4615_v34, %v15317_v32 }
 0xf4b   :  { %v15502_v4 = vadd.f32 %v11370_v30, %v4631_v33  ;;  %v11380_v33 = vld [vmem:[%s14973_s24 + $0x1] ss:$0 sm:$0xff]  ;;  %s16732_s24 = sld [smem:[#allocation16_spill]] }
 0xf4c   :  { %v15504_v36 = vadd.f32 %v11370_v30, %v4630_v35  ;;  %v14047_v30 = vpack.c.bf16 %v11398_v29, %v11397_v28 }
 0xf4d   :  { %v4649_v5 = vsel %vm141_vm0, %v15502_v4, 0.0 }
 0xf4e   :  { %4650 = vadd.xlane.f32.xlu1 %v4649_v5  ;;  %v4646_v38 = vsel %vm141_vm0, %v15504_v36, 0.0 }
 0xf4f   :  { %4647 = vadd.xlane.f32.xlu0 %v4646_v38 }
 0xfdb   :  { %v4651_v39 = vpop.xlane.xlu1 %4650 }
 0xfdc   :  { %v4653_v31 = vmul.f32 0.03125, %v4651_v39  ;;  %v4648_v41 = vpop.xlane.xlu0 %4647 }
 0xfdd   :  { %v4652_v32 = vmul.f32 0.03125, %v4648_v41 }
 0xfde   :  { %v4655_v42 = vsub.f32 %v15502_v4, %v4653_v31 }
 0xfdf   :  { %v4654_v43 = vsub.f32 %v15504_v36, %v4652_v32 }
 0xfe0   :  { %v4657_v44 = vmul.f32 %v4655_v42, %v4655_v42 }
 0xfe1   :  { %v4656_v45 = vmul.f32 %v4654_v43, %v4654_v43 }
 0xfe2   :  { %v4661_v46 = vsel %vm141_vm0, %v4657_v44, 0.0 }
 0xfe3   :  { %4662 = vadd.xlane.f32.xlu1 %v4661_v46  ;;  %v4658_v47 = vsel %vm141_vm0, %v4656_v45, 0.0 }
 0xfe4   :  { %4659 = vadd.xlane.f32.xlu0 %v4658_v47 }
0x1070   :  { %v4663_v53 = vpop.xlane.xlu1 %4662 }
0x1071   :  { %v4665_v54 = vmul.f32 0.03125, %v4663_v53  ;;  %v4660_v55 = vpop.xlane.xlu0 %4659 }
0x1072   :  { %v4664_v56 = vmul.f32 0.03125, %v4660_v55 }
0x1073   :  { %v4667_v57 = vadd.f32 1e-05, %v4665_v54 }
0x1074   :  { %v4666_v58 = vadd.f32 1e-05, %v4664_v56  ;;  %v11400_v56 = vld [vmem:[%s14983_s6 + $0x1] ss:$0 sm:$0xff]  ;;  %s16734_s6 = sld [smem:[#allocation18_spill]] }
0x1075   :  { %14644 = vrsqrt.f32 %v4667_v57 }
0x1076   :  { %14646 = vrsqrt.f32 %v4666_v58 }
0x107f   :  { %v14645_v59 = vpop.eup %14644 }
0x1080   :  { %v14647_v61 = vpop.eup %14646  ;;  %v4671_v62 = vmul.f32 %v14645_v59, %v4655_v42 }
0x1081   :  { %v4670_v63 = vmul.f32 %v14647_v61, %v4654_v43 }
0x1082   :  { %v4679_v3 = vmul.f32 %v11373_v60, %v4671_v62  ;;  %v5023_v62 = vld [vmem:[%s14998_s27 + $0x8] sm:$0xff] }
0x1083   :  { %v4678_v6 = vmul.f32 %v11373_v60, %v4670_v63 }
0x1084   :  { %v4687_v9 = vadd.f32 %v11374_v2, %v4679_v3 }
0x1085   :  { %v4686_v7 = vadd.f32 %v11374_v2, %v4678_v6  ;;  %v5022_v2 = vld [vmem:[%s14998_s27] sm:$0xff]  ;;  %v5035_v6 = vsel %vm141_vm0, %v5023_v62, 0.0 }
0x1087   :  { %12910 = vmatprep.mubr.msk.f32.mxu1 %vm141_vm0, %v4686_v7  ;;  %v5032_v7 = vsel %vm141_vm0, %v5022_v2, 0.0 }
0x1088   :  { %12911 = vmatmul.mubr.msk.f32.vlgmr.msra.gmra.mrb[42].mxu1 %vm141_vm0, %v4687_v9  ;;  %v5025_v9 = vld [vmem:[%s14998_s27 + $0x18] sm:$0xff] }
0x1089   :  { %14022 = vmatpush3.bf16.msra.mxu1 %v14019_v37 }
0x108a   :  { %14024 = vmatprep.subr.bf16.mxu1 %v14023_v13 }
0x108d   :  { %14026 = vmatpush3.bf16.msra.mxu1 %v14023_v13 }
0x108e   :  { %14028 = vmatprep.subr.bf16.mxu1 %v14027_v16 }
0x1091   :  { %14030 = vmatpush3.bf16.msra.mxu1 %v14027_v16 }
0x1092   :  { %14032 = vmatprep.subr.bf16.mxu1 %v14031_v40 }
0x1095   :  { %14034 = vmatpush3.bf16.msra.mxu1 %v14031_v40 }
0x1096   :  { %14036 = vmatprep.subr.bf16.mxu1 %v14035_v22 }
0x1099   :  { %14038 = vmatpush3.bf16.msra.mxu1 %v14035_v22 }
0x109a   :  { %14040 = vmatprep.subr.bf16.mxu1 %v14039_v24 }
0x109d   :  { %14042 = vmatpush3.bf16.msra.mxu1 %v14039_v24 }
0x109e   :  { %14044 = vmatprep.subr.bf16.mxu1 %v14043_v27 }
0x10a1   :  { %14046 = vmatpush3.bf16.msra.mxu1 %v14043_v27 }
0x10a2   :  { %14048 = vmatprep.subr.bf16.mxu1 %v14047_v30 }
0x10a5   :  { %14050 = vmatpush3.bf16.msra.mxu1 %v14047_v30 }
0x115b   :  { %v12912_v34 = vpop.f32.mrb[42].mxu1 }
0x115c   :  { %v4779_v35 = vadd.f32 %v12912_v34, %v11380_v33  ;;  %v4773_v5 = vpop.f32.mrb[43].mxu1 }
0x115d   :  { %v4774_v38 = vadd.f32 %v11380_v33, %v4773_v5 }
0x115e   :  { %v4783_v39 = vmul.f32 %v4779_v35, %v4779_v35 }
0x115f   :  { %v4782_v31 = vmul.f32 %v4774_v38, %v4774_v38 }
0x1160   :  { %v4785_v41 = vmul.f32 %v4783_v39, %v4779_v35 }
0x1161   :  { %v4784_v32 = vmul.f32 %v4782_v31, %v4774_v38 }
0x1162   :  { %v4787_v42 = vmul.f32 0.044715, %v4785_v41  ;;  %v5116_v41 = vld [vmem:[%s16721_s0 + $0x60] sm:$0xff] }
0x1163   :  { %v4786_v43 = vmul.f32 0.044715, %v4784_v32  ;;  %v5117_v32 = vld [vmem:[%s16721_s0 + $0x68] sm:$0xff] }
0x1164   :  { %v4789_v44 = vadd.f32 %v4787_v42, %v4779_v35  ;;  %v14078_v42 = vpack.c.bf16 %v5117_v32, %v5116_v41 }
0x1165   :  { %v4788_v45 = vadd.f32 %v4786_v43, %v4774_v38  ;;  %v5118_v43 = vld [vmem:[%s16721_s0 + $0x70] sm:$0xff] }
0x1166   :  { %v4791_v46 = vmul.f32 0.7978846, %v4789_v44  ;;  %14079 = vmatprep.subr.bf16.mxu1 %v14078_v42  ;;  %v5119_v44 = vld [vmem:[%s16721_s0 + $0x78] sm:$0xff] }
0x1167   :  { %v4790_v47 = vmul.f32 0.7978846, %v4788_v45  ;;  %v14082_v45 = vpack.c.bf16 %v5119_v44, %v5118_v43  ;;  %v5108_v44 = vld [vmem:[%s16721_s0 + $0x20] sm:$0xff] }
0x1168   :  { %14648 = vtanh.f32 %v4791_v46  ;;  %v14906_v46 = vmov 0.0|0.0  }
0x1169   :  { %14650 = vtanh.f32 %v4790_v47  ;;  %14051 = vmatprep.subr.bf16.mxu0 %v14906_v46  ;;  %v5124_v47 = vld [vmem:[%s16721_s0 + $0xa0] sm:$0xff] }
0x1172   :  { %v14649_v48 = vpop.eup %14648 }
0x1173   :  { %v14651_v8 = vpop.eup %14650  ;;  %v4795_v49 = vadd.f32 1.0, %v14649_v48  ;;  %v5125_v48 = vld [vmem:[%s16721_s0 + $0xa8] sm:$0xff] }
0x1174   :  { %v4794_v50 = vadd.f32 1.0, %v14651_v8  ;;  %v14908_v8 = vmov 0.0  }
0x1175   :  { %v4797_v10 = vmul.f32 0.5, %v4795_v49  ;;  %12952 = vmatprep.mubr.msk.f32.mxu0 %vm14907_vm4, %v14908_v8  ;;  %v15591_v49 = vpack.c.bf16 %v5125_v48, %v5124_v47  ;;  %v5133_v47 = vld [vmem:[%s16721_s0 + $0xe8] sm:$0xff] }
0x1176   :  { %v4796_v52 = vmul.f32 0.5, %v4794_v50 }
0x1177   :  { %v4799_v54 = vmul.f32 %v4797_v10, %v4779_v35 }
0x1178   :  { %v4798_v53 = vmul.f32 %v4796_v52, %v4774_v38 }
0x117a   :  { %12945 = vmatprep.mubr.f32.mxu1 %v4798_v53 }
0x117b   :  { %12946 = vmatmul.mubr.f32.vlgmr.msra.gmra.mrb[44].mxu1 %v4799_v54 }
0x117c   :  { %14081 = vmatpush3.bf16.msra.mxu1 %v14078_v42 }
0x117d   :  { %14083 = vmatprep.subr.bf16.mxu1 %v14082_v45 }
0x1180   :  { %14085 = vmatpush3.bf16.msra.mxu1 %v14082_v45  ;;  %v5109_v45 = vld [vmem:[%s16721_s0 + $0x28] sm:$0xff] }
0x1181   :  { %14095 = vmatprep.subr.bf16.mxu1 %v15591_v49 }
0x124e   :  { %v12947_v55 = vpop.f32.mrb[44].mxu1 }
0x124f   :  { %v4893_v57 = vadd.f32 %v12947_v55, %v15502_v4  ;;  %v4883_v58 = vpop.f32.mrb[45].mxu1  ;;  %v5041_v4 = vsel %vm141_vm0, %v5025_v9, 0.0 }
0x1250   :  { %v4892_v59 = vadd.f32 %v4883_v58, %v15504_v36  ;;  %v5038_v36 = vsel %vm141_vm0, %v5024_v1, 0.0 }
0x1251   :  { %v4903_v60 = vadd.f32 %v11400_v56, %v4893_v57 }
0x1252   :  { %v4902_v61 = vadd.f32 %v11400_v56, %v4892_v59 }
0x1253   :  { %v4909_v63 = vsel %vm141_vm0, %v4903_v60, 0.0 }
0x1254   :  { %4910 = vadd.xlane.f32.xlu1 %v4909_v63  ;;  %v4906_v3 = vsel %vm141_vm0, %v4902_v61, 0.0 }
0x1255   :  { %4907 = vadd.xlane.f32.xlu0 %v4906_v3 }
0x1258   :  { %5036 = vadd.xlane.f32.xlu1 %v5035_v6 }
0x1259   :  { %5033 = vadd.xlane.f32.xlu0 %v5032_v7 }
0x125c   :  { %5042 = vadd.xlane.f32.xlu1 %v5041_v4 }
0x125d   :  { %5039 = vadd.xlane.f32.xlu0 %v5038_v36 }
0x12e1   :  { %v4911_v11 = vpop.xlane.xlu1 %4910 }
0x12e2   :  { %v4913_v37 = vmul.f32 0.03125, %v4911_v11  ;;  %v4908_v0 = vpop.xlane.xlu0 %4907  ;;  %v11402_v11 = vld [vmem:[%s16723_s9] ss:$0 sm:$0xff] }
0x12e3   :  { %v4912_v12 = vmul.f32 0.03125, %v4908_v0 }
0x12e4   :  { %v15552_v13 = vsub.f32 %v4903_v60, %v4913_v37 }
0x12e5   :  { %v15554_v14 = vsub.f32 %v4902_v61, %v4912_v12  ;;  %v5037_v15 = vpop.xlane.xlu1 %5036 }
0x12e6   :  { %v5045_v16 = vmul.f32 0.03125, %v5037_v15  ;;  %v5034_v17 = vpop.xlane.xlu0 %5033  ;;  %v4917_v18 = vmul.f32 %v15552_v13, %v15552_v13  ;;  %v11404_v15 = vld [vmem:[%s16724_s17] ss:$0 sm:$0xff] }
0x12e7   :  { %v5044_v40 = vmul.f32 0.03125, %v5034_v17  ;;  %v4916_v19 = vmul.f32 %v15554_v14, %v15554_v14  ;;  %v5104_v17 = vld [vmem:[%s16721_s0] sm:$0xff] }
0x12e8   :  { %v15560_v20 = vsub.f32 %v5023_v62, %v5045_v16  ;;  %v4921_v21 = vsel %vm141_vm0, %v4917_v18, 0.0  ;;  %v5105_v18 = vld [vmem:[%s16721_s0 + $0x8] sm:$0xff] }
0x12e9   :  { %v15563_v22 = vsub.f32 %v5022_v2, %v5044_v40  ;;  %4922 = vadd.xlane.f32.xlu1 %v4921_v21  ;;  %v5043_v23 = vpop.xlane.xlu1 %5042  ;;  %v4918_v24 = vsel %vm141_vm0, %v4916_v19, 0.0 }
0x12ea   :  { %v5047_v25 = vmul.f32 0.03125, %v5043_v23  ;;  %4919 = vadd.xlane.f32.xlu0 %v4918_v24  ;;  %v5040_v26 = vpop.xlane.xlu0 %5039  ;;  %v5053_v27 = vmul.f32 %v15560_v20, %v15560_v20  ;;  %v11405_v24 = vld [vmem:[%s16725_s21] ss:$0 sm:$0xff] }
0x12eb   :  { %v5046_v28 = vmul.f32 0.03125, %v5040_v26  ;;  %v5052_v29 = vmul.f32 %v15563_v22, %v15563_v22 }
0x12ec   :  { %v15570_v30 = vsub.f32 %v5025_v9, %v5047_v25  ;;  %v5059_v33 = vsel %vm141_vm0, %v5053_v27, 0.0  ;;  %v14054_v25 = vpack.c.bf16 %v5105_v18, %v5104_v17  ;;  %v5150_v17 = vld [vmem:[%s16721_s0 + $0x170] sm:$0xff]  ;;  %v5151_v18 = vld [vmem:[%s16721_s0 + $0x178] sm:$0xff] }
0x12ed   :  { %v15573_v34 = vsub.f32 %v5024_v1, %v5046_v28  ;;  %5060 = vadd.xlane.f32.xlu1 %v5059_v33  ;;  %v5056_v35 = vsel %vm141_vm0, %v5052_v29, 0.0  ;;  %v11401_v1 = vld [vmem:[%s16722_s5] ss:$0 sm:$0xff]  ;;  %v5106_v29 = vld [vmem:[%s16721_s0 + $0x10] sm:$0xff]  ;;  %v5107_v33 = vld [vmem:[%s16721_s0 + $0x18] sm:$0xff] }
0x12ee   :  { %5057 = vadd.xlane.f32.xlu0 %v5056_v35  ;;  %v5055_v5 = vmul.f32 %v15570_v30, %v15570_v30  ;;  %v14058_v42 = vpack.c.bf16 %v5107_v33, %v5106_v29  ;;  %v5138_v29 = vld [vmem:[%s16721_s0 + $0x110] sm:$0xff]  ;;  %v5139_v33 = vld [vmem:[%s16721_s0 + $0x118] sm:$0xff] }
0x12ef   :  { %v5054_v38 = vmul.f32 %v15573_v34, %v15573_v34 }
0x12f0   :  { %v5065_v39 = vsel %vm141_vm0, %v5055_v5, 0.0 }
0x12f1   :  { %5066 = vadd.xlane.f32.xlu1 %v5065_v39  ;;  %v5062_v31 = vsel %vm141_vm0, %v5054_v38, 0.0  ;;  %v5126_v38 = vld [vmem:[%s16721_s0 + $0xb0] sm:$0xff] }
0x12f2   :  { %5063 = vadd.xlane.f32.xlu0 %v5062_v31  ;;  %v4948_v31 = vld [vmem:[%s16726_s25] sm:$0x3] }
0x1376   :  { %v4923_v50 = vpop.xlane.xlu1 %4922 }
0x1377   :  { %v4925_v10 = vmul.f32 0.03125, %v4923_v50  ;;  %v4920_v52 = vpop.xlane.xlu0 %4919 }
0x1378   :  { %v4924_v53 = vmul.f32 0.03125, %v4920_v52 }
0x1379   :  { %v4927_v54 = vadd.f32 1e-05, %v4925_v10  ;;  %v14062_v10 = vpack.c.bf16 %v5109_v45, %v5108_v44 }
0x137a   :  { %v4926_v55 = vadd.f32 1e-05, %v4924_v53  ;;  %v5061_v56 = vpop.xlane.xlu1 %5060  ;;  %v5110_v53 = vld [vmem:[%s16721_s0 + $0x30] sm:$0xff] }
0x137b   :  { %14652 = vrsqrt.f32 %v4927_v54  ;;  %v5069_v57 = vmul.f32 0.03125, %v5061_v56  ;;  %v5058_v58 = vpop.xlane.xlu0 %5057  ;;  %v5111_v54 = vld [vmem:[%s16721_s0 + $0x38] sm:$0xff] }
0x137c   :  { %14654 = vrsqrt.f32 %v4926_v55  ;;  %v5068_v59 = vmul.f32 0.03125, %v5058_v58  ;;  %v5135_v55 = vld [vmem:[%s16721_s0 + $0xf8] sm:$0xff]  ;;  %v14066_v56 = vpack.c.bf16 %v5111_v54, %v5110_v53  ;;  %v5112_v58 = vld [vmem:[%s16721_s0 + $0x40] sm:$0xff] }
0x137d   :  { %v5073_v60 = vadd.f32 1e-05, %v5069_v57 }
0x137e   :  { %v5072_v61 = vadd.f32 1e-05, %v5068_v59  ;;  %v5067_v62 = vpop.xlane.xlu1 %5066  ;;  %v5113_v59 = vld [vmem:[%s16721_s0 + $0x48] sm:$0xff] }
0x137f   :  { %14656 = vrsqrt.f32 %v5073_v60  ;;  %v5071_v63 = vmul.f32 0.03125, %v5067_v62  ;;  %v5064_v2 = vpop.xlane.xlu0 %5063  ;;  %v5140_v60 = vld [vmem:[%s16721_s0 + $0x120] sm:$0xff]  ;;  %v14070_v62 = vpack.c.bf16 %v5113_v59, %v5112_v58 }
0x1380   :  { %14658 = vrsqrt.f32 %v5072_v61  ;;  %v5070_v3 = vmul.f32 0.03125, %v5064_v2  ;;  %v5141_v61 = vld [vmem:[%s16721_s0 + $0x128] sm:$0xff]  ;;  %v5114_v2 = vld [vmem:[%s16721_s0 + $0x50] sm:$0xff] }
0x1381   :  { %v5075_v6 = vadd.f32 1e-05, %v5071_v63  ;;  %v14126_v63 = vpack.c.bf16 %v5141_v61, %v5140_v60 }
0x1382   :  { %v5074_v7 = vadd.f32 1e-05, %v5070_v3  ;;  %v5115_v3 = vld [vmem:[%s16721_s0 + $0x58] sm:$0xff] }
0x1383   :  { %14660 = vrsqrt.f32 %v5075_v6  ;;  %v5142_v6 = vld [vmem:[%s16721_s0 + $0x130] sm:$0xff] }
0x1384   :  { %14662 = vrsqrt.f32 %v5074_v7  ;;  %v5143_v7 = vld [vmem:[%s16721_s0 + $0x138] sm:$0xff] }
0x1385   :  { %v14653_v9 = vpop.eup %14652 }
0x1386   :  { %v14655_v4 = vpop.eup %14654  ;;  %v4931_v36 = vmul.f32 %v14653_v9, %v15552_v13  ;;  %v14074_v9 = vpack.c.bf16 %v5115_v3, %v5114_v2 }
0x1387   :  { %v4930_v37 = vmul.f32 %v14655_v4, %v15554_v14  ;;  %v5120_v4 = vld [vmem:[%s16721_s0 + $0x80] sm:$0xff] }
0x1388   :  { %v4939_v0 = vmul.f32 %v11401_v1, %v4931_v36  ;;  %v5121_v36 = vld [vmem:[%s16721_s0 + $0x88] sm:$0xff] }
0x1389   :  { %v14657_v12 = vpop.eup %14656  ;;  %v4938_v16 = vmul.f32 %v11401_v1, %v4930_v37  ;;  %v14130_v1 = vpack.c.bf16 %v5143_v7, %v5142_v6  ;;  %v5149_v37 = vld [vmem:[%s16721_s0 + $0x168] sm:$0xff] }
0x138a   :  { %v14659_v40 = vpop.eup %14658  ;;  %v5081_v19 = vmul.f32 %v14657_v12, %v15560_v20  ;;  %v4947_v21 = vadd.f32 %v11402_v11, %v4939_v0  ;;  %v5127_v20 = vld [vmem:[%s16721_s0 + $0xb8] sm:$0xff]  ;;  %v14086_v0 = vpack.c.bf16 %v5121_v36, %v5120_v4 }
0x138b   :  { %v5080_v23 = vmul.f32 %v14659_v40, %v15563_v22  ;;  %v4946_v13 = vadd.f32 %v11402_v11, %v4938_v16  ;;  %v5148_v11 = vld [vmem:[%s16721_s0 + $0x160] sm:$0xff]  ;;  %v5123_v16 = vld [vmem:[%s16721_s0 + $0x98] sm:$0xff] }
0x138c   :  { %v5091_v14 = vmul.f32 %v11404_v15, %v5081_v19  ;;  %v14142_v12 = vpack.c.bf16 %v5149_v37, %v5148_v11  ;;  %v14146_v19 = vpack.c.bf16 %v5151_v18, %v5150_v17 }
0x138d   :  { %v14661_v26 = vpop.eup %14660  ;;  %v5090_v27 = vmul.f32 %v11404_v15, %v5080_v23  ;;  %v14052_v28 = vpack.c.bf16 %v4947_v21, %v4946_v13  ;;  %v5128_v21 = vld [vmem:[%s16721_s0 + $0xc0] sm:$0xff]  ;;  %v5129_v23 = vld [vmem:[%s16721_s0 + $0xc8] sm:$0xff] }
0x138e   :  { %v14663_v35 = vpop.eup %14662  ;;  %v5083_v5 = vmul.f32 %v14661_v26, %v15570_v30  ;;  %v15613_v41 = vadd.f32 %v11405_v24, %v5091_v14  ;;  %v14098_v30 = vpack.c.bf16 %v5127_v20, %v5126_v38  ;;  %v14102_v13 = vpack.c.bf16 %v5129_v23, %v5128_v21  ;;  %v5131_v14 = vld [vmem:[%s16721_s0 + $0xd8] sm:$0xff]  ;;  %v5136_v26 = vld [vmem:[%s16721_s0 + $0x100] sm:$0xff]  ;;  %v5145_v38 = vld [vmem:[%s16721_s0 + $0x148] sm:$0xff] }
0x138f   :  { %v15609_v39 = vadd.f32 %v11405_v24, %v5090_v27  ;;  %v5082_v22 = vmul.f32 %v14663_v35, %v15573_v34  ;;  %14053 = vmatpush3.bf16.msra.mxu0 %v14052_v28  ;;  %v5132_v34 = vld [vmem:[%s16721_s0 + $0xe0] sm:$0xff]  ;;  %v5137_v27 = vld [vmem:[%s16721_s0 + $0x108] sm:$0xff]  ;;  %v14122_v35 = vpack.c.bf16 %v5139_v33, %v5138_v29 }
0x1390   :  { %v5093_v32 = vmul.f32 %v11404_v15, %v5083_v5  ;;  %14055 = vmatprep.subr.bf16.mxu0 %v14054_v25  ;;  %v14110_v52 = vpack.c.bf16 %v5133_v47, %v5132_v34  ;;  %v14118_v28 = vpack.c.bf16 %v5137_v27, %v5136_v26  ;;  %v5144_v5 = vld [vmem:[%s16721_s0 + $0x140] sm:$0xff] }
0x1391   :  { %v5092_v43 = vmul.f32 %v11404_v15, %v5082_v22  ;;  %13005 = vmatprep.mubr.msk.f32.mxu1 %vm141_vm0, %v15609_v39  ;;  %v5122_v15 = vld [vmem:[%s16721_s0 + $0x90] sm:$0xff]  ;;  %v14134_v20 = vpack.c.bf16 %v5145_v38, %v5144_v5 }
0x1392   :  { %12953 = vmatmul.mubr.msk.f32.vlgmr.msra.gmra.mrb[46].mxu0 %vm1504_vm3, %v4948_v31  ;;  %13006 = vmatmul.mubr.msk.f32.vlgmr.msra.gmra.mrb[46].mxu1 %vm141_vm0, %v15613_v41  ;;  %v15628_v50 = vadd.f32 %v11405_v24, %v5093_v32  ;;  %v14090_v40 = vpack.c.bf16 %v5123_v16, %v5122_v15  ;;  %v5146_v22 = vld [vmem:[%s16721_s0 + $0x150] sm:$0xff]  ;;  %v5147_v31 = vld [vmem:[%s16721_s0 + $0x158] sm:$0xff] }
0x1393   :  { %v15624_v48 = vadd.f32 %v11405_v24, %v5092_v43  ;;  %14057 = vmatpush3.bf16.msra.mxu0 %v14054_v25  ;;  %12963 = vmatprep.mubr.msk.f32.mxu0 %vm141_vm0, %v15609_v39  ;;  %v5130_v24 = vld [vmem:[%s16721_s0 + $0xd0] sm:$0xff]  ;;  %v14138_v32 = vpack.c.bf16 %v5147_v31, %v5146_v22 }
0x1394   :  { %14097 = vmatpush3.bf16.msra.mxu1 %v15591_v49  ;;  %14059 = vmatprep.subr.bf16.mxu0 %v14058_v42  ;;  %v5134_v49 = vld [vmem:[%s16721_s0 + $0xf0] sm:$0xff]  ;;  %v14106_v25 = vpack.c.bf16 %v5131_v14, %v5130_v24 }
0x1395   :  { %13008 = vmatprep.mubr.msk.f32.mxu1 %vm141_vm0, %v15624_v48  ;;  %14099 = vmatprep.subr.bf16.mxu1 %v14098_v30  ;;  %v14114_v57 = vpack.c.bf16 %v5135_v55, %v5134_v49 }
0x1396   :  { %13009 = vmatmul.mubr.msk.f32.gmra.mrb[48].mxu1 %vm141_vm0, %v15628_v50 }
0x1397   :  { %14061 = vmatpush3.bf16.msra.mxu0 %v14058_v42  ;;  %13033 = vmatprep.mubr.msk.f32.mxu1 %vm141_vm0, %v15609_v39 }
0x1398   :  { %14101 = vmatpush3.bf16.msra.mxu1 %v14098_v30  ;;  %14063 = vmatprep.subr.bf16.mxu0 %v14062_v10 }
0x1399   :  { %14111 = vmatprep.subr.bf16.mxu1 %v14110_v52 }
0x139a   :  { %12964 = vmatmul.mubr.msk.f32.vlgmr.msra.gmra.mrb[48].mxu0 %vm141_vm0, %v15613_v41 }
0x139b   :  { %13034 = vmatmul.mubr.msk.f32.vlgmr.msra.gmra.mrb[50].mxu1 %vm141_vm0, %v15613_v41  ;;  %12966 = vmatprep.mubr.msk.f32.mxu0 %vm141_vm0, %v15624_v48 }
0x139c   :  { %14065 = vmatpush3.bf16.msra.mxu0 %v14062_v10  ;;  %13036 = vmatprep.mubr.msk.f32.mxu1 %vm141_vm0, %v15624_v48 }
0x139d   :  { %14113 = vmatpush3.bf16.msra.mxu1 %v14110_v52  ;;  %14067 = vmatprep.subr.bf16.mxu0 %v14066_v56 }
0x139e   :  { %12967 = vmatmul.mubr.msk.f32.gmra.mrb[50].mxu0 %vm141_vm0, %v15628_v50  ;;  %14115 = vmatprep.subr.bf16.mxu1 %v14114_v57 }
0x139f   :  { %13037 = vmatmul.mubr.msk.f32.gmra.mrb[52].mxu1 %vm141_vm0, %v15628_v50  ;;  %12977 = vmatprep.mubr.msk.f32.mxu0 %vm141_vm0, %v15609_v39 }
0x13a0   :  { %14069 = vmatpush3.bf16.msra.mxu0 %v14066_v56  ;;  %13061 = vmatprep.mubr.msk.f32.mxu1 %vm141_vm0, %v15609_v39 }
0x13a1   :  { %14117 = vmatpush3.bf16.msra.mxu1 %v14114_v57  ;;  %14071 = vmatprep.subr.bf16.mxu0 %v14070_v62 }
0x13a2   :  { %14127 = vmatprep.subr.bf16.mxu1 %v14126_v63 }
0x13a3   :  { %12978 = vmatmul.mubr.msk.f32.vlgmr.msra.gmra.mrb[52].mxu0 %vm141_vm0, %v15613_v41 }
0x13a4   :  { %13062 = vmatmul.mubr.msk.f32.vlgmr.msra.gmra.mrb[54].mxu1 %vm141_vm0, %v15613_v41  ;;  %12980 = vmatprep.mubr.msk.f32.mxu0 %vm141_vm0, %v15624_v48 }
0x13a5   :  { %14073 = vmatpush3.bf16.msra.mxu0 %v14070_v62  ;;  %13064 = vmatprep.mubr.msk.f32.mxu1 %vm141_vm0, %v15624_v48 }
0x13a6   :  { %14129 = vmatpush3.bf16.msra.mxu1 %v14126_v63  ;;  %14075 = vmatprep.subr.bf16.mxu0 %v14074_v9 }
0x13a7   :  { %12981 = vmatmul.mubr.msk.f32.gmra.mrb[54].mxu0 %vm141_vm0, %v15628_v50  ;;  %14131 = vmatprep.subr.bf16.mxu1 %v14130_v1 }
0x13a8   :  { %13065 = vmatmul.mubr.msk.f32.gmra.mrb[56].mxu1 %vm141_vm0, %v15628_v50  ;;  %12991 = vmatprep.mubr.msk.f32.mxu0 %vm141_vm0, %v15609_v39 }
0x13a9   :  { %14077 = vmatpush3.bf16.msra.mxu0 %v14074_v9  ;;  %13089 = vmatprep.mubr.msk.f32.mxu1 %vm141_vm0, %v15609_v39 }
0x13aa   :  { %14133 = vmatpush3.bf16.msra.mxu1 %v14130_v1  ;;  %14087 = vmatprep.subr.bf16.mxu0 %v14086_v0 }
0x13ab   :  { %14143 = vmatprep.subr.bf16.mxu1 %v14142_v12 }
0x13ac   :  { %12992 = vmatmul.mubr.msk.f32.vlgmr.msra.gmra.mrb[56].mxu0 %vm141_vm0, %v15613_v41 }
0x13ad   :  { %13090 = vmatmul.mubr.msk.f32.vlgmr.msra.gmra.mrb[58].mxu1 %vm141_vm0, %v15613_v41  ;;  %12994 = vmatprep.mubr.msk.f32.mxu0 %vm141_vm0, %v15624_v48 }
0x13ae   :  { %14089 = vmatpush3.bf16.msra.mxu0 %v14086_v0  ;;  %13092 = vmatprep.mubr.msk.f32.mxu1 %vm141_vm0, %v15624_v48 }
0x13af   :  { %14145 = vmatpush3.bf16.msra.mxu1 %v14142_v12  ;;  %14091 = vmatprep.subr.bf16.mxu0 %v14090_v40 }
0x13b0   :  { %12995 = vmatmul.mubr.msk.f32.gmra.mrb[58].mxu0 %vm141_vm0, %v15628_v50  ;;  %14147 = vmatprep.subr.bf16.mxu1 %v14146_v19 }
0x13b1   :  { %13093 = vmatmul.mubr.msk.f32.gmra.mrb[60].mxu1 %vm141_vm0, %v15628_v50  ;;  %13019 = vmatprep.mubr.msk.f32.mxu0 %vm141_vm0, %v15609_v39 }
0x13b2   :  { %14093 = vmatpush3.bf16.msra.mxu0 %v14090_v40  ;;  %13117 = vmatprep.mubr.msk.f32.mxu1 %vm141_vm0, %v15609_v39 }
0x13b3   :  { %14149 = vmatpush3.bf16.msra.mxu1 %v14146_v19  ;;  %14103 = vmatprep.subr.bf16.mxu0 %v14102_v13 }
0x13b5   :  { %13020 = vmatmul.mubr.msk.f32.vlgmr.msra.gmra.mrb[60].mxu0 %vm141_vm0, %v15613_v41 }
0x13b6   :  { %13118 = vmatmul.mubr.msk.f32.vlgmr.msra.gmra.mrb[62].mxu1 %vm141_vm0, %v15613_v41  ;;  %13022 = vmatprep.mubr.msk.f32.mxu0 %vm141_vm0, %v15624_v48 }
0x13b7   :  { %14105 = vmatpush3.bf16.msra.mxu0 %v14102_v13  ;;  %13120 = vmatprep.mubr.msk.f32.mxu1 %vm141_vm0, %v15624_v48 }
0x13b8   :  { %14107 = vmatprep.subr.bf16.mxu0 %v14106_v25 }
0x13b9   :  { %13023 = vmatmul.mubr.msk.f32.gmra.mrb[62].mxu0 %vm141_vm0, %v15628_v50 }
0x13ba   :  { %13121 = vmatmul.mubr.msk.f32.gmra.mrb[64].mxu1 %vm141_vm0, %v15628_v50  ;;  %13047 = vmatprep.mubr.msk.f32.mxu0 %vm141_vm0, %v15609_v39 }
0x13bb   :  { %14109 = vmatpush3.bf16.msra.mxu0 %v14106_v25 }
0x13bc   :  { %14119 = vmatprep.subr.bf16.mxu0 %v14118_v28 }
0x13be   :  { %13048 = vmatmul.mubr.msk.f32.vlgmr.msra.gmra.mrb[64].mxu0 %vm141_vm0, %v15613_v41 }
0x13bf   :  { %13050 = vmatprep.mubr.msk.f32.mxu0 %vm141_vm0, %v15624_v48  ;;  %14121 = vmatpush3.bf16.msra.mxu0 %v14118_v28 }
0x13c0   :  { %14123 = vmatprep.subr.bf16.mxu0 %v14122_v35 }
0x13c2   :  { %13051 = vmatmul.mubr.msk.f32.gmra.mrb[66].mxu0 %vm141_vm0, %v15628_v50 }
0x13c3   :  { %14125 = vmatpush3.bf16.msra.mxu0 %v14122_v35  ;;  %13075 = vmatprep.mubr.msk.f32.mxu0 %vm141_vm0, %v15609_v39 }
0x13c4   :  { %14135 = vmatprep.subr.bf16.mxu0 %v14134_v20 }
0x13c6   :  { %13076 = vmatmul.mubr.msk.f32.vlgmr.msra.gmra.mrb[68].mxu0 %vm141_vm0, %v15613_v41 }
0x13c7   :  { %13078 = vmatprep.mubr.msk.f32.mxu0 %vm141_vm0, %v15624_v48  ;;  %14137 = vmatpush3.bf16.msra.mxu0 %v14134_v20 }
0x13c8   :  { %14139 = vmatprep.subr.bf16.mxu0 %v14138_v32 }
0x13ca   :  { %13079 = vmatmul.mubr.msk.f32.gmra.mrb[70].mxu0 %vm141_vm0, %v15628_v50 }
0x13cb   :  { %14141 = vmatpush3.bf16.msra.mxu0 %v14138_v32  ;;  %13103 = vmatprep.mubr.msk.f32.mxu0 %vm141_vm0, %v15609_v39 }
0x13ce   :  { %13104 = vmatmul.mubr.msk.f32.vlgmr.msra.gmra.mrb[72].mxu0 %vm141_vm0, %v15613_v41 }
0x13cf   :  { %13106 = vmatprep.mubr.msk.f32.mxu0 %vm141_vm0, %v15624_v48 }
0x13d2   :  { %13107 = vmatmul.mubr.msk.f32.gmra.mrb[74].mxu0 %vm141_vm0, %v15628_v50 }
0x1465   :  { %v15753_v42 = vpop.f32.mrb[46].mxu0  ;;  %v15755_v43 = vpop.f32.mrb[46].mxu1 }
0x1466   :  { %v12954_v30 = vpop.f32.mrb[47].mxu0  ;;  %v5485_v44 = vpop.f32.mrb[47].mxu1 }
0x1469   :  { %v15757_v45 = vpop.f32.mrb[48].mxu1 }
0x146a   :  { %v15759_v34 = vpop.f32.mrb[49].mxu1 }
0x146d   :  { %v15761_v39 = vpop.f32.mrb[48].mxu0 }
0x146e   :  { %v13035_v47 = vpop.f32.mrb[50].mxu1  ;;  %v5230_v41 = vpop.f32.mrb[49].mxu0 }
0x146f   :  { %v5655_v10 = vpop.f32.mrb[51].mxu1  ;;  %13131 = vmatprep.mubr.msk.f32.mxu0 %vm1139_vm1, %v5230_v41 }
0x1470   :  { %v14162_v48 = vpack.c.bf16 %v13035_v47, %v5655_v10 }
0x1471   :  { %v15764_v52 = vpop.f32.mrb[50].mxu0 }
0x1472   :  { %v13038_v50 = vpop.f32.mrb[52].mxu1  ;;  %14164 = vmatprep.subr.msk.bf16.mxu1 %vm15200_vm2, %v14162_v48  ;;  %v15768_v53 = vpop.f32.mrb[51].mxu0 }
0x1473   :  { %v5665_v54 = vpop.f32.mrb[53].mxu1  ;;  %14167 = vmatpush3.bf16.xpose.msk.msra.mxu1 %vm15200_vm2, %v14162_v48 }
0x1474   :  { %v14168_v49 = vpack.c.bf16 %v13038_v50, %v5665_v54 }
0x1476   :  { %v12979_v55 = vpop.f32.mrb[52].mxu0  ;;  %14170 = vmatprep.subr.msk.bf16.mxu1 %vm15200_vm2, %v14168_v49 }
0x1477   :  { %v13063_v56 = vpop.f32.mrb[54].mxu1  ;;  %v5315_v57 = vpop.f32.mrb[53].mxu0 }
0x1478   :  { %v5825_v58 = vpop.f32.mrb[55].mxu1  ;;  %13145 = vmatprep.mubr.msk.f32.mxu1 %vm1139_vm1, %v5315_v57  ;;  %v5027_v57 = vld [vmem:[%s16727_s29 + $0x8] sm:$0xff] }
0x1479   :  { %v14186_v59 = vpack.c.bf16 %v13063_v56, %v5825_v58 }
0x147a   :  { %v12982_v60 = vpop.f32.mrb[54].mxu0 }
0x147b   :  { %v13066_v61 = vpop.f32.mrb[56].mxu1  ;;  %v5325_v62 = vpop.f32.mrb[55].mxu0  ;;  %14173 = vmatpush3.bf16.xpose.msk.msra.mxu1 %vm15200_vm2, %v14168_v49 }
0x147c   :  { %v5835_v63 = vpop.f32.mrb[57].mxu1  ;;  %14188 = vmatprep.subr.msk.bf16.mxu1 %vm15200_vm2, %v14186_v59 }
0x147d   :  { %v14192_v2 = vpack.c.bf16 %v13066_v61, %v5835_v63 }
0x147f   :  { %v15779_v3 = vpop.f32.mrb[56].mxu0 }
0x1480   :  { %v13091_v6 = vpop.f32.mrb[58].mxu1  ;;  %v5400_v7 = vpop.f32.mrb[57].mxu0 }
0x1481   :  { %v5995_v9 = vpop.f32.mrb[59].mxu1 }
0x1482   :  { %v14206_v1 = vpack.c.bf16 %v13091_v6, %v5995_v9  ;;  %13146 = vmatmul.mubr.msk.f32.vlgmr.msra.gmra.mrb[66].mxu1 %vm1139_vm1, %v12979_v55 }
0x1483   :  { %v15782_v4 = vpop.f32.mrb[58].mxu0  ;;  %13148 = vmatprep.mubr.msk.f32.mxu1 %vm1139_vm1, %v5325_v62  ;;  %14191 = vmatpush3.bf16.xpose.msk.msra.mxu1 %vm15200_vm2, %v14186_v59  ;;  %v5026_v59 = vld [vmem:[%s16727_s29] sm:$0xff] }
0x1484   :  { %v13094_v36 = vpop.f32.mrb[60].mxu1  ;;  %v5410_v11 = vpop.f32.mrb[59].mxu0  ;;  %14194 = vmatprep.subr.msk.bf16.mxu1 %vm15200_vm2, %v14192_v2 }
0x1485   :  { %v6005_v37 = vpop.f32.mrb[61].mxu1 }
0x1486   :  { %v14210_v0 = vpack.c.bf16 %v13094_v36, %v6005_v37  ;;  %13149 = vmatmul.mubr.msk.f32.gmra.mrb[68].mxu1 %vm1139_vm1, %v12982_v60  ;;  %v5028_v36 = vld [vmem:[%s16727_s29 + $0x10] sm:$0xff] }
0x1487   :  { %13173 = vmatprep.mubr.msk.f32.mxu1 %vm1139_vm1, %v5485_v44 }
0x1488   :  { %v13021_v12 = vpop.f32.mrb[60].mxu0 }
0x1489   :  { %v13119_v15 = vpop.f32.mrb[62].mxu1  ;;  %v5570_v16 = vpop.f32.mrb[61].mxu0 }
0x148a   :  { %v14150_v17 = vpack.c.bf16 %v13021_v12, %v5570_v16  ;;  %v6165_v18 = vpop.f32.mrb[63].mxu1 }
0x148b   :  { %v15791_v40 = vpack.c.bf16 %v13119_v15, %v6165_v18  ;;  %14197 = vmatpush3.bf16.xpose.msk.msra.mxu1 %vm15200_vm2, %v14192_v2 }
0x148c   :  { %v13024_v19 = vpop.f32.mrb[62].mxu0  ;;  %14152 = vmatprep.subr.msk.bf16.mxu0 %vm15200_vm2, %v14150_v17  ;;  %14207 = vmatprep.subr.bf16.mxu1 %v14206_v1 }
0x148d   :  { %v13122_v21 = vpop.f32.mrb[64].mxu1  ;;  %v5580_v23 = vpop.f32.mrb[63].mxu0  ;;  %14155 = vmatpush3.bf16.xpose.msk.msra.mxu0 %vm15200_vm2, %v14150_v17 }
0x148e   :  { %v14156_v13 = vpack.c.bf16 %v13024_v19, %v5580_v23  ;;  %v6175_v24 = vpop.f32.mrb[65].mxu1 }
0x148f   :  { %v15799_v14 = vpack.c.bf16 %v13122_v21, %v6175_v24 }
0x1490   :  { %14158 = vmatprep.subr.msk.bf16.mxu0 %vm15200_vm2, %v14156_v13 }
0x1491   :  { %v13049_v25 = vpop.f32.mrb[64].mxu0 }
0x1492   :  { %v5740_v26 = vpop.f32.mrb[65].mxu0  ;;  %13174 = vmatmul.mubr.msk.f32.vlgmr.msra.gmra.mrb[70].mxu1 %vm1139_vm1, %v15755_v43 }
0x1493   :  { %v14174_v27 = vpack.c.bf16 %v13049_v25, %v5740_v26  ;;  %13176 = vmatprep.mubr.msk.f32.mxu1 %vm1139_vm1, %v15759_v34  ;;  %14209 = vmatpush3.bf16.msra.mxu1 %v14206_v1  ;;  %v5029_v1 = vld [vmem:[%s16727_s29 + $0x18] sm:$0xff] }
0x1494   :  { %14211 = vmatprep.subr.bf16.mxu1 %v14210_v0 }
0x1495   :  { %v13052_v28 = vpop.f32.mrb[66].mxu0  ;;  %14161 = vmatpush3.bf16.xpose.msk.msra.mxu0 %vm15200_vm2, %v14156_v13 }
0x1496   :  { %v5750_v29 = vpop.f32.mrb[67].mxu0  ;;  %14176 = vmatprep.subr.msk.bf16.mxu0 %vm15200_vm2, %v14174_v27  ;;  %13177 = vmatmul.mubr.msk.f32.gmra.mrb[72].mxu1 %vm1139_vm1, %v15757_v45 }
0x1497   :  { %v14180_v33 = vpack.c.bf16 %v13052_v28, %v5750_v29  ;;  %14213 = vmatpush3.bf16.msra.mxu1 %v14210_v0 }
0x1498   :  { %14223 = vmatprep.subr.bf16.mxu1 %v15791_v40 }
0x1499   :  { %v13077_v35 = vpop.f32.mrb[68].mxu0 }
0x149a   :  { %v5910_v5 = vpop.f32.mrb[69].mxu0 }
0x149b   :  { %v14198_v38 = vpack.c.bf16 %v13077_v35, %v5910_v5 }
0x149c   :  { %13132 = vmatmul.mubr.msk.f32.vlgmr.msra.gmra.mrb[76].mxu0 %vm1139_vm1, %v15761_v39 }
0x149d   :  { %v13080_v20 = vpop.f32.mrb[70].mxu0  ;;  %13134 = vmatprep.mubr.msk.f32.mxu0 %vm1139_vm1, %v15768_v53  ;;  %14179 = vmatpush3.bf16.xpose.msk.msra.mxu0 %vm15200_vm2, %v14174_v27 }
0x149e   :  { %v5920_v22 = vpop.f32.mrb[71].mxu0  ;;  %14182 = vmatprep.subr.msk.bf16.mxu0 %vm15200_vm2, %v14180_v33 }
0x149f   :  { %v14202_v31 = vpack.c.bf16 %v13080_v20, %v5920_v22 }
0x14a0   :  { %13135 = vmatmul.mubr.msk.f32.gmra.mrb[78].mxu0 %vm1139_vm1, %v15764_v52 }
0x14a1   :  { %v13105_v32 = vpop.f32.mrb[72].mxu0  ;;  %13159 = vmatprep.mubr.msk.f32.mxu0 %vm1139_vm1, %v5400_v7 }
0x14a2   :  { %v6080_v43 = vpop.f32.mrb[73].mxu0 }
0x14a3   :  { %v15825_v30 = vpack.c.bf16 %v13105_v32, %v6080_v43 }
0x14a5   :  { %v13108_v44 = vpop.f32.mrb[74].mxu0  ;;  %14185 = vmatpush3.bf16.xpose.msk.msra.mxu0 %vm15200_vm2, %v14180_v33 }
0x14a6   :  { %v6090_v45 = vpop.f32.mrb[75].mxu0  ;;  %14199 = vmatprep.subr.bf16.mxu0 %v14198_v38 }
0x14a7   :  { %v15829_v34 = vpack.c.bf16 %v13108_v44, %v6090_v45 }
0x14ac   :  { %13160 = vmatmul.mubr.msk.f32.vlgmr.msra.gmra.mrb[80].mxu0 %vm1139_vm1, %v15779_v3 }
0x14ad   :  { %13162 = vmatprep.mubr.msk.f32.mxu0 %vm1139_vm1, %v5410_v11  ;;  %14201 = vmatpush3.bf16.msra.mxu0 %v14198_v38 }
0x14ae   :  { %14203 = vmatprep.subr.bf16.mxu0 %v14202_v31 }
0x14b0   :  { %13163 = vmatmul.mubr.msk.f32.gmra.mrb[82].mxu0 %vm1139_vm1, %v15782_v4 }
0x14b1   :  { %14205 = vmatpush3.bf16.msra.mxu0 %v14202_v31 }
0x14b2   :  { %14215 = vmatprep.subr.bf16.mxu0 %v15825_v30 }
0x1555   :  { %v13147_v39 = vpop.f32.mrb[66].mxu1 }
0x1556   :  { %v6383_v47 = vpop.f32.mrb[67].mxu1  ;;  %v6625_v62 = vmul.f32 0.35355338, %v13147_v39 }
0x1557   :  { %v6624_v6 = vmul.f32 0.35355338, %v6383_v47 }
0x1558   :  { %v15855_v12 = vadd.f32 %v6625_v62, %v5027_v57 }
0x1559   :  { %v13150_v41 = vpop.f32.mrb[68].mxu1  ;;  %v15859_v17 = vadd.f32 %v6624_v6, %v5026_v59 }
0x155a   :  { %v6393_v10 = vpop.f32.mrb[69].mxu1  ;;  %v6627_v37 = vmul.f32 0.35355338, %v13150_v41  ;;  %v6667_v18 = vsel %vm141_vm0, %v15855_v12, -inf }
0x155b   :  { %v6626_v15 = vmul.f32 0.35355338, %v6393_v10  ;;  %v6664_v21 = vsel %vm141_vm0, %v15859_v17, -inf }
0x155c   :  { %v15863_v19 = vadd.f32 %v6627_v37, %v5029_v1 }
0x155d   :  { %v15867_v23 = vadd.f32 %v6626_v15, %v5028_v36 }
0x155e   :  { %v6673_v26 = vsel %vm141_vm0, %v15863_v19, -inf }
0x155f   :  { %v6670_v28 = vsel %vm141_vm0, %v15867_v23, -inf }
0x1565   :  { %v13175_v48 = vpop.f32.mrb[70].mxu1 }
0x1566   :  { %v6601_v52 = vpop.f32.mrb[71].mxu1  ;;  %v6633_v5 = vmul.f32 0.35355338, %v13175_v48 }
0x1567   :  { %v6632_v31 = vmul.f32 0.35355338, %v6601_v52 }
0x1568   :  { %v15887_v41 = vadd.f32 %v6633_v5, %v5027_v57 }
0x1569   :  { %v13178_v50 = vpop.f32.mrb[72].mxu1  ;;  %v15891_v52 = vadd.f32 %v6632_v31, %v5026_v59 }
0x156a   :  { %v6611_v53 = vpop.f32.mrb[73].mxu1  ;;  %v6635_v39 = vmul.f32 0.35355338, %v13178_v50 }
0x156b   :  { %v6634_v10 = vmul.f32 0.35355338, %v6611_v53  ;;  %v6688_v50 = vsel %vm141_vm0, %v15891_v52, -inf }
0x156f   :  { %v13133_v54 = vpop.f32.mrb[76].mxu0 }
0x1570   :  { %v6621_v49 = vmul.f32 0.35355338, %v13133_v54  ;;  %v6274_v55 = vpop.f32.mrb[77].mxu0  ;;  %v6691_v54 = vsel %vm141_vm0, %v15887_v41, -inf }
0x1571   :  { %v6620_v56 = vmul.f32 0.35355338, %v6274_v55  ;;  %v15899_v55 = vadd.f32 %v6634_v10, %v5028_v36 }
0x1572   :  { %v15838_v58 = vadd.f32 %v6621_v49, %v5027_v57  ;;  %v15895_v49 = vadd.f32 %v6635_v39, %v5029_v1 }
0x1573   :  { %v13136_v60 = vpop.f32.mrb[78].mxu0  ;;  %v15841_v61 = vadd.f32 %v6620_v56, %v5026_v59  ;;  %v6694_v56 = vsel %vm141_vm0, %v15899_v55, -inf }
0x1574   :  { %v6623_v63 = vmul.f32 0.35355338, %v13136_v60  ;;  %v6284_v2 = vpop.f32.mrb[79].mxu0  ;;  %v6655_v3 = vsel %vm141_vm0, %v15838_v58, -inf  ;;  %v6697_v53 = vsel %vm141_vm0, %v15895_v49, -inf }
0x1575   :  { %v6622_v7 = vmul.f32 0.35355338, %v6284_v2  ;;  %6656 = vmax.xlane.f32.xlu1 %v6655_v3  ;;  %v6652_v9 = vsel %vm141_vm0, %v15841_v61, -inf }
0x1576   :  { %6653 = vmax.xlane.f32.xlu0 %v6652_v9  ;;  %v15848_v4 = vadd.f32 %v6623_v63, %v5029_v1 }
0x1577   :  { %v15851_v11 = vadd.f32 %v6622_v7, %v5028_v36 }
0x1578   :  { %v6661_v0 = vsel %vm141_vm0, %v15848_v4, -inf }
0x1579   :  { %6662 = vmax.xlane.f32.xlu1 %v6661_v0  ;;  %v6658_v16 = vsel %vm141_vm0, %v15851_v11, -inf }
0x157a   :  { %6659 = vmax.xlane.f32.xlu0 %v6658_v16 }
0x157d   :  { %6668 = vmax.xlane.f32.xlu1 %v6667_v18 }
0x157e   :  { %6665 = vmax.xlane.f32.xlu0 %v6664_v21 }
0x157f   :  { %v13161_v13 = vpop.f32.mrb[80].mxu0 }
0x1580   :  { %v6629_v24 = vmul.f32 0.35355338, %v13161_v13  ;;  %v6492_v25 = vpop.f32.mrb[81].mxu0 }
0x1581   :  { %v6628_v27 = vmul.f32 0.35355338, %v6492_v25  ;;  %6674 = vmax.xlane.f32.xlu1 %v6673_v26 }
0x1582   :  { %6671 = vmax.xlane.f32.xlu0 %v6670_v28  ;;  %v15873_v29 = vadd.f32 %v6629_v24, %v5027_v57 }
0x1583   :  { %v13164_v33 = vpop.f32.mrb[82].mxu0  ;;  %v15875_v35 = vadd.f32 %v6628_v27, %v5026_v59 }
0x1584   :  { %v6631_v38 = vmul.f32 0.35355338, %v13164_v33  ;;  %v6502_v20 = vpop.f32.mrb[83].mxu0  ;;  %v6679_v22 = vsel %vm141_vm0, %v15873_v29, -inf }
0x1585   :  { %v6630_v32 = vmul.f32 0.35355338, %v6502_v20  ;;  %6680 = vmax.xlane.f32.xlu1 %v6679_v22  ;;  %v6676_v43 = vsel %vm141_vm0, %v15875_v35, -inf }
0x1586   :  { %6677 = vmax.xlane.f32.xlu0 %v6676_v43  ;;  %v15881_v44 = vadd.f32 %v6631_v38, %v5029_v1 }
0x1587   :  { %v15883_v45 = vadd.f32 %v6630_v32, %v5028_v36 }
0x1588   :  { %v6685_v47 = vsel %vm141_vm0, %v15881_v44, -inf }
0x1589   :  { %6686 = vmax.xlane.f32.xlu1 %v6685_v47  ;;  %v6682_v48 = vsel %vm141_vm0, %v15883_v45, -inf }
0x158a   :  { %6683 = vmax.xlane.f32.xlu0 %v6682_v48 }
0x158d   :  { %6692 = vmax.xlane.f32.xlu1 %v6691_v54 }
0x158e   :  { %6689 = vmax.xlane.f32.xlu0 %v6688_v50 }
0x1591   :  { %6698 = vmax.xlane.f32.xlu1 %v6697_v53 }
0x1592   :  { %6695 = vmax.xlane.f32.xlu0 %v6694_v56 }
0x1602   :  { %v6657_v57 = vpop.xlane.xlu1 %6656 }
0x1603   :  { %v6701_v59 = vsub.f32 %v15838_v58, %v6657_v57  ;;  %v6654_v60 = vpop.xlane.xlu0 %6653 }
0x1604   :  { %v6700_v62 = vsub.f32 %v15841_v61, %v6654_v60 }
0x1605   :  { %v6718_v63 = vmul.f32 1.442695, %v6701_v59 }
0x1606   :  { %v6716_v2 = vmul.f32 1.442695, %v6700_v62  ;;  %v6663_v3 = vpop.xlane.xlu1 %6662 }
0x1607   :  { %14664 = vpow2.f32 %v6718_v63  ;;  %v6703_v6 = vsub.f32 %v15848_v4, %v6663_v3  ;;  %v6660_v7 = vpop.xlane.xlu0 %6659 }
0x1608   :  { %14666 = vpow2.f32 %v6716_v2  ;;  %v6702_v9 = vsub.f32 %v15851_v11, %v6660_v7 }
0x1609   :  { %v6722_v1 = vmul.f32 1.442695, %v6703_v6 }
0x160a   :  { %v6720_v36 = vmul.f32 1.442695, %v6702_v9  ;;  %v6669_v37 = vpop.xlane.xlu1 %6668 }
0x160b   :  { %14668 = vpow2.f32 %v6722_v1  ;;  %v6705_v0 = vsub.f32 %v15855_v12, %v6669_v37  ;;  %v6666_v58 = vpop.xlane.xlu0 %6665 }
0x160c   :  { %14670 = vpow2.f32 %v6720_v36  ;;  %v6704_v61 = vsub.f32 %v15859_v17, %v6666_v58 }
0x160d   :  { %v6726_v15 = vmul.f32 1.442695, %v6705_v0 }
0x160e   :  { %v6724_v16 = vmul.f32 1.442695, %v6704_v61  ;;  %v6675_v18 = vpop.xlane.xlu1 %6674 }
0x160f   :  { %14672 = vpow2.f32 %v6726_v15  ;;  %v6707_v4 = vsub.f32 %v15863_v19, %v6675_v18  ;;  %v6672_v21 = vpop.xlane.xlu0 %6671 }
0x1610   :  { %14674 = vpow2.f32 %v6724_v16  ;;  %v6706_v11 = vsub.f32 %v15867_v23, %v6672_v21 }
0x1611   :  { %v15913_v13 = vpop.eup %14664  ;;  %v6730_v24 = vmul.f32 1.442695, %v6707_v4 }
0x1612   :  { %v15915_v25 = vpop.eup %14666  ;;  %v6728_v12 = vmul.f32 1.442695, %v6706_v11  ;;  %v6681_v26 = vpop.xlane.xlu1 %6680  ;;  %v6751_v17 = vsel %vm141_vm0, %v15913_v13, 0.0 }
0x1613   :  { %14676 = vpow2.f32 %v6730_v24  ;;  %v6709_v27 = vsub.f32 %v15873_v29, %v6681_v26  ;;  %v6678_v28 = vpop.xlane.xlu0 %6677  ;;  %6752 = vadd.xlane.f32.xlu1 %v6751_v17  ;;  %v6748_v19 = vsel %vm141_vm0, %v15915_v25, 0.0 }
0x1614   :  { %14678 = vpow2.f32 %v6728_v12  ;;  %v6708_v23 = vsub.f32 %v15875_v35, %v6678_v28  ;;  %6749 = vadd.xlane.f32.xlu0 %v6748_v19 }
0x1615   :  { %v15923_v33 = vpop.eup %14668  ;;  %v6734_v5 = vmul.f32 1.442695, %v6709_v27 }
0x1616   :  { %v15925_v38 = vpop.eup %14670  ;;  %v6732_v20 = vmul.f32 1.442695, %v6708_v23  ;;  %v6687_v22 = vpop.xlane.xlu1 %6686  ;;  %v6757_v31 = vsel %vm141_vm0, %v15923_v33, 0.0 }
0x1617   :  { %14680 = vpow2.f32 %v6734_v5  ;;  %v6711_v29 = vsub.f32 %v15881_v44, %v6687_v22  ;;  %6758 = vadd.xlane.f32.xlu1 %v6757_v31  ;;  %v6684_v32 = vpop.xlane.xlu0 %6683  ;;  %v6754_v43 = vsel %vm141_vm0, %v15925_v38, 0.0 }
0x1618   :  { %14682 = vpow2.f32 %v6732_v20  ;;  %v6710_v35 = vsub.f32 %v15883_v45, %v6684_v32  ;;  %6755 = vadd.xlane.f32.xlu0 %v6754_v43 }
0x1619   :  { %v15933_v39 = vpop.eup %14672  ;;  %v6738_v47 = vmul.f32 1.442695, %v6711_v29 }
0x161a   :  { %v15935_v10 = vpop.eup %14674  ;;  %v6736_v48 = vmul.f32 1.442695, %v6710_v35  ;;  %v6693_v54 = vpop.xlane.xlu1 %6692  ;;  %v6763_v50 = vsel %vm141_vm0, %v15933_v39, 0.0 }
0x161b   :  { %14684 = vpow2.f32 %v6738_v47  ;;  %v6713_v44 = vsub.f32 %v15887_v41, %v6693_v54  ;;  %6764 = vadd.xlane.f32.xlu1 %v6763_v50  ;;  %v6690_v53 = vpop.xlane.xlu0 %6689  ;;  %v6760_v56 = vsel %vm141_vm0, %v15935_v10, 0.0  ;;  %v7216_v50 = vld [vmem:[%s16728_s3] sm:$0xff] }
0x161c   :  { %14686 = vpow2.f32 %v6736_v48  ;;  %v6712_v45 = vsub.f32 %v15891_v52, %v6690_v53  ;;  %6761 = vadd.xlane.f32.xlu0 %v6760_v56 }
0x161d   :  { %v15943_v57 = vpop.eup %14676  ;;  %v6742_v59 = vmul.f32 1.442695, %v6713_v44 }
0x161e   :  { %v15945_v60 = vpop.eup %14678  ;;  %v6740_v62 = vmul.f32 1.442695, %v6712_v45  ;;  %v6699_v63 = vpop.xlane.xlu1 %6698  ;;  %v6769_v2 = vsel %vm141_vm0, %v15943_v57, 0.0 }
0x161f   :  { %14688 = vpow2.f32 %v6742_v59  ;;  %v6715_v41 = vsub.f32 %v15895_v49, %v6699_v63  ;;  %6770 = vadd.xlane.f32.xlu1 %v6769_v2  ;;  %v6696_v3 = vpop.xlane.xlu0 %6695  ;;  %v6766_v6 = vsel %vm141_vm0, %v15945_v60, 0.0 }
0x1620   :  { %14690 = vpow2.f32 %v6740_v62  ;;  %v6714_v52 = vsub.f32 %v15899_v55, %v6696_v3  ;;  %6767 = vadd.xlane.f32.xlu0 %v6766_v6 }
0x1621   :  { %v15953_v7 = vpop.eup %14680  ;;  %v6746_v9 = vmul.f32 1.442695, %v6715_v41 }
0x1622   :  { %v15955_v1 = vpop.eup %14682  ;;  %v6744_v36 = vmul.f32 1.442695, %v6714_v52  ;;  %v6775_v37 = vsel %vm141_vm0, %v15953_v7, 0.0 }
0x1623   :  { %14692 = vpow2.f32 %v6746_v9  ;;  %6776 = vadd.xlane.f32.xlu1 %v6775_v37  ;;  %v6772_v49 = vsel %vm141_vm0, %v15955_v1, 0.0 }
0x1624   :  { %14694 = vpow2.f32 %v6744_v36  ;;  %6773 = vadd.xlane.f32.xlu0 %v6772_v49 }
0x1625   :  { %v15961_v0 = vpop.eup %14684 }
0x1626   :  { %v15963_v55 = vpop.eup %14686  ;;  %v6781_v58 = vsel %vm141_vm0, %v15961_v0, 0.0 }
0x1627   :  { %6782 = vadd.xlane.f32.xlu1 %v6781_v58  ;;  %v6778_v61 = vsel %vm141_vm0, %v15963_v55, 0.0 }
0x1628   :  { %6779 = vadd.xlane.f32.xlu0 %v6778_v61 }
0x1629   :  { %v15969_v15 = vpop.eup %14688 }
0x162a   :  { %v15971_v16 = vpop.eup %14690  ;;  %v6787_v18 = vsel %vm141_vm0, %v15969_v15, 0.0 }
0x162b   :  { %6788 = vadd.xlane.f32.xlu1 %v6787_v18  ;;  %v6784_v4 = vsel %vm141_vm0, %v15971_v16, 0.0 }
0x162c   :  { %6785 = vadd.xlane.f32.xlu0 %v6784_v4 }
0x162d   :  { %v15977_v21 = vpop.eup %14692 }
0x162e   :  { %v15979_v11 = vpop.eup %14694  ;;  %v6793_v24 = vsel %vm141_vm0, %v15977_v21, 0.0 }
0x162f   :  { %6794 = vadd.xlane.f32.xlu1 %v6793_v24  ;;  %v6790_v12 = vsel %vm141_vm0, %v15979_v11, 0.0 }
0x1630   :  { %6791 = vadd.xlane.f32.xlu0 %v6790_v12 }
0x16a0   :  { %v6753_v26 = vpop.xlane.xlu1 %6752 }
0x16a1   :  { %14696 = vrcp.f32 %v6753_v26  ;;  %v6750_v17 = vpop.xlane.xlu0 %6749 }
0x16a2   :  { %14698 = vrcp.f32 %v6750_v17 }
0x16a4   :  { %v6759_v27 = vpop.xlane.xlu1 %6758 }
0x16a5   :  { %14700 = vrcp.f32 %v6759_v27  ;;  %v6756_v28 = vpop.xlane.xlu0 %6755 }
0x16a6   :  { %14702 = vrcp.f32 %v6756_v28 }
0x16a8   :  { %v6765_v19 = vpop.xlane.xlu1 %6764 }
0x16a9   :  { %14704 = vrcp.f32 %v6765_v19  ;;  %v6762_v23 = vpop.xlane.xlu0 %6761 }
0x16aa   :  { %14706 = vrcp.f32 %v6762_v23 }
0x16ab   :  { %v14697_v5 = vpop.eup %14696 }
0x16ac   :  { %v14699_v20 = vpop.eup %14698  ;;  %v6771_v22 = vpop.xlane.xlu1 %6770  ;;  %v6813_v32 = vmul.f32 %v14697_v5, %v15913_v13 }
0x16ad   :  { %14708 = vrcp.f32 %v6771_v22  ;;  %v6768_v31 = vpop.xlane.xlu0 %6767  ;;  %v6812_v29 = vmul.f32 %v14699_v20, %v15915_v25 }
0x16ae   :  { %14710 = vrcp.f32 %v6768_v31  ;;  %v11518_v31 = vld [vmem:[%s16729_s8] ss:$0 sm:$0xff] }
0x16af   :  { %v14701_v43 = vpop.eup %14700  ;;  %13187 = vmatprep.mubr.msk.f32.mxu0 %vm141_vm0, %v6812_v29  ;;  %v14842_v29 = vld [vmem:[%s14998_s27 + $0x8] sm:$0xff] }
0x16b0   :  { %v14703_v35 = vpop.eup %14702  ;;  %v6777_v47 = vpop.xlane.xlu1 %6776  ;;  %13188 = vmatmul.mubr.msk.f32.vlgmr.msra.gmra.mrb[84].mxu0 %vm141_vm0, %v6813_v32  ;;  %v6815_v13 = vmul.f32 %v14701_v43, %v15923_v33 }
0x16b1   :  { %14712 = vrcp.f32 %v6777_v47  ;;  %14217 = vmatpush3.bf16.msra.mxu0 %v15825_v30  ;;  %v6774_v48 = vpop.xlane.xlu0 %6773  ;;  %v6814_v54 = vmul.f32 %v14703_v35, %v15925_v38  ;;  %v14843_v35 = vld [vmem:[%s14998_s27] sm:$0xff] }
0x16b2   :  { %14219 = vmatprep.subr.bf16.mxu0 %v15829_v34  ;;  %14714 = vrcp.f32 %v6774_v48 }
0x16b3   :  { %v14705_v25 = vpop.eup %14704  ;;  %13190 = vmatprep.mubr.msk.f32.mxu0 %vm141_vm0, %v6814_v54 }
0x16b4   :  { %v14707_v44 = vpop.eup %14706  ;;  %v6783_v53 = vpop.xlane.xlu1 %6782  ;;  %13191 = vmatmul.mubr.msk.f32.gmra.mrb[86].mxu0 %vm141_vm0, %v6815_v13  ;;  %v6817_v38 = vmul.f32 %v14705_v25, %v15933_v39  ;;  %v14844_v25 = vld [vmem:[%s14998_s27 + $0x18] sm:$0xff] }
0x16b5   :  { %14716 = vrcp.f32 %v6783_v53  ;;  %14221 = vmatpush3.bf16.msra.mxu0 %v15829_v34  ;;  %v6780_v30 = vpop.xlane.xlu0 %6779  ;;  %v6816_v56 = vmul.f32 %v14707_v44, %v15935_v10 }
0x16b6   :  { %14718 = vrcp.f32 %v6780_v30  ;;  %13235 = vmatprep.subr.mxu0 %v7216_v50  ;;  %v14845_v30 = vld [vmem:[%s14998_s27 + $0x10] sm:$0xff]  ;;  %s16735_s27 = sld [smem:[#allocation9_spill]] }
0x16b7   :  { %v14709_v45 = vpop.eup %14708  ;;  %13201 = vmatprep.mubr.msk.f32.mxu1 %vm141_vm0, %v6816_v56 }
0x16b8   :  { %v14711_v33 = vpop.eup %14710  ;;  %v6789_v59 = vpop.xlane.xlu1 %6788  ;;  %13202 = vmatmul.mubr.msk.f32.vlgmr.msra.gmra.mrb[74].mxu1 %vm141_vm0, %v6817_v38  ;;  %v6819_v39 = vmul.f32 %v14709_v45, %v15943_v57 }
0x16b9   :  { %14720 = vrcp.f32 %v6789_v59  ;;  %14225 = vmatpush3.bf16.msra.mxu1 %v15791_v40  ;;  %v6786_v62 = vpop.xlane.xlu0 %6785  ;;  %v6818_v34 = vmul.f32 %v14711_v33, %v15945_v60 }
0x16ba   :  { %14227 = vmatprep.subr.bf16.mxu1 %v15799_v14  ;;  %14722 = vrcp.f32 %v6786_v62 }
0x16bb   :  { %v14713_v10 = vpop.eup %14712  ;;  %13204 = vmatprep.mubr.msk.f32.mxu1 %vm141_vm0, %v6818_v34 }
0x16bc   :  { %v14715_v63 = vpop.eup %14714  ;;  %v6795_v2 = vpop.xlane.xlu1 %6794  ;;  %13205 = vmatmul.mubr.msk.f32.gmra.mrb[76].mxu1 %vm141_vm0, %v6819_v39  ;;  %v6821_v60 = vmul.f32 %v14713_v10, %v15953_v7 }
0x16bd   :  { %14724 = vrcp.f32 %v6795_v2  ;;  %14229 = vmatpush3.bf16.msra.mxu1 %v15799_v14  ;;  %v6792_v41 = vpop.xlane.xlu0 %6791  ;;  %v6820_v40 = vmul.f32 %v14715_v63, %v15955_v1 }
0x16be   :  { %14726 = vrcp.f32 %v6792_v41 }
0x16bf   :  { %v14717_v3 = vpop.eup %14716  ;;  %13215 = vmatprep.mubr.msk.f32.mxu0 %vm141_vm0, %v6820_v40 }
0x16c0   :  { %v14719_v57 = vpop.eup %14718  ;;  %13216 = vmatmul.mubr.msk.f32.vlgmr.msra.gmra.mrb[88].mxu0 %vm141_vm0, %v6821_v60  ;;  %v6823_v52 = vmul.f32 %v14717_v3, %v15961_v0 }
0x16c1   :  { %v6822_v6 = vmul.f32 %v14719_v57, %v15963_v55  ;;  %13236 = vmatpush3.msra.mxu0 %v7216_v50  ;;  %v7217_v55 = vld [vmem:[%s16728_s3 + $0x8] sm:$0xff] }
0x16c2   :  { %13243 = vmatprep.subr.mxu0 %v7217_v55 }
0x16c3   :  { %v14721_v9 = vpop.eup %14720  ;;  %13218 = vmatprep.mubr.msk.f32.mxu0 %vm141_vm0, %v6822_v6 }
0x16c4   :  { %v14723_v14 = vpop.eup %14722  ;;  %13219 = vmatmul.mubr.msk.f32.gmra.mrb[90].mxu0 %vm141_vm0, %v6823_v52  ;;  %v6825_v1 = vmul.f32 %v14721_v9, %v15969_v15  ;;  %v7218_v15 = vld [vmem:[%s16728_s3 + $0x10] sm:$0xff] }
0x16c5   :  { %v6824_v7 = vmul.f32 %v14723_v14, %v15971_v16 }
0x16c7   :  { %v14725_v36 = vpop.eup %14724  ;;  %13229 = vmatprep.mubr.msk.f32.mxu1 %vm141_vm0, %v6824_v7 }
0x16c8   :  { %v14727_v37 = vpop.eup %14726  ;;  %13230 = vmatmul.mubr.msk.f32.vlgmr.msra.gmra.mrb[78].mxu1 %vm141_vm0, %v6825_v1  ;;  %v6827_v0 = vmul.f32 %v14725_v36, %v15977_v21 }
0x16c9   :  { %v6826_v49 = vmul.f32 %v14727_v37, %v15979_v11  ;;  %v7219_v11 = vld [vmem:[%s16728_s3 + $0x18] sm:$0xff] }
0x16cb   :  { %13232 = vmatprep.mubr.msk.f32.mxu1 %vm141_vm0, %v6826_v49 }
0x16cc   :  { %13233 = vmatmul.mubr.msk.f32.gmra.mrb[80].mxu1 %vm141_vm0, %v6827_v0 }
0x1783   :  { %v13189_v58 = vpop.f32.mrb[84].mxu0 }
0x1784   :  { %v6906_v61 = vpop.f32.mrb[85].mxu0 }
0x1785   :  { %13237 = vmatprep.mubr.msk.f32.mxu0 %vm1139_vm1, %v6906_v61 }
0x1786   :  { %13238 = vmatmul.mubr.msk.f32.vlgmr.msra.gmra.mrb[92].mxu0 %vm1139_vm1, %v13189_v58  ;;  %v7710_v58 = vld [vmem:[%s16730_s14 + $0x8] sm:$0xff] }
0x1787   :  { %v13192_v16 = vpop.f32.mrb[86].mxu0  ;;  %13244 = vmatpush3.msra.mxu0 %v7217_v55  ;;  %v7709_v55 = vld [vmem:[%s16730_s14] sm:$0xff] }
0x1788   :  { %v6916_v18 = vpop.f32.mrb[87].mxu0  ;;  %13251 = vmatprep.subr.mxu0 %v7218_v15  ;;  %v14230_v61 = vpack.c.bf16 %v7710_v58, %v7709_v55  ;;  %v7867_v58 = vld [vmem:[%s16733_s30 + $0x70] sm:$0xff] }
0x1789   :  { %13240 = vmatprep.mubr.msk.f32.mxu0 %vm1139_vm1, %v6916_v18 }
0x178a   :  { %13241 = vmatmul.mubr.msk.f32.gmra.mrb[94].mxu0 %vm1139_vm1, %v13192_v16  ;;  %v7712_v16 = vld [vmem:[%s16730_s14 + $0x18] sm:$0xff]  ;;  %14231 = vmatprep.subr.bf16.mxu1 %v14230_v61 }
0x178b   :  { %v13203_v4 = vpop.f32.mrb[74].mxu1  ;;  %14233 = vmatpush3.bf16.msra.mxu1 %v14230_v61  ;;  %v7868_v61 = vld [vmem:[%s16733_s30 + $0x78] sm:$0xff] }
0x178c   :  { %v7003_v21 = vpop.f32.mrb[75].mxu1 }
0x178d   :  { %13245 = vmatprep.mubr.msk.f32.mxu0 %vm1139_vm1, %v7003_v21 }
0x178e   :  { %13246 = vmatmul.mubr.msk.f32.vlgmr.msra.gmra.mrb[92].mxu0 %vm1139_vm1, %v13203_v4 }
0x178f   :  { %v13206_v24 = vpop.f32.mrb[76].mxu1  ;;  %13252 = vmatpush3.msra.mxu0 %v7218_v15  ;;  %v7711_v15 = vld [vmem:[%s16730_s14 + $0x10] sm:$0xff] }
0x1790   :  { %v7013_v12 = vpop.f32.mrb[77].mxu1  ;;  %13259 = vmatprep.subr.mxu0 %v7219_v11  ;;  %v14234_v18 = vpack.c.bf16 %v7712_v16, %v7711_v15  ;;  %v14266_v15 = vpack.c.bf16 %v7868_v61, %v7867_v58  ;;  %v11521_v16 = vld [vmem:[%s16734_s6] ss:$0 sm:$0xff] }
0x1791   :  { %13248 = vmatprep.mubr.msk.f32.mxu0 %vm1139_vm1, %v7013_v12 }
0x1792   :  { %13249 = vmatmul.mubr.msk.f32.gmra.mrb[94].mxu0 %vm1139_vm1, %v13206_v24  ;;  %14235 = vmatprep.subr.bf16.mxu1 %v14234_v18 }
0x1793   :  { %v13217_v26 = vpop.f32.mrb[88].mxu0  ;;  %14237 = vmatpush3.bf16.msra.mxu1 %v14234_v18 }
0x1794   :  { %v7100_v17 = vpop.f32.mrb[89].mxu0 }
0x1795   :  { %13253 = vmatprep.mubr.msk.f32.mxu0 %vm1139_vm1, %v7100_v17 }
0x1796   :  { %13254 = vmatmul.mubr.msk.f32.vlgmr.msra.gmra.mrb[92].mxu0 %vm1139_vm1, %v13217_v26 }
0x1797   :  { %v13220_v27 = vpop.f32.mrb[90].mxu0  ;;  %13260 = vmatpush3.msra.mxu0 %v7219_v11 }
0x1798   :  { %v7110_v28 = vpop.f32.mrb[91].mxu0 }
0x1799   :  { %13256 = vmatprep.mubr.msk.f32.mxu0 %vm1139_vm1, %v7110_v28 }
0x179a   :  { %13257 = vmatmul.mubr.msk.f32.gmra.mrb[94].mxu0 %vm1139_vm1, %v13220_v27 }
0x179b   :  { %v13231_v19 = vpop.f32.mrb[78].mxu1 }
0x179c   :  { %v7197_v23 = vpop.f32.mrb[79].mxu1 }
0x179d   :  { %13261 = vmatprep.mubr.msk.f32.mxu0 %vm1139_vm1, %v7197_v23 }
0x179e   :  { %13262 = vmatmul.mubr.msk.f32.vlgmr.msra.gmra.mrb[92].mxu0 %vm1139_vm1, %v13231_v19 }
0x179f   :  { %v13234_v5 = vpop.f32.mrb[80].mxu1 }
0x17a0   :  { %v7207_v20 = vpop.f32.mrb[81].mxu1 }
0x17a1   :  { %13264 = vmatprep.mubr.msk.f32.mxu0 %vm1139_vm1, %v7207_v20 }
0x17a2   :  { %13265 = vmatmul.mubr.msk.f32.gmra.mrb[94].mxu0 %vm1139_vm1, %v13234_v5 }
0x1871   :  { %v13263_v22 = vpop.f32.mrb[92].mxu0 }
0x1872   :  { %v7621_v32 = vadd.f32 %v14842_v29, %v13263_v22  ;;  %v7589_v43 = vpop.f32.mrb[93].mxu0  ;;  %v11519_v22 = vld [vmem:[%s16731_s19] ss:$0 sm:$0xff] }
0x1873   :  { %v7620_v47 = vadd.f32 %v14843_v35, %v7589_v43  ;;  %v11520_v43 = vld [vmem:[%s16732_s24] ss:$0 sm:$0xff] }
0x1874   :  { %v16046_v48 = vadd.f32 %v11518_v31, %v7621_v32 }
0x1875   :  { %v16048_v54 = vadd.f32 %v11518_v31, %v7620_v47  ;;  %v13266_v13 = vpop.f32.mrb[94].mxu0 }
0x1876   :  { %v7623_v50 = vadd.f32 %v14844_v25, %v13266_v13  ;;  %v7599_v44 = vpop.f32.mrb[95].mxu0  ;;  %v7640_v53 = vsel %vm141_vm0, %v16046_v48, 0.0 }
0x1877   :  { %v7622_v56 = vadd.f32 %v14845_v30, %v7599_v44  ;;  %7641 = vadd.xlane.f32.xlu1 %v7640_v53  ;;  %v7637_v38 = vsel %vm141_vm0, %v16048_v54, 0.0 }
0x1878   :  { %v16056_v45 = vadd.f32 %v11518_v31, %v7623_v50  ;;  %7638 = vadd.xlane.f32.xlu0 %v7637_v38 }
0x1879   :  { %v16058_v33 = vadd.f32 %v11518_v31, %v7622_v56 }
0x187a   :  { %v7646_v59 = vsel %vm141_vm0, %v16056_v45, 0.0 }
0x187b   :  { %7647 = vadd.xlane.f32.xlu1 %v7646_v59  ;;  %v7643_v62 = vsel %vm141_vm0, %v16058_v33, 0.0 }
0x187c   :  { %7644 = vadd.xlane.f32.xlu0 %v7643_v62 }
0x1904   :  { %v7642_v34 = vpop.xlane.xlu1 %7641 }
0x1905   :  { %v7650_v39 = vmul.f32 0.03125, %v7642_v34  ;;  %v7639_v10 = vpop.xlane.xlu0 %7638  ;;  %v7853_v34 = vld [vmem:[%s16733_s30] sm:$0xff] }
0x1906   :  { %v7649_v63 = vmul.f32 0.03125, %v7639_v10 }
0x1907   :  { %v7654_v2 = vsub.f32 %v16046_v48, %v7650_v39  ;;  %v7854_v39 = vld [vmem:[%s16733_s30 + $0x8] sm:$0xff] }
0x1908   :  { %v7653_v41 = vsub.f32 %v16048_v54, %v7649_v63  ;;  %v7648_v40 = vpop.xlane.xlu1 %7647  ;;  %v14238_v10 = vpack.c.bf16 %v7854_v39, %v7853_v34  ;;  %v7855_v63 = vld [vmem:[%s16733_s30 + $0x10] sm:$0xff] }
0x1909   :  { %v7652_v60 = vmul.f32 0.03125, %v7648_v40  ;;  %v7645_v3 = vpop.xlane.xlu0 %7644  ;;  %v7658_v57 = vmul.f32 %v7654_v2, %v7654_v2  ;;  %v7857_v40 = vld [vmem:[%s16733_s30 + $0x20] sm:$0xff] }
0x190a   :  { %v7651_v6 = vmul.f32 0.03125, %v7645_v3  ;;  %v7657_v52 = vmul.f32 %v7653_v41, %v7653_v41  ;;  %14239 = vmatprep.subr.bf16.mxu1 %v14238_v10 }
0x190b   :  { %v7656_v9 = vsub.f32 %v16056_v45, %v7652_v60  ;;  %v7664_v14 = vsel %vm141_vm0, %v7658_v57, 0.0  ;;  %v7858_v60 = vld [vmem:[%s16733_s30 + $0x28] sm:$0xff]  ;;  %v7859_v57 = vld [vmem:[%s16733_s30 + $0x30] sm:$0xff] }
0x190c   :  { %v7655_v7 = vsub.f32 %v16058_v33, %v7651_v6  ;;  %7665 = vadd.xlane.f32.xlu1 %v7664_v14  ;;  %v7661_v1 = vsel %vm141_vm0, %v7657_v52, 0.0  ;;  %v14246_v3 = vpack.c.bf16 %v7858_v60, %v7857_v40  ;;  %v7860_v6 = vld [vmem:[%s16733_s30 + $0x38] sm:$0xff]  ;;  %v7862_v14 = vld [vmem:[%s16733_s30 + $0x48] sm:$0xff] }
0x190d   :  { %7662 = vadd.xlane.f32.xlu0 %v7661_v1  ;;  %v7660_v36 = vmul.f32 %v7656_v9, %v7656_v9  ;;  %v14250_v52 = vpack.c.bf16 %v7860_v6, %v7859_v57  ;;  %v7863_v1 = vld [vmem:[%s16733_s30 + $0x50] sm:$0xff] }
0x190e   :  { %v7659_v37 = vmul.f32 %v7655_v7, %v7655_v7 }
0x190f   :  { %v7670_v49 = vsel %vm141_vm0, %v7660_v36, 0.0  ;;  %v7864_v36 = vld [vmem:[%s16733_s30 + $0x58] sm:$0xff] }
0x1910   :  { %7671 = vadd.xlane.f32.xlu1 %v7670_v49  ;;  %v7667_v0 = vsel %vm141_vm0, %v7659_v37, 0.0  ;;  %v14258_v37 = vpack.c.bf16 %v7864_v36, %v7863_v1  ;;  %v7865_v49 = vld [vmem:[%s16733_s30 + $0x60] sm:$0xff] }
0x1911   :  { %7668 = vadd.xlane.f32.xlu0 %v7667_v0  ;;  %v7866_v0 = vld [vmem:[%s16733_s30 + $0x68] sm:$0xff] }
0x1912   :  { %v14262_v55 = vpack.c.bf16 %v7866_v0, %v7865_v49 }
0x1999   :  { %v7666_v4 = vpop.xlane.xlu1 %7665 }
0x199a   :  { %v7674_v21 = vmul.f32 0.03125, %v7666_v4  ;;  %v7663_v11 = vpop.xlane.xlu0 %7662 }
0x199b   :  { %v7673_v24 = vmul.f32 0.03125, %v7663_v11 }
0x199c   :  { %v7678_v12 = vadd.f32 1e-05, %v7674_v21 }
0x199d   :  { %v7677_v26 = vadd.f32 1e-05, %v7673_v24  ;;  %v7672_v17 = vpop.xlane.xlu1 %7671 }
0x199e   :  { %14728 = vrsqrt.f32 %v7678_v12  ;;  %v7676_v27 = vmul.f32 0.03125, %v7672_v17  ;;  %v7669_v28 = vpop.xlane.xlu0 %7668 }
0x199f   :  { %14730 = vrsqrt.f32 %v7677_v26  ;;  %v7675_v19 = vmul.f32 0.03125, %v7669_v28 }
0x19a0   :  { %v7680_v23 = vadd.f32 1e-05, %v7676_v27 }
0x19a1   :  { %v7679_v5 = vadd.f32 1e-05, %v7675_v19 }
0x19a2   :  { %14732 = vrsqrt.f32 %v7680_v23 }
0x19a3   :  { %14734 = vrsqrt.f32 %v7679_v5 }
0x19a8   :  { %v14729_v20 = vpop.eup %14728 }
0x19a9   :  { %v14731_v31 = vpop.eup %14730  ;;  %v7686_v29 = vmul.f32 %v14729_v20, %v7654_v2  ;;  %v7856_v2 = vld [vmem:[%s16733_s30 + $0x18] sm:$0xff] }
0x19aa   :  { %v7685_v32 = vmul.f32 %v14731_v31, %v7653_v41  ;;  %v14242_v41 = vpack.c.bf16 %v7856_v2, %v7855_v63 }
0x19ab   :  { %v7696_v35 = vmul.f32 %v11519_v22, %v7686_v29 }
0x19ac   :  { %v14733_v47 = vpop.eup %14732  ;;  %v7695_v13 = vmul.f32 %v11519_v22, %v7685_v32 }
0x19ad   :  { %v14735_v25 = vpop.eup %14734  ;;  %v7688_v50 = vmul.f32 %v14733_v47, %v7656_v9  ;;  %v7706_v30 = vadd.f32 %v11520_v43, %v7696_v35  ;;  %v7861_v9 = vld [vmem:[%s16733_s30 + $0x40] sm:$0xff] }
0x19ae   :  { %v7705_v44 = vadd.f32 %v11520_v43, %v7695_v13  ;;  %v7687_v53 = vmul.f32 %v14735_v25, %v7655_v7  ;;  %v14254_v7 = vpack.c.bf16 %v7862_v14, %v7861_v9 }
0x19af   :  { %v7698_v56 = vmul.f32 %v11519_v22, %v7688_v50 }
0x19b0   :  { %13275 = vmatprep.mubr.msk.f32.mxu1 %vm141_vm0, %v7705_v44  ;;  %v7697_v38 = vmul.f32 %v11519_v22, %v7687_v53 }
0x19b1   :  { %13276 = vmatmul.mubr.msk.f32.vlgmr.msra.gmra.mrb[82].mxu1 %vm141_vm0, %v7706_v30  ;;  %v7708_v62 = vadd.f32 %v11520_v43, %v7698_v56 }
0x19b2   :  { %v7707_v59 = vadd.f32 %v11520_v43, %v7697_v38  ;;  %14241 = vmatpush3.bf16.msra.mxu1 %v14238_v10 }
0x19b3   :  { %14243 = vmatprep.subr.bf16.mxu1 %v14242_v41 }
0x19b4   :  { %13278 = vmatprep.mubr.msk.f32.mxu1 %vm141_vm0, %v7707_v59 }
0x19b5   :  { %13279 = vmatmul.mubr.msk.f32.gmra.mrb[84].mxu1 %vm141_vm0, %v7708_v62 }
0x19b6   :  { %14245 = vmatpush3.bf16.msra.mxu1 %v14242_v41 }
0x19b7   :  { %14247 = vmatprep.subr.bf16.mxu1 %v14246_v3 }
0x19ba   :  { %14249 = vmatpush3.bf16.msra.mxu1 %v14246_v3 }
0x19bb   :  { %14251 = vmatprep.subr.bf16.mxu1 %v14250_v52 }
0x19be   :  { %14253 = vmatpush3.bf16.msra.mxu1 %v14250_v52 }
0x19bf   :  { %14255 = vmatprep.subr.bf16.mxu1 %v14254_v7 }
0x19c2   :  { %14257 = vmatpush3.bf16.msra.mxu1 %v14254_v7  ;;  %v11526_v7 = vld [vmem:[%s15063_s4] ss:$0 sm:$0xff] }
0x19c3   :  { %14259 = vmatprep.subr.bf16.mxu1 %v14258_v37 }
0x19c6   :  { %14261 = vmatpush3.bf16.msra.mxu1 %v14258_v37 }
0x19c7   :  { %14263 = vmatprep.subr.bf16.mxu1 %v14262_v55 }
0x19ca   :  { %14265 = vmatpush3.bf16.msra.mxu1 %v14262_v55 }
0x19cb   :  { %14267 = vmatprep.subr.bf16.mxu1 %v14266_v15 }
0x19ce   :  { %14269 = vmatpush3.bf16.msra.mxu1 %v14266_v15 }
0x1a84   :  { %v13277_v18 = vpop.f32.mrb[82].mxu1 }
0x1a85   :  { %v7804_v4 = vadd.f32 %v13277_v18, %v11521_v16  ;;  %v7798_v21 = vpop.f32.mrb[83].mxu1 }
0x1a86   :  { %v7799_v11 = vadd.f32 %v11521_v16, %v7798_v21 }
0x1a87   :  { %v7818_v24 = vmul.f32 %v7804_v4, %v7804_v4 }
0x1a88   :  { %v7817_v12 = vmul.f32 %v7799_v11, %v7799_v11  ;;  %v13280_v26 = vpop.f32.mrb[84].mxu1 }
0x1a89   :  { %v7822_v17 = vmul.f32 %v7818_v24, %v7804_v4  ;;  %v7814_v27 = vadd.f32 %v13280_v26, %v11521_v16  ;;  %v7808_v28 = vpop.f32.mrb[85].mxu1 }
0x1a8a   :  { %v7821_v19 = vmul.f32 %v7817_v12, %v7799_v11  ;;  %v7809_v23 = vadd.f32 %v11521_v16, %v7808_v28 }
0x1a8b   :  { %v7826_v5 = vmul.f32 0.044715, %v7822_v17  ;;  %v7820_v20 = vmul.f32 %v7814_v27, %v7814_v27 }
0x1a8c   :  { %v7825_v22 = vmul.f32 0.044715, %v7821_v19  ;;  %v7819_v31 = vmul.f32 %v7809_v23, %v7809_v23 }
0x1a8d   :  { %v7830_v29 = vadd.f32 %v7826_v5, %v7804_v4  ;;  %v7824_v32 = vmul.f32 %v7820_v20, %v7814_v27 }
0x1a8e   :  { %v7829_v43 = vadd.f32 %v7825_v22, %v7799_v11  ;;  %v7823_v35 = vmul.f32 %v7819_v31, %v7809_v23 }
0x1a8f   :  { %v7834_v47 = vmul.f32 0.7978846, %v7830_v29  ;;  %v7828_v13 = vmul.f32 0.044715, %v7824_v32 }
0x1a90   :  { %v7833_v25 = vmul.f32 0.7978846, %v7829_v43  ;;  %v7827_v50 = vmul.f32 0.044715, %v7823_v35 }
0x1a91   :  { %14736 = vtanh.f32 %v7834_v47  ;;  %v7832_v44 = vadd.f32 %v7828_v13, %v7814_v27  ;;  %v11531_v13 = vld [vmem:[%s16721_s0 + $0x180] sm:$0xff] }
0x1a92   :  { %v7831_v53 = vadd.f32 %v7827_v50, %v7809_v23  ;;  %14738 = vtanh.f32 %v7833_v25  ;;  %v11532_v25 = vld [vmem:[%s16721_s0 + $0x188] sm:$0xff]  ;;  %v11539_v50 = vld [vmem:[%s16721_s0 + $0x1c0] sm:$0xff] }
0x1a93   :  { %v7836_v30 = vmul.f32 0.7978846, %v7832_v44  ;;  %v14270_v44 = vpack.c.bf16 %v11532_v25, %v11531_v13 }
0x1a94   :  { %v7835_v56 = vmul.f32 0.7978846, %v7831_v53  ;;  %v11540_v53 = vld [vmem:[%s16721_s0 + $0x1c8] sm:$0xff] }
0x1a95   :  { %14740 = vtanh.f32 %v7836_v30  ;;  %v14286_v30 = vpack.c.bf16 %v11540_v53, %v11539_v50  ;;  %14271 = vmatprep.subr.bf16.mxu0 %v14270_v44  ;;  %v11545_v53 = vld [vmem:[%s16721_s0 + $0x1f0] sm:$0xff] }
0x1a96   :  { %14742 = vtanh.f32 %v7835_v56  ;;  %14273 = vmatpush3.bf16.msra.mxu0 %v14270_v44  ;;  %v11533_v56 = vld [vmem:[%s16721_s0 + $0x190] sm:$0xff] }
0x1a97   :  { %14287 = vmatprep.subr.bf16.mxu1 %v14286_v30 }
0x1a9b   :  { %v14737_v38 = vpop.eup %14736 }
0x1a9c   :  { %v14739_v59 = vpop.eup %14738  ;;  %v7842_v62 = vadd.f32 1.0, %v14737_v38  ;;  %v11534_v38 = vld [vmem:[%s16721_s0 + $0x198] sm:$0xff] }
0x1a9d   :  { %v7841_v34 = vadd.f32 1.0, %v14739_v59  ;;  %v11541_v59 = vld [vmem:[%s16721_s0 + $0x1d0] sm:$0xff] }
0x1a9e   :  { %v7846_v39 = vmul.f32 0.5, %v7842_v62  ;;  %v14274_v62 = vpack.c.bf16 %v11534_v38, %v11533_v56  ;;  %v11557_v56 = vld [vmem:[%s16721_s0 + $0x250] sm:$0xff]  ;;  %v11558_v38 = vld [vmem:[%s16721_s0 + $0x258] sm:$0xff] }
0x1a9f   :  { %v14741_v10 = vpop.eup %14740  ;;  %v7845_v63 = vmul.f32 0.5, %v7841_v34  ;;  %v11542_v34 = vld [vmem:[%s16721_s0 + $0x1d8] sm:$0xff] }
0x1aa0   :  { %v14743_v2 = vpop.eup %14742  ;;  %v7844_v41 = vadd.f32 1.0, %v14741_v10  ;;  %v7850_v3 = vmul.f32 %v7846_v39, %v7804_v4  ;;  %v14290_v39 = vpack.c.bf16 %v11542_v34, %v11541_v59  ;;  %14275 = vmatprep.subr.bf16.mxu0 %v14274_v62  ;;  %v11535_v10 = vld [vmem:[%s16721_s0 + $0x1a0] sm:$0xff] }
0x1aa1   :  { %v7849_v40 = vmul.f32 %v7845_v63, %v7799_v11  ;;  %v7843_v60 = vadd.f32 1.0, %v14743_v2  ;;  %14277 = vmatpush3.bf16.msra.mxu0 %v14274_v62  ;;  %v11536_v63 = vld [vmem:[%s16721_s0 + $0x1a8] sm:$0xff]  ;;  %v11547_v2 = vld [vmem:[%s16721_s0 + $0x200] sm:$0xff]  ;;  %v14322_v62 = vpack.c.bf16 %v11558_v38, %v11557_v56 }
0x1aa2   :  { %v7848_v57 = vmul.f32 0.5, %v7844_v41  ;;  %v14278_v41 = vpack.c.bf16 %v11536_v63, %v11535_v10  ;;  %v11551_v34 = vld [vmem:[%s16721_s0 + $0x220] sm:$0xff]  ;;  %v11564_v63 = vld [vmem:[%s16721_s0 + $0x288] sm:$0xff] }
0x1aa3   :  { %13313 = vmatprep.mubr.f32.mxu1 %v7849_v40  ;;  %v7847_v6 = vmul.f32 0.5, %v7843_v60  ;;  %v11548_v40 = vld [vmem:[%s16721_s0 + $0x208] sm:$0xff]  ;;  %v11563_v10 = vld [vmem:[%s16721_s0 + $0x280] sm:$0xff] }
0x1aa4   :  { %13314 = vmatmul.mubr.f32.vlgmr.msra.gmra.mrb[86].mxu1 %v7850_v3  ;;  %v7852_v9 = vmul.f32 %v7848_v57, %v7814_v27  ;;  %v14302_v60 = vpack.c.bf16 %v11548_v40, %v11547_v2  ;;  %14279 = vmatprep.subr.bf16.mxu0 %v14278_v41  ;;  %v11553_v40 = vld [vmem:[%s16721_s0 + $0x230] sm:$0xff] }
0x1aa5   :  { %v7851_v52 = vmul.f32 %v7847_v6, %v7809_v23  ;;  %14289 = vmatpush3.bf16.msra.mxu1 %v14286_v30  ;;  %v11546_v30 = vld [vmem:[%s16721_s0 + $0x1f8] sm:$0xff] }
0x1aa6   :  { %14291 = vmatprep.subr.bf16.mxu1 %v14290_v39  ;;  %v14298_v59 = vpack.c.bf16 %v11546_v30, %v11545_v53 }
0x1aa7   :  { %13316 = vmatprep.mubr.f32.mxu1 %v7851_v52 }
0x1aa8   :  { %13317 = vmatmul.mubr.f32.gmra.mrb[88].mxu1 %v7852_v9 }
0x1aa9   :  { %14293 = vmatpush3.bf16.msra.mxu1 %v14290_v39  ;;  %v11552_v39 = vld [vmem:[%s16721_s0 + $0x228] sm:$0xff] }
0x1aaa   :  { %14303 = vmatprep.subr.bf16.mxu1 %v14302_v60  ;;  %v14310_v2 = vpack.c.bf16 %v11552_v39, %v11551_v34 }
0x1b77   :  { %v13315_v14 = vpop.f32.mrb[86].mxu1 }
0x1b78   :  { %v7955_v1 = vadd.f32 %v13315_v14, %v16046_v48  ;;  %v7935_v36 = vpop.f32.mrb[87].mxu1 }
0x1b79   :  { %v7954_v37 = vadd.f32 %v7935_v36, %v16048_v54 }
0x1b7a   :  { %v16102_v49 = vadd.f32 %v11526_v7, %v7955_v1 }
0x1b7b   :  { %v16104_v0 = vadd.f32 %v11526_v7, %v7954_v37  ;;  %v13318_v55 = vpop.f32.mrb[88].mxu1 }
0x1b7c   :  { %v7957_v58 = vadd.f32 %v13318_v55, %v16056_v45  ;;  %v7945_v61 = vpop.f32.mrb[89].mxu1  ;;  %v7976_v15 = vsel %vm141_vm0, %v16102_v49, 0.0 }
0x1b7d   :  { %v7956_v16 = vadd.f32 %v7945_v61, %v16058_v33  ;;  %7977 = vadd.xlane.f32.xlu1 %v7976_v15  ;;  %v7973_v48 = vsel %vm141_vm0, %v16104_v0, 0.0  ;;  %v11529_v15 = vld [vmem:[%s16724_s17 + $0x1] ss:$0 sm:$0xff] }
0x1b7e   :  { %v16112_v18 = vadd.f32 %v11526_v7, %v7957_v58  ;;  %7974 = vadd.xlane.f32.xlu0 %v7973_v48 }
0x1b7f   :  { %v16114_v54 = vadd.f32 %v11526_v7, %v7956_v16 }
0x1b80   :  { %v7982_v4 = vsel %vm141_vm0, %v16112_v18, 0.0 }
0x1b81   :  { %7983 = vadd.xlane.f32.xlu1 %v7982_v4  ;;  %v7979_v45 = vsel %vm141_vm0, %v16114_v54, 0.0 }
0x1b82   :  { %7980 = vadd.xlane.f32.xlu0 %v7979_v45  ;;  %v11530_v45 = vld [vmem:[%s16725_s21 + $0x1] ss:$0 sm:$0xff] }
0x1c0a   :  { %v7978_v21 = vpop.xlane.xlu1 %7977 }
0x1c0b   :  { %v7986_v11 = vmul.f32 0.03125, %v7978_v21  ;;  %v7975_v33 = vpop.xlane.xlu0 %7974 }
0x1c0c   :  { %v7985_v24 = vmul.f32 0.03125, %v7975_v33 }
0x1c0d   :  { %v16121_v12 = vsub.f32 %v16102_v49, %v7986_v11  ;;  %v11537_v11 = vld [vmem:[%s16721_s0 + $0x1b0] sm:$0xff] }
0x1c0e   :  { %v16124_v26 = vsub.f32 %v16104_v0, %v7985_v24  ;;  %v7984_v17 = vpop.xlane.xlu1 %7983 }
0x1c0f   :  { %v7988_v27 = vmul.f32 0.03125, %v7984_v17  ;;  %v7981_v28 = vpop.xlane.xlu0 %7980  ;;  %v7994_v19 = vmul.f32 %v16121_v12, %v16121_v12  ;;  %v11538_v17 = vld [vmem:[%s16721_s0 + $0x1b8] sm:$0xff] }
0x1c10   :  { %v7987_v23 = vmul.f32 0.03125, %v7981_v28  ;;  %v7993_v5 = vmul.f32 %v16124_v26, %v16124_v26  ;;  %v11550_v28 = vld [vmem:[%s16721_s0 + $0x218] sm:$0xff] }
0x1c11   :  { %v16131_v20 = vsub.f32 %v16112_v18, %v7988_v27  ;;  %v8000_v22 = vsel %vm141_vm0, %v7994_v19, 0.0  ;;  %v11549_v27 = vld [vmem:[%s16721_s0 + $0x210] sm:$0xff] }
0x1c12   :  { %v16135_v31 = vsub.f32 %v16114_v54, %v7987_v23  ;;  %8001 = vadd.xlane.f32.xlu1 %v8000_v22  ;;  %v7997_v29 = vsel %vm141_vm0, %v7993_v5, 0.0 }
0x1c13   :  { %7998 = vadd.xlane.f32.xlu0 %v7997_v29  ;;  %v7996_v32 = vmul.f32 %v16131_v20, %v16131_v20  ;;  %v14282_v29 = vpack.c.bf16 %v11538_v17, %v11537_v11  ;;  %v11569_v11 = vld [vmem:[%s16721_s0 + $0x2b0] sm:$0xff]  ;;  %v11575_v17 = vld [vmem:[%s16721_s0 + $0x2e0] sm:$0xff] }
0x1c14   :  { %v7995_v43 = vmul.f32 %v16135_v31, %v16135_v31 }
0x1c15   :  { %v8006_v35 = vsel %vm141_vm0, %v7996_v32, 0.0  ;;  %v14306_v32 = vpack.c.bf16 %v11550_v28, %v11549_v27  ;;  %v11576_v27 = vld [vmem:[%s16721_s0 + $0x2e8] sm:$0xff] }
0x1c16   :  { %8007 = vadd.xlane.f32.xlu1 %v8006_v35  ;;  %v8003_v47 = vsel %vm141_vm0, %v7995_v43, 0.0  ;;  %v11543_v35 = vld [vmem:[%s16721_s0 + $0x1e0] sm:$0xff]  ;;  %v14358_v28 = vpack.c.bf16 %v11576_v27, %v11575_v17 }
0x1c17   :  { %8004 = vadd.xlane.f32.xlu0 %v8003_v47  ;;  %v11556_v47 = vld [vmem:[%s16721_s0 + $0x248] sm:$0xff] }
0x1c9f   :  { %v8002_v3 = vpop.xlane.xlu1 %8001 }
0x1ca0   :  { %v8010_v57 = vmul.f32 0.03125, %v8002_v3  ;;  %v7999_v6 = vpop.xlane.xlu0 %7998  ;;  %v11565_v3 = vld [vmem:[%s16721_s0 + $0x290] sm:$0xff] }
0x1ca1   :  { %v8009_v52 = vmul.f32 0.03125, %v7999_v6 }
0x1ca2   :  { %v8014_v9 = vadd.f32 1e-05, %v8010_v57  ;;  %v11566_v57 = vld [vmem:[%s16721_s0 + $0x298] sm:$0xff] }
0x1ca3   :  { %v8013_v14 = vadd.f32 1e-05, %v8009_v52  ;;  %v8008_v7 = vpop.xlane.xlu1 %8007  ;;  %v14338_v52 = vpack.c.bf16 %v11566_v57, %v11565_v3 }
0x1ca4   :  { %14744 = vrsqrt.f32 %v8014_v9  ;;  %v8012_v1 = vmul.f32 0.03125, %v8008_v7  ;;  %v8005_v36 = vpop.xlane.xlu0 %8004  ;;  %v11559_v9 = vld [vmem:[%s16721_s0 + $0x260] sm:$0xff] }
0x1ca5   :  { %14746 = vrsqrt.f32 %v8013_v14  ;;  %v8011_v37 = vmul.f32 0.03125, %v8005_v36  ;;  %v11560_v14 = vld [vmem:[%s16721_s0 + $0x268] sm:$0xff]  ;;  %v11571_v7 = vld [vmem:[%s16721_s0 + $0x2c0] sm:$0xff] }
0x1ca6   :  { %v8016_v55 = vadd.f32 1e-05, %v8012_v1  ;;  %v11572_v1 = vld [vmem:[%s16721_s0 + $0x2c8] sm:$0xff]  ;;  %v14326_v36 = vpack.c.bf16 %v11560_v14, %v11559_v9 }
0x1ca7   :  { %v8015_v58 = vadd.f32 1e-05, %v8011_v37  ;;  %v14350_v37 = vpack.c.bf16 %v11572_v1, %v11571_v7 }
0x1ca8   :  { %14748 = vrsqrt.f32 %v8016_v55  ;;  %v11561_v55 = vld [vmem:[%s16721_s0 + $0x270] sm:$0xff] }
0x1ca9   :  { %14750 = vrsqrt.f32 %v8015_v58  ;;  %v11562_v58 = vld [vmem:[%s16721_s0 + $0x278] sm:$0xff] }
0x1cae   :  { %v14745_v61 = vpop.eup %14744 }
0x1caf   :  { %v14747_v16 = vpop.eup %14746  ;;  %v8022_v48 = vmul.f32 %v14745_v61, %v16121_v12  ;;  %v11573_v61 = vld [vmem:[%s16721_s0 + $0x2d0] sm:$0xff] }
0x1cb0   :  { %v8021_v4 = vmul.f32 %v14747_v16, %v16124_v26  ;;  %v14330_v16 = vpack.c.bf16 %v11562_v58, %v11561_v55 }
0x1cb1   :  { %v8032_v21 = vmul.f32 %v11529_v15, %v8022_v48 }
0x1cb2   :  { %v14749_v33 = vpop.eup %14748  ;;  %v8031_v24 = vmul.f32 %v11529_v15, %v8021_v4  ;;  %v11567_v4 = vld [vmem:[%s16721_s0 + $0x2a0] sm:$0xff] }
0x1cb3   :  { %v14751_v19 = vpop.eup %14750  ;;  %v8024_v23 = vmul.f32 %v14749_v33, %v16131_v20  ;;  %v16168_v26 = vadd.f32 %v11530_v45, %v8032_v21  ;;  %v11544_v20 = vld [vmem:[%s16721_s0 + $0x1e8] sm:$0xff]  ;;  %v11570_v33 = vld [vmem:[%s16721_s0 + $0x2b8] sm:$0xff] }
0x1cb4   :  { %v16165_v5 = vadd.f32 %v11530_v45, %v8031_v24  ;;  %v8023_v12 = vmul.f32 %v14751_v19, %v16135_v31  ;;  %v11555_v31 = vld [vmem:[%s16721_s0 + $0x240] sm:$0xff]  ;;  %v14294_v50 = vpack.c.bf16 %v11544_v20, %v11543_v35  ;;  %v14346_v24 = vpack.c.bf16 %v11570_v33, %v11569_v11  ;;  %v11577_v19 = vld [vmem:[%s16721_s0 + $0x2f0] sm:$0xff] }
0x1cb5   :  { %v8034_v22 = vmul.f32 %v11529_v15, %v8024_v23  ;;  %v14318_v44 = vpack.c.bf16 %v11556_v47, %v11555_v31  ;;  %v11578_v23 = vld [vmem:[%s16721_s0 + $0x2f8] sm:$0xff] }
0x1cb6   :  { %v8033_v43 = vmul.f32 %v11529_v15, %v8023_v12  ;;  %13327 = vmatprep.mubr.msk.f32.mxu0 %vm141_vm0, %v16165_v5  ;;  %13355 = vmatprep.mubr.msk.f32.mxu1 %vm141_vm0, %v16165_v5  ;;  %v11574_v15 = vld [vmem:[%s16721_s0 + $0x2d8] sm:$0xff]  ;;  %v14362_v12 = vpack.c.bf16 %v11578_v23, %v11577_v19 }
0x1cb7   :  { %13328 = vmatmul.mubr.msk.f32.vlgmr.msra.gmra.mrb[96].mxu0 %vm141_vm0, %v16168_v26  ;;  %13356 = vmatmul.mubr.msk.f32.vlgmr.msra.gmra.mrb[90].mxu1 %vm141_vm0, %v16168_v26  ;;  %v16184_v25 = vadd.f32 %v11530_v45, %v8034_v22  ;;  %v14354_v48 = vpack.c.bf16 %v11574_v15, %v11573_v61 }
0x1cb8   :  { %v16182_v13 = vadd.f32 %v11530_v45, %v8033_v43  ;;  %14281 = vmatpush3.bf16.msra.mxu0 %v14278_v41  ;;  %14305 = vmatpush3.bf16.msra.mxu1 %v14302_v60  ;;  %v14334_v41 = vpack.c.bf16 %v11564_v63, %v11563_v10  ;;  %v11554_v60 = vld [vmem:[%s16721_s0 + $0x238] sm:$0xff]  ;;  %v11568_v45 = vld [vmem:[%s16721_s0 + $0x2a8] sm:$0xff] }
0x1cb9   :  { %14283 = vmatprep.subr.bf16.mxu0 %v14282_v29  ;;  %14307 = vmatprep.subr.bf16.mxu1 %v14306_v32  ;;  %v14314_v6 = vpack.c.bf16 %v11554_v60, %v11553_v40  ;;  %v14342_v21 = vpack.c.bf16 %v11568_v45, %v11567_v4 }
0x1cba   :  { %13330 = vmatprep.mubr.msk.f32.mxu0 %vm141_vm0, %v16182_v13  ;;  %13358 = vmatprep.mubr.msk.f32.mxu1 %vm141_vm0, %v16182_v13 }
0x1cbb   :  { %13331 = vmatmul.mubr.msk.f32.gmra.mrb[98].mxu0 %vm141_vm0, %v16184_v25  ;;  %13359 = vmatmul.mubr.msk.f32.gmra.mrb[92].mxu1 %vm141_vm0, %v16184_v25 }
0x1cbc   :  { %14285 = vmatpush3.bf16.msra.mxu0 %v14282_v29  ;;  %13341 = vmatprep.mubr.msk.f32.mxu0 %vm141_vm0, %v16165_v5 }
0x1cbd   :  { %14309 = vmatpush3.bf16.msra.mxu1 %v14306_v32  ;;  %13383 = vmatprep.mubr.msk.f32.mxu1 %vm141_vm0, %v16165_v5 }
0x1cbe   :  { %14295 = vmatprep.subr.bf16.mxu0 %v14294_v50  ;;  %14319 = vmatprep.subr.bf16.mxu1 %v14318_v44 }
0x1cbf   :  { %13342 = vmatmul.mubr.msk.f32.vlgmr.msra.gmra.mrb[100].mxu0 %vm141_vm0, %v16168_v26 }
0x1cc0   :  { %13384 = vmatmul.mubr.msk.f32.vlgmr.msra.gmra.mrb[94].mxu1 %vm141_vm0, %v16168_v26  ;;  %13344 = vmatprep.mubr.msk.f32.mxu0 %vm141_vm0, %v16182_v13 }
0x1cc1   :  { %14297 = vmatpush3.bf16.msra.mxu0 %v14294_v50  ;;  %13386 = vmatprep.mubr.msk.f32.mxu1 %vm141_vm0, %v16182_v13 }
0x1cc2   :  { %14321 = vmatpush3.bf16.msra.mxu1 %v14318_v44  ;;  %14299 = vmatprep.subr.bf16.mxu0 %v14298_v59 }
0x1cc3   :  { %13345 = vmatmul.mubr.msk.f32.gmra.mrb[102].mxu0 %vm141_vm0, %v16184_v25  ;;  %14323 = vmatprep.subr.bf16.mxu1 %v14322_v62 }
0x1cc4   :  { %13387 = vmatmul.mubr.msk.f32.gmra.mrb[96].mxu1 %vm141_vm0, %v16184_v25  ;;  %13369 = vmatprep.mubr.msk.f32.mxu0 %vm141_vm0, %v16165_v5 }
0x1cc5   :  { %14301 = vmatpush3.bf16.msra.mxu0 %v14298_v59  ;;  %13411 = vmatprep.mubr.msk.f32.mxu1 %vm141_vm0, %v16165_v5 }
0x1cc6   :  { %14325 = vmatpush3.bf16.msra.mxu1 %v14322_v62  ;;  %14311 = vmatprep.subr.bf16.mxu0 %v14310_v2 }
0x1cc7   :  { %14335 = vmatprep.subr.bf16.mxu1 %v14334_v41 }
0x1cc8   :  { %13370 = vmatmul.mubr.msk.f32.vlgmr.msra.gmra.mrb[104].mxu0 %vm141_vm0, %v16168_v26 }
0x1cc9   :  { %13412 = vmatmul.mubr.msk.f32.vlgmr.msra.gmra.mrb[98].mxu1 %vm141_vm0, %v16168_v26  ;;  %13372 = vmatprep.mubr.msk.f32.mxu0 %vm141_vm0, %v16182_v13 }
0x1cca   :  { %14313 = vmatpush3.bf16.msra.mxu0 %v14310_v2  ;;  %13414 = vmatprep.mubr.msk.f32.mxu1 %vm141_vm0, %v16182_v13 }
0x1ccb   :  { %14337 = vmatpush3.bf16.msra.mxu1 %v14334_v41  ;;  %14315 = vmatprep.subr.bf16.mxu0 %v14314_v6 }
0x1ccc   :  { %13373 = vmatmul.mubr.msk.f32.gmra.mrb[106].mxu0 %vm141_vm0, %v16184_v25  ;;  %14339 = vmatprep.subr.bf16.mxu1 %v14338_v52 }
0x1ccd   :  { %13415 = vmatmul.mubr.msk.f32.gmra.mrb[100].mxu1 %vm141_vm0, %v16184_v25  ;;  %13397 = vmatprep.mubr.msk.f32.mxu0 %vm141_vm0, %v16165_v5 }
0x1cce   :  { %14317 = vmatpush3.bf16.msra.mxu0 %v14314_v6  ;;  %13439 = vmatprep.mubr.msk.f32.mxu1 %vm141_vm0, %v16165_v5 }
0x1ccf   :  { %14341 = vmatpush3.bf16.msra.mxu1 %v14338_v52  ;;  %14327 = vmatprep.subr.bf16.mxu0 %v14326_v36 }
0x1cd0   :  { %14351 = vmatprep.subr.bf16.mxu1 %v14350_v37 }
0x1cd1   :  { %13398 = vmatmul.mubr.msk.f32.vlgmr.msra.gmra.mrb[108].mxu0 %vm141_vm0, %v16168_v26 }
0x1cd2   :  { %13440 = vmatmul.mubr.msk.f32.vlgmr.msra.gmra.mrb[102].mxu1 %vm141_vm0, %v16168_v26  ;;  %13400 = vmatprep.mubr.msk.f32.mxu0 %vm141_vm0, %v16182_v13 }
0x1cd3   :  { %14329 = vmatpush3.bf16.msra.mxu0 %v14326_v36  ;;  %13442 = vmatprep.mubr.msk.f32.mxu1 %vm141_vm0, %v16182_v13 }
0x1cd4   :  { %14353 = vmatpush3.bf16.msra.mxu1 %v14350_v37  ;;  %14331 = vmatprep.subr.bf16.mxu0 %v14330_v16 }
0x1cd5   :  { %13401 = vmatmul.mubr.msk.f32.gmra.mrb[110].mxu0 %vm141_vm0, %v16184_v25  ;;  %14355 = vmatprep.subr.bf16.mxu1 %v14354_v48 }
0x1cd6   :  { %13443 = vmatmul.mubr.msk.f32.gmra.mrb[104].mxu1 %vm141_vm0, %v16184_v25  ;;  %13425 = vmatprep.mubr.msk.f32.mxu0 %vm141_vm0, %v16165_v5 }
0x1cd7   :  { %14333 = vmatpush3.bf16.msra.mxu0 %v14330_v16  ;;  %13467 = vmatprep.mubr.msk.f32.mxu1 %vm141_vm0, %v16165_v5 }
0x1cd8   :  { %14357 = vmatpush3.bf16.msra.mxu1 %v14354_v48  ;;  %14343 = vmatprep.subr.bf16.mxu0 %v14342_v21 }
0x1cda   :  { %13426 = vmatmul.mubr.msk.f32.vlgmr.msra.gmra.mrb[112].mxu0 %vm141_vm0, %v16168_v26 }
0x1cdb   :  { %13468 = vmatmul.mubr.msk.f32.vlgmr.msra.gmra.mrb[106].mxu1 %vm141_vm0, %v16168_v26  ;;  %13428 = vmatprep.mubr.msk.f32.mxu0 %vm141_vm0, %v16182_v13 }
0x1cdc   :  { %14345 = vmatpush3.bf16.msra.mxu0 %v14342_v21  ;;  %13470 = vmatprep.mubr.msk.f32.mxu1 %vm141_vm0, %v16182_v13 }
0x1cdd   :  { %14347 = vmatprep.subr.bf16.mxu0 %v14346_v24 }
0x1cde   :  { %13429 = vmatmul.mubr.msk.f32.gmra.mrb[114].mxu0 %vm141_vm0, %v16184_v25 }
0x1cdf   :  { %13471 = vmatmul.mubr.msk.f32.gmra.mrb[108].mxu1 %vm141_vm0, %v16184_v25  ;;  %13453 = vmatprep.mubr.msk.f32.mxu0 %vm141_vm0, %v16165_v5 }
0x1ce0   :  { %14349 = vmatpush3.bf16.msra.mxu0 %v14346_v24 }
0x1ce1   :  { %14359 = vmatprep.subr.bf16.mxu0 %v14358_v28 }
0x1ce3   :  { %13454 = vmatmul.mubr.msk.f32.vlgmr.msra.gmra.mrb[116].mxu0 %vm141_vm0, %v16168_v26 }
0x1ce4   :  { %13456 = vmatprep.mubr.msk.f32.mxu0 %vm141_vm0, %v16182_v13  ;;  %14361 = vmatpush3.bf16.msra.mxu0 %v14358_v28 }
0x1ce5   :  { %14363 = vmatprep.subr.bf16.mxu0 %v14362_v12 }
0x1ce7   :  { %13457 = vmatmul.mubr.msk.f32.gmra.mrb[118].mxu0 %vm141_vm0, %v16184_v25 }
0x1ce8   :  { %14365 = vmatpush3.bf16.msra.mxu0 %v14362_v12  ;;  %13481 = vmatprep.mubr.msk.f32.mxu0 %vm141_vm0, %v16165_v5 }
0x1ceb   :  { %13482 = vmatmul.mubr.msk.f32.vlgmr.msra.gmra.mrb[120].mxu0 %vm141_vm0, %v16168_v26 }
0x1cec   :  { %13484 = vmatprep.mubr.msk.f32.mxu0 %vm141_vm0, %v16182_v13 }
0x1cef   :  { %13485 = vmatmul.mubr.msk.f32.gmra.mrb[122].mxu0 %vm141_vm0, %v16184_v25 }
0x1d8a   :  { %v13329_v22 = vpop.f32.mrb[96].mxu0  ;;  %v16302_v29 = vpop.f32.mrb[90].mxu1 }
0x1d8b   :  { %v8172_v32 = vpop.f32.mrb[97].mxu0  ;;  %v8342_v43 = vpop.f32.mrb[91].mxu1 }
0x1d8c   :  { %13495 = vmatprep.mubr.msk.f32.mxu1 %vm1139_vm1, %v8172_v32 }
0x1d8e   :  { %v13332_v35 = vpop.f32.mrb[98].mxu0  ;;  %v16305_v20 = vpop.f32.mrb[92].mxu1 }
0x1d8f   :  { %v8182_v5 = vpop.f32.mrb[99].mxu0  ;;  %v16307_v31 = vpop.f32.mrb[93].mxu1 }
0x1d92   :  { %v16309_v26 = vpop.f32.mrb[100].mxu0 }
0x1d93   :  { %v13385_v47 = vpop.f32.mrb[94].mxu1  ;;  %v8257_v13 = vpop.f32.mrb[101].mxu0 }
0x1d94   :  { %v8512_v50 = vpop.f32.mrb[95].mxu1  ;;  %13509 = vmatprep.mubr.msk.f32.mxu0 %vm1139_vm1, %v8257_v13 }
0x1d95   :  { %v14366_v25 = vpack.c.bf16 %v13385_v47, %v8512_v50  ;;  %v16388_v50 = vld [vmem:[%s16727_s29 + $0x8] sm:$0xff] }
0x1d96   :  { %v16312_v44 = vpop.f32.mrb[102].mxu0 }
0x1d97   :  { %v13388_v53 = vpop.f32.mrb[96].mxu1  ;;  %14368 = vmatprep.subr.msk.bf16.mxu1 %vm15200_vm2, %v14366_v25  ;;  %v8267_v30 = vpop.f32.mrb[103].mxu0 }
0x1d98   :  { %v8522_v56 = vpop.f32.mrb[97].mxu1  ;;  %14371 = vmatpush3.bf16.xpose.msk.msra.mxu1 %vm15200_vm2, %v14366_v25 }
0x1d99   :  { %v14372_v38 = vpack.c.bf16 %v13388_v53, %v8522_v56 }
0x1d9b   :  { %v16318_v59 = vpop.f32.mrb[104].mxu0  ;;  %14374 = vmatprep.subr.msk.bf16.mxu1 %vm15200_vm2, %v14372_v38 }
0x1d9c   :  { %v13413_v62 = vpop.f32.mrb[98].mxu1  ;;  %v16322_v34 = vpop.f32.mrb[105].mxu0 }
0x1d9d   :  { %v8682_v39 = vpop.f32.mrb[99].mxu1 }
0x1d9e   :  { %v14390_v10 = vpack.c.bf16 %v13413_v62, %v8682_v39  ;;  %v14848_v39 = vld [vmem:[%s16727_s29 + $0x18] sm:$0xff] }
0x1d9f   :  { %v16324_v63 = vpop.f32.mrb[106].mxu0 }
0x1da0   :  { %v13416_v2 = vpop.f32.mrb[100].mxu1  ;;  %v16326_v41 = vpop.f32.mrb[107].mxu0  ;;  %14377 = vmatpush3.bf16.xpose.msk.msra.mxu1 %vm15200_vm2, %v14372_v38 }
0x1da1   :  { %v8692_v40 = vpop.f32.mrb[101].mxu1  ;;  %14392 = vmatprep.subr.msk.bf16.mxu1 %vm15200_vm2, %v14390_v10 }
0x1da2   :  { %v14396_v60 = vpack.c.bf16 %v13416_v2, %v8692_v40 }
0x1da4   :  { %v13399_v3 = vpop.f32.mrb[108].mxu0 }
0x1da5   :  { %v13441_v57 = vpop.f32.mrb[102].mxu1  ;;  %v8597_v6 = vpop.f32.mrb[109].mxu0 }
0x1da6   :  { %v14378_v52 = vpack.c.bf16 %v13399_v3, %v8597_v6  ;;  %v8852_v9 = vpop.f32.mrb[103].mxu1 }
0x1da7   :  { %v14414_v14 = vpack.c.bf16 %v13441_v57, %v8852_v9  ;;  %13496 = vmatmul.mubr.msk.f32.vlgmr.msra.gmra.mrb[110].mxu1 %vm1139_vm1, %v13329_v22 }
0x1da8   :  { %v13402_v7 = vpop.f32.mrb[110].mxu0  ;;  %14380 = vmatprep.subr.msk.bf16.mxu0 %vm15200_vm2, %v14378_v52  ;;  %13498 = vmatprep.mubr.msk.f32.mxu1 %vm1139_vm1, %v8182_v5 }
0x1da9   :  { %v13444_v1 = vpop.f32.mrb[104].mxu1  ;;  %v8607_v36 = vpop.f32.mrb[111].mxu0  ;;  %14383 = vmatpush3.bf16.xpose.msk.msra.mxu0 %vm15200_vm2, %v14378_v52  ;;  %14395 = vmatpush3.bf16.xpose.msk.msra.mxu1 %vm15200_vm2, %v14390_v10 }
0x1daa   :  { %v14384_v37 = vpack.c.bf16 %v13402_v7, %v8607_v36  ;;  %v8862_v55 = vpop.f32.mrb[105].mxu1  ;;  %14398 = vmatprep.subr.msk.bf16.mxu1 %vm15200_vm2, %v14396_v60 }
0x1dab   :  { %v14418_v58 = vpack.c.bf16 %v13444_v1, %v8862_v55  ;;  %13499 = vmatmul.mubr.msk.f32.gmra.mrb[112].mxu1 %vm1139_vm1, %v13332_v35 }
0x1dac   :  { %14386 = vmatprep.subr.msk.bf16.mxu0 %vm15200_vm2, %v14384_v37  ;;  %13523 = vmatprep.mubr.msk.f32.mxu1 %vm1139_vm1, %v8342_v43 }
0x1dad   :  { %v13427_v61 = vpop.f32.mrb[112].mxu0 }
0x1dae   :  { %v13469_v15 = vpop.f32.mrb[106].mxu1  ;;  %v8767_v16 = vpop.f32.mrb[113].mxu0 }
0x1daf   :  { %v14402_v48 = vpack.c.bf16 %v13427_v61, %v8767_v16  ;;  %v9022_v4 = vpop.f32.mrb[107].mxu1 }
0x1db0   :  { %v16346_v45 = vpack.c.bf16 %v13469_v15, %v9022_v4 }
0x1db1   :  { %v13430_v21 = vpop.f32.mrb[114].mxu0  ;;  %14389 = vmatpush3.bf16.xpose.msk.msra.mxu0 %vm15200_vm2, %v14384_v37  ;;  %14401 = vmatpush3.bf16.xpose.msk.msra.mxu1 %vm15200_vm2, %v14396_v60 }
0x1db2   :  { %v13472_v11 = vpop.f32.mrb[108].mxu1  ;;  %v8777_v33 = vpop.f32.mrb[115].mxu0  ;;  %14404 = vmatprep.subr.msk.bf16.mxu0 %vm15200_vm2, %v14402_v48  ;;  %14415 = vmatprep.subr.bf16.mxu1 %v14414_v14 }
0x1db3   :  { %v14408_v24 = vpack.c.bf16 %v13430_v21, %v8777_v33  ;;  %v9032_v17 = vpop.f32.mrb[109].mxu1 }
0x1db4   :  { %v16354_v27 = vpack.c.bf16 %v13472_v11, %v9032_v17 }
0x1db6   :  { %v13455_v28 = vpop.f32.mrb[116].mxu0 }
0x1db7   :  { %v8937_v19 = vpop.f32.mrb[117].mxu0 }
0x1db8   :  { %v14422_v23 = vpack.c.bf16 %v13455_v28, %v8937_v19  ;;  %13510 = vmatmul.mubr.msk.f32.vlgmr.msra.gmra.mrb[124].mxu0 %vm1139_vm1, %v16309_v26  ;;  %13524 = vmatmul.mubr.msk.f32.vlgmr.msra.gmra.mrb[114].mxu1 %vm1139_vm1, %v16302_v29 }
0x1db9   :  { %13512 = vmatprep.mubr.msk.f32.mxu0 %vm1139_vm1, %v8267_v30  ;;  %13526 = vmatprep.mubr.msk.f32.mxu1 %vm1139_vm1, %v16307_v31 }
0x1dba   :  { %v13458_v12 = vpop.f32.mrb[118].mxu0  ;;  %14407 = vmatpush3.bf16.xpose.msk.msra.mxu0 %vm15200_vm2, %v14402_v48  ;;  %14417 = vmatpush3.bf16.msra.mxu1 %v14414_v14 }
0x1dbb   :  { %v8947_v22 = vpop.f32.mrb[119].mxu0  ;;  %14410 = vmatprep.subr.msk.bf16.mxu0 %vm15200_vm2, %v14408_v24  ;;  %14419 = vmatprep.subr.bf16.mxu1 %v14418_v58 }
0x1dbc   :  { %v14426_v32 = vpack.c.bf16 %v13458_v12, %v8947_v22  ;;  %13513 = vmatmul.mubr.msk.f32.gmra.mrb[126].mxu0 %vm1139_vm1, %v16312_v44  ;;  %13527 = vmatmul.mubr.msk.f32.gmra.mrb[116].mxu1 %vm1139_vm1, %v16305_v20  ;;  %v16394_v44 = vld [vmem:[%s16727_s29] sm:$0xff] }
0x1dbd   :  { %13537 = vmatprep.mubr.msk.f32.mxu0 %vm1139_vm1, %v16322_v34 }
0x1dbe   :  { %v13483_v29 = vpop.f32.mrb[120].mxu0  ;;  %14421 = vmatpush3.bf16.msra.mxu1 %v14418_v58 }
0x1dbf   :  { %v9107_v43 = vpop.f32.mrb[121].mxu0  ;;  %14431 = vmatprep.subr.bf16.mxu1 %v16346_v45 }
0x1dc0   :  { %v16374_v35 = vpack.c.bf16 %v13483_v29, %v9107_v43 }
0x1dc2   :  { %v13486_v5 = vpop.f32.mrb[122].mxu0  ;;  %14413 = vmatpush3.bf16.xpose.msk.msra.mxu0 %vm15200_vm2, %v14408_v24 }
0x1dc3   :  { %v9117_v31 = vpop.f32.mrb[123].mxu0  ;;  %14423 = vmatprep.subr.bf16.mxu0 %v14422_v23 }
0x1dc4   :  { %v16378_v26 = vpack.c.bf16 %v13486_v5, %v9117_v31 }
0x1dc9   :  { %13538 = vmatmul.mubr.msk.f32.vlgmr.msra.gmra.mrb[128].mxu0 %vm1139_vm1, %v16318_v59 }
0x1dca   :  { %13540 = vmatprep.mubr.msk.f32.mxu0 %vm1139_vm1, %v16326_v41  ;;  %14425 = vmatpush3.bf16.msra.mxu0 %v14422_v23 }
0x1dcb   :  { %14427 = vmatprep.subr.bf16.mxu0 %v14426_v32 }
0x1dcd   :  { %13541 = vmatmul.mubr.msk.f32.gmra.mrb[130].mxu0 %vm1139_vm1, %v16324_v63  ;;  %v14849_v63 = vld [vmem:[%s16727_s29 + $0x10] sm:$0xff] }
0x1dce   :  { %14429 = vmatpush3.bf16.msra.mxu0 %v14426_v32 }
0x1dcf   :  { %14439 = vmatprep.subr.bf16.mxu0 %v16374_v35 }
0x1e7a   :  { %v13497_v51 = vpop.f32.mrb[110].mxu1 }
0x1e7b   :  { %v9563_v20 = vmul.f32 0.35355338, %v13497_v51  ;;  %v9216_v47 = vpop.f32.mrb[111].mxu1 }
0x1e7c   :  { %v9562_v13 = vmul.f32 0.35355338, %v9216_v47 }
0x1e7d   :  { %v16391_v25 = vadd.f32 %v16388_v50, %v9563_v20 }
0x1e7e   :  { %v16397_v53 = vadd.f32 %v16394_v44, %v9562_v13  ;;  %v13500_v30 = vpop.f32.mrb[112].mxu1 }
0x1e7f   :  { %v9565_v56 = vmul.f32 0.35355338, %v13500_v30  ;;  %v9226_v38 = vpop.f32.mrb[113].mxu1  ;;  %v9597_v59 = vsel %vm141_vm0, %v16391_v25, -inf }
0x1e80   :  { %v9564_v62 = vmul.f32 0.35355338, %v9226_v38  ;;  %9598 = vmax.xlane.f32.xlu1 %v9597_v59  ;;  %v9594_v34 = vsel %vm141_vm0, %v16397_v53, -inf }
0x1e81   :  { %v16404_v10 = vadd.f32 %v14848_v39, %v9565_v56  ;;  %9595 = vmax.xlane.f32.xlu0 %v9594_v34 }
0x1e82   :  { %v16407_v2 = vadd.f32 %v14849_v63, %v9564_v62 }
0x1e83   :  { %v9603_v41 = vsel %vm141_vm0, %v16404_v10, -inf }
0x1e84   :  { %9604 = vmax.xlane.f32.xlu1 %v9603_v41  ;;  %v9600_v40 = vsel %vm141_vm0, %v16407_v2, -inf }
0x1e85   :  { %9601 = vmax.xlane.f32.xlu0 %v9600_v40 }
0x1e8b   :  { %v13511_v60 = vpop.f32.mrb[124].mxu0  ;;  %v13525_v3 = vpop.f32.mrb[114].mxu1 }
0x1e8c   :  { %v9567_v57 = vmul.f32 0.35355338, %v13511_v60  ;;  %v9325_v6 = vpop.f32.mrb[125].mxu0  ;;  %v9434_v52 = vpop.f32.mrb[115].mxu1  ;;  %v9571_v37 = vmul.f32 0.35355338, %v13525_v3 }
0x1e8d   :  { %v9566_v9 = vmul.f32 0.35355338, %v9325_v6  ;;  %v9570_v15 = vmul.f32 0.35355338, %v9434_v52 }
0x1e8e   :  { %v16414_v14 = vadd.f32 %v16388_v50, %v9567_v57  ;;  %v16428_v33 = vadd.f32 %v16388_v50, %v9571_v37 }
0x1e8f   :  { %v16417_v7 = vadd.f32 %v16394_v44, %v9566_v9  ;;  %v13514_v1 = vpop.f32.mrb[126].mxu0  ;;  %v13528_v36 = vpop.f32.mrb[116].mxu1  ;;  %v16433_v17 = vadd.f32 %v16394_v44, %v9570_v15 }
0x1e90   :  { %v9569_v55 = vmul.f32 0.35355338, %v13514_v1  ;;  %v9335_v58 = vpop.f32.mrb[127].mxu0  ;;  %v9444_v61 = vpop.f32.mrb[117].mxu1  ;;  %v9609_v48 = vsel %vm141_vm0, %v16414_v14, -inf  ;;  %v9621_v32 = vsel %vm141_vm0, %v16428_v33, -inf }
0x1e91   :  { %v9568_v16 = vmul.f32 0.35355338, %v9335_v58  ;;  %v9606_v4 = vsel %vm141_vm0, %v16417_v7, -inf  ;;  %9610 = vmax.xlane.f32.xlu1 %v9609_v48  ;;  %v9573_v28 = vmul.f32 0.35355338, %v13528_v36  ;;  %v9618_v29 = vsel %vm141_vm0, %v16433_v17, -inf }
0x1e92   :  { %v16423_v21 = vadd.f32 %v14848_v39, %v9569_v55  ;;  %9607 = vmax.xlane.f32.xlu0 %v9606_v4  ;;  %v9572_v19 = vmul.f32 0.35355338, %v9444_v61 }
0x1e93   :  { %v16425_v11 = vadd.f32 %v14849_v63, %v9568_v16  ;;  %v16437_v12 = vadd.f32 %v14848_v39, %v9573_v28 }
0x1e94   :  { %v9615_v24 = vsel %vm141_vm0, %v16423_v21, -inf  ;;  %v16439_v22 = vadd.f32 %v14849_v63, %v9572_v19 }
0x1e95   :  { %v9612_v23 = vsel %vm141_vm0, %v16425_v11, -inf  ;;  %9616 = vmax.xlane.f32.xlu1 %v9615_v24  ;;  %v9627_v51 = vsel %vm141_vm0, %v16437_v12, -inf }
0x1e96   :  { %9613 = vmax.xlane.f32.xlu0 %v9612_v23  ;;  %v9624_v20 = vsel %vm141_vm0, %v16439_v22, -inf }
0x1e99   :  { %9622 = vmax.xlane.f32.xlu1 %v9621_v32 }
0x1e9a   :  { %9619 = vmax.xlane.f32.xlu0 %v9618_v29 }
0x1e9c   :  { %v13539_v43 = vpop.f32.mrb[128].mxu0 }
0x1e9d   :  { %v9575_v5 = vmul.f32 0.35355338, %v13539_v43  ;;  %v9543_v31 = vpop.f32.mrb[129].mxu0  ;;  %9628 = vmax.xlane.f32.xlu1 %v9627_v51 }
0x1e9e   :  { %v9574_v47 = vmul.f32 0.35355338, %v9543_v31  ;;  %9625 = vmax.xlane.f32.xlu0 %v9624_v20 }
0x1e9f   :  { %v16450_v13 = vadd.f32 %v16388_v50, %v9575_v5 }
0x1ea0   :  { %v16453_v30 = vadd.f32 %v16394_v44, %v9574_v47  ;;  %v13542_v56 = vpop.f32.mrb[130].mxu0 }
0x1ea1   :  { %v9577_v38 = vmul.f32 0.35355338, %v13542_v56  ;;  %v9553_v59 = vpop.f32.mrb[131].mxu0  ;;  %v9633_v62 = vsel %vm141_vm0, %v16450_v13, -inf }
0x1ea2   :  { %v9576_v34 = vmul.f32 0.35355338, %v9553_v59  ;;  %9634 = vmax.xlane.f32.xlu1 %v9633_v62  ;;  %v9630_v41 = vsel %vm141_vm0, %v16453_v30, -inf }
0x1ea3   :  { %v16459_v40 = vadd.f32 %v14848_v39, %v9577_v38  ;;  %9631 = vmax.xlane.f32.xlu0 %v9630_v41 }
0x1ea4   :  { %v16461_v60 = vadd.f32 %v14849_v63, %v9576_v34 }
0x1ea5   :  { %v9639_v50 = vsel %vm141_vm0, %v16459_v40, -inf }
0x1ea6   :  { %9640 = vmax.xlane.f32.xlu1 %v9639_v50  ;;  %v9636_v44 = vsel %vm141_vm0, %v16461_v60, -inf }
0x1ea7   :  { %9637 = vmax.xlane.f32.xlu0 %v9636_v44 }
0x1f0d   :  { %v9599_v3 = vpop.xlane.xlu1 %9598 }
0x1f0e   :  { %v9643_v57 = vsub.f32 %v16391_v25, %v9599_v3  ;;  %v9596_v6 = vpop.xlane.xlu0 %9595 }
0x1f0f   :  { %v9642_v52 = vsub.f32 %v16397_v53, %v9596_v6 }
0x1f10   :  { %v9660_v9 = vmul.f32 1.442695, %v9643_v57 }
0x1f11   :  { %v9658_v39 = vmul.f32 1.442695, %v9642_v52  ;;  %v9605_v1 = vpop.xlane.xlu1 %9604 }
0x1f12   :  { %14752 = vpow2.f32 %v9660_v9  ;;  %v9645_v63 = vsub.f32 %v16404_v10, %v9605_v1  ;;  %v9602_v36 = vpop.xlane.xlu0 %9601 }
0x1f13   :  { %14754 = vpow2.f32 %v9658_v39  ;;  %v9644_v37 = vsub.f32 %v16407_v2, %v9602_v36 }
0x1f14   :  { %v9664_v55 = vmul.f32 1.442695, %v9645_v63 }
0x1f15   :  { %v9662_v58 = vmul.f32 1.442695, %v9644_v37 }
0x1f16   :  { %14756 = vpow2.f32 %v9664_v55 }
0x1f17   :  { %14758 = vpow2.f32 %v9662_v58 }
0x1f1c   :  { %v16471_v61 = vpop.eup %14752 }
0x1f1d   :  { %v16473_v25 = vpop.eup %14754  ;;  %v9693_v53 = vsel %vm141_vm0, %v16471_v61, 0.0 }
0x1f1e   :  { %9694 = vadd.xlane.f32.xlu1 %v9693_v53  ;;  %v9690_v15 = vsel %vm141_vm0, %v16473_v25, 0.0  ;;  %v9611_v10 = vpop.xlane.xlu1 %9610 }
0x1f1f   :  { %v9608_v16 = vpop.xlane.xlu0 %9607  ;;  %9691 = vadd.xlane.f32.xlu0 %v9690_v15  ;;  %v9647_v2 = vsub.f32 %v16414_v14, %v9611_v10 }
0x1f20   :  { %v16479_v48 = vpop.eup %14756  ;;  %v9646_v4 = vsub.f32 %v16417_v7, %v9608_v16 }
0x1f21   :  { %v16483_v24 = vpop.eup %14758  ;;  %v9699_v28 = vsel %vm141_vm0, %v16479_v48, 0.0  ;;  %v9668_v19 = vmul.f32 1.442695, %v9647_v2 }
0x1f22   :  { %v9666_v23 = vmul.f32 1.442695, %v9646_v4  ;;  %9700 = vadd.xlane.f32.xlu1 %v9699_v28  ;;  %v9696_v32 = vsel %vm141_vm0, %v16483_v24, 0.0  ;;  %v9617_v29 = vpop.xlane.xlu1 %9616 }
0x1f23   :  { %v9614_v43 = vpop.xlane.xlu0 %9613  ;;  %9697 = vadd.xlane.f32.xlu0 %v9696_v32  ;;  %14760 = vpow2.f32 %v9668_v19  ;;  %v9649_v5 = vsub.f32 %v16423_v21, %v9617_v29 }
0x1f24   :  { %v9648_v14 = vsub.f32 %v16425_v11, %v9614_v43  ;;  %14762 = vpow2.f32 %v9666_v23 }
0x1f25   :  { %v9672_v7 = vmul.f32 1.442695, %v9649_v5 }
0x1f26   :  { %v9670_v31 = vmul.f32 1.442695, %v9648_v14  ;;  %v9623_v51 = vpop.xlane.xlu1 %9622 }
0x1f27   :  { %v9620_v20 = vpop.xlane.xlu0 %9619  ;;  %14764 = vpow2.f32 %v9672_v7  ;;  %v9651_v47 = vsub.f32 %v16428_v33, %v9623_v51 }
0x1f28   :  { %v9650_v56 = vsub.f32 %v16433_v17, %v9620_v20  ;;  %14766 = vpow2.f32 %v9670_v31 }
0x1f29   :  { %v9676_v38 = vmul.f32 1.442695, %v9651_v47 }
0x1f2a   :  { %v9674_v59 = vmul.f32 1.442695, %v9650_v56  ;;  %v9629_v62 = vpop.xlane.xlu1 %9628 }
0x1f2b   :  { %v9626_v34 = vpop.xlane.xlu0 %9625  ;;  %14768 = vpow2.f32 %v9676_v38  ;;  %v9653_v21 = vsub.f32 %v16437_v12, %v9629_v62 }
0x1f2c   :  { %v9652_v11 = vsub.f32 %v16439_v22, %v9626_v34  ;;  %14770 = vpow2.f32 %v9674_v59 }
0x1f2d   :  { %v16495_v41 = vpop.eup %14760  ;;  %v9680_v50 = vmul.f32 1.442695, %v9653_v21 }
0x1f2e   :  { %v9678_v44 = vmul.f32 1.442695, %v9652_v11  ;;  %v16497_v3 = vpop.eup %14762  ;;  %v9705_v17 = vsel %vm141_vm0, %v16495_v41, 0.0 }
0x1f2f   :  { %v9635_v33 = vpop.xlane.xlu1 %9634  ;;  %14772 = vpow2.f32 %v9680_v50  ;;  %9706 = vadd.xlane.f32.xlu1 %v9705_v17  ;;  %v9702_v12 = vsel %vm141_vm0, %v16497_v3, 0.0 }
0x1f30   :  { %v9655_v57 = vsub.f32 %v16450_v13, %v9635_v33  ;;  %v9632_v6 = vpop.xlane.xlu0 %9631  ;;  %14774 = vpow2.f32 %v9678_v44  ;;  %9703 = vadd.xlane.f32.xlu0 %v9702_v12 }
0x1f31   :  { %v9654_v22 = vsub.f32 %v16453_v30, %v9632_v6  ;;  %v16505_v52 = vpop.eup %14764 }
0x1f32   :  { %v9684_v9 = vmul.f32 1.442695, %v9655_v57  ;;  %v16507_v39 = vpop.eup %14766  ;;  %v9711_v36 = vsel %vm141_vm0, %v16505_v52, 0.0 }
0x1f33   :  { %v9682_v1 = vmul.f32 1.442695, %v9654_v22  ;;  %v9641_v63 = vpop.xlane.xlu1 %9640  ;;  %9712 = vadd.xlane.f32.xlu1 %v9711_v36  ;;  %v9708_v55 = vsel %vm141_vm0, %v16507_v39, 0.0 }
0x1f34   :  { %14776 = vpow2.f32 %v9684_v9  ;;  %v9657_v13 = vsub.f32 %v16459_v40, %v9641_v63  ;;  %v9638_v37 = vpop.xlane.xlu0 %9637  ;;  %9709 = vadd.xlane.f32.xlu0 %v9708_v55 }
0x1f35   :  { %14778 = vpow2.f32 %v9682_v1  ;;  %v9656_v30 = vsub.f32 %v16461_v60, %v9638_v37  ;;  %v16515_v58 = vpop.eup %14768 }
0x1f36   :  { %v9688_v53 = vmul.f32 1.442695, %v9657_v13  ;;  %v16517_v15 = vpop.eup %14770  ;;  %v9717_v16 = vsel %vm141_vm0, %v16515_v58, 0.0 }
0x1f37   :  { %v9686_v10 = vmul.f32 1.442695, %v9656_v30  ;;  %9718 = vadd.xlane.f32.xlu1 %v9717_v16  ;;  %v9714_v40 = vsel %vm141_vm0, %v16517_v15, 0.0 }
0x1f38   :  { %14780 = vpow2.f32 %v9688_v53  ;;  %9715 = vadd.xlane.f32.xlu0 %v9714_v40 }
0x1f39   :  { %14782 = vpow2.f32 %v9686_v10  ;;  %v16523_v2 = vpop.eup %14772 }
0x1f3a   :  { %v16525_v60 = vpop.eup %14774  ;;  %v9723_v4 = vsel %vm141_vm0, %v16523_v2, 0.0 }
0x1f3b   :  { %9724 = vadd.xlane.f32.xlu1 %v9723_v4  ;;  %v9720_v28 = vsel %vm141_vm0, %v16525_v60, 0.0 }
0x1f3c   :  { %9721 = vadd.xlane.f32.xlu0 %v9720_v28  ;;  %v11675_v28 = vld [vmem:[%s16728_s3 + $0x20] sm:$0xff] }
0x1f3e   :  { %v16531_v19 = vpop.eup %14776 }
0x1f3f   :  { %v16533_v23 = vpop.eup %14778  ;;  %v9729_v32 = vsel %vm141_vm0, %v16531_v19, 0.0 }
0x1f40   :  { %9730 = vadd.xlane.f32.xlu1 %v9729_v32  ;;  %v9726_v29 = vsel %vm141_vm0, %v16533_v23, 0.0 }
0x1f41   :  { %9727 = vadd.xlane.f32.xlu0 %v9726_v29  ;;  %v11677_v29 = vld [vmem:[%s16728_s3 + $0x30] sm:$0xff] }
0x1f42   :  { %v16539_v43 = vpop.eup %14780 }
0x1f43   :  { %v16541_v5 = vpop.eup %14782  ;;  %v9735_v14 = vsel %vm141_vm0, %v16539_v43, 0.0 }
0x1f44   :  { %9736 = vadd.xlane.f32.xlu1 %v9735_v14  ;;  %v9732_v7 = vsel %vm141_vm0, %v16541_v5, 0.0 }
0x1f45   :  { %9733 = vadd.xlane.f32.xlu0 %v9732_v7 }
0x1fab   :  { %v9695_v31 = vpop.xlane.xlu1 %9694 }
0x1fac   :  { %14784 = vrcp.f32 %v9695_v31  ;;  %v9692_v51 = vpop.xlane.xlu0 %9691  ;;  %v11678_v31 = vld [vmem:[%s16728_s3 + $0x38] sm:$0xff] }
0x1fad   :  { %14786 = vrcp.f32 %v9692_v51 }
0x1faf   :  { %v9701_v20 = vpop.xlane.xlu1 %9700 }
0x1fb0   :  { %14788 = vrcp.f32 %v9701_v20  ;;  %v9698_v47 = vpop.xlane.xlu0 %9697 }
0x1fb1   :  { %14790 = vrcp.f32 %v9698_v47 }
0x1fb6   :  { %v14785_v56 = vpop.eup %14784 }
0x1fb7   :  { %v14787_v38 = vpop.eup %14786  ;;  %v9755_v62 = vmul.f32 %v14785_v56, %v16471_v61 }
0x1fb8   :  { %v9754_v59 = vmul.f32 %v14787_v38, %v16473_v25 }
0x1fba   :  { %v14789_v34 = vpop.eup %14788  ;;  %13551 = vmatprep.mubr.msk.f32.mxu1 %vm141_vm0, %v9754_v59 }
0x1fbb   :  { %v14791_v21 = vpop.eup %14790  ;;  %13552 = vmatmul.mubr.msk.f32.vlgmr.msra.gmra.mrb[118].mxu1 %vm141_vm0, %v9755_v62  ;;  %v9757_v44 = vmul.f32 %v14789_v34, %v16479_v48 }
0x1fbc   :  { %14433 = vmatpush3.bf16.msra.mxu1 %v16346_v45  ;;  %v9756_v11 = vmul.f32 %v14791_v21, %v16483_v24  ;;  %v9707_v50 = vpop.xlane.xlu1 %9706 }
0x1fbd   :  { %14435 = vmatprep.subr.bf16.mxu1 %v16354_v27  ;;  %14792 = vrcp.f32 %v9707_v50  ;;  %v9704_v33 = vpop.xlane.xlu0 %9703 }
0x1fbe   :  { %13554 = vmatprep.mubr.msk.f32.mxu1 %vm141_vm0, %v9756_v11  ;;  %14794 = vrcp.f32 %v9704_v33 }
0x1fbf   :  { %13555 = vmatmul.mubr.msk.f32.gmra.mrb[120].mxu1 %vm141_vm0, %v9757_v44  ;;  %v11696_v44 = vld [vmem:[%s16729_s8 + $0x1] ss:$0 sm:$0xff] }
0x1fc0   :  { %14437 = vmatpush3.bf16.msra.mxu1 %v16354_v27  ;;  %v9713_v61 = vpop.xlane.xlu1 %9712 }
0x1fc1   :  { %14796 = vrcp.f32 %v9713_v61  ;;  %v9710_v25 = vpop.xlane.xlu0 %9709  ;;  %13599 = vmatprep.subr.mxu1 %v11675_v28 }
0x1fc2   :  { %14798 = vrcp.f32 %v9710_v25 }
0x1fc4   :  { %v9719_v45 = vpop.xlane.xlu1 %9718 }
0x1fc5   :  { %14800 = vrcp.f32 %v9719_v45  ;;  %v9716_v24 = vpop.xlane.xlu0 %9715 }
0x1fc6   :  { %14802 = vrcp.f32 %v9716_v24 }
0x1fc7   :  { %v14793_v17 = vpop.eup %14792 }
0x1fc8   :  { %v14795_v57 = vpop.eup %14794  ;;  %v9725_v48 = vpop.xlane.xlu1 %9724  ;;  %v9759_v22 = vmul.f32 %v14793_v17, %v16495_v41 }
0x1fc9   :  { %14804 = vrcp.f32 %v9725_v48  ;;  %v9722_v6 = vpop.xlane.xlu0 %9721  ;;  %v9758_v12 = vmul.f32 %v14795_v57, %v16497_v3 }
0x1fca   :  { %14806 = vrcp.f32 %v9722_v6 }
0x1fcb   :  { %v14797_v9 = vpop.eup %14796  ;;  %13565 = vmatprep.mubr.msk.f32.mxu0 %vm141_vm0, %v9758_v12 }
0x1fcc   :  { %v14799_v27 = vpop.eup %14798  ;;  %13566 = vmatmul.mubr.msk.f32.vlgmr.msra.gmra.mrb[132].mxu0 %vm141_vm0, %v9759_v22  ;;  %v9761_v3 = vmul.f32 %v14797_v9, %v16505_v52 }
0x1fcd   :  { %v9731_v1 = vpop.xlane.xlu1 %9730  ;;  %14441 = vmatpush3.bf16.msra.mxu0 %v16374_v35  ;;  %v9760_v36 = vmul.f32 %v14799_v27, %v16507_v39 }
0x1fce   :  { %14808 = vrcp.f32 %v9731_v1  ;;  %v9728_v63 = vpop.xlane.xlu0 %9727  ;;  %14443 = vmatprep.subr.bf16.mxu0 %v16378_v26 }
0x1fcf   :  { %14810 = vrcp.f32 %v9728_v63  ;;  %v14801_v41 = vpop.eup %14800  ;;  %13568 = vmatprep.mubr.msk.f32.mxu0 %vm141_vm0, %v9760_v36 }
0x1fd0   :  { %v14803_v13 = vpop.eup %14802  ;;  %13569 = vmatmul.mubr.msk.f32.gmra.mrb[134].mxu0 %vm141_vm0, %v9761_v3  ;;  %v9763_v39 = vmul.f32 %v14801_v41, %v16515_v58 }
0x1fd1   :  { %v9737_v37 = vpop.xlane.xlu1 %9736  ;;  %14445 = vmatpush3.bf16.msra.mxu0 %v16378_v26  ;;  %v9762_v35 = vmul.f32 %v14803_v13, %v16517_v15 }
0x1fd2   :  { %14812 = vrcp.f32 %v9737_v37  ;;  %v9734_v55 = vpop.xlane.xlu0 %9733 }
0x1fd3   :  { %14814 = vrcp.f32 %v9734_v55  ;;  %v14805_v30 = vpop.eup %14804  ;;  %13579 = vmatprep.mubr.msk.f32.mxu1 %vm141_vm0, %v9762_v35 }
0x1fd4   :  { %v14807_v52 = vpop.eup %14806  ;;  %13580 = vmatmul.mubr.msk.f32.vlgmr.msra.gmra.mrb[122].mxu1 %vm141_vm0, %v9763_v39  ;;  %v9765_v10 = vmul.f32 %v14805_v30, %v16523_v2 }
0x1fd5   :  { %v9764_v53 = vmul.f32 %v14807_v52, %v16525_v60  ;;  %13600 = vmatpush3.msra.mxu1 %v11675_v28  ;;  %v11704_v28 = vld [vmem:[%s16730_s14 + $0x38] sm:$0xff] }
0x1fd7   :  { %13582 = vmatprep.mubr.msk.f32.mxu1 %vm141_vm0, %v9764_v53 }
0x1fd8   :  { %v14809_v16 = vpop.eup %14808  ;;  %13583 = vmatmul.mubr.msk.f32.gmra.mrb[124].mxu1 %vm141_vm0, %v9765_v10 }
0x1fd9   :  { %v14811_v26 = vpop.eup %14810  ;;  %v9767_v15 = vmul.f32 %v14809_v16, %v16531_v19 }
0x1fda   :  { %v9766_v58 = vmul.f32 %v14811_v26, %v16533_v23  ;;  %v11676_v23 = vld [vmem:[%s16728_s3 + $0x28] sm:$0xff] }
0x1fdb   :  { %13607 = vmatprep.subr.mxu1 %v11676_v23 }
0x1fdc   :  { %v14813_v40 = vpop.eup %14812  ;;  %13593 = vmatprep.mubr.msk.f32.mxu0 %vm141_vm0, %v9766_v58 }
0x1fdd   :  { %v14815_v4 = vpop.eup %14814  ;;  %13594 = vmatmul.mubr.msk.f32.vlgmr.msra.gmra.mrb[136].mxu0 %vm141_vm0, %v9767_v15  ;;  %v9769_v60 = vmul.f32 %v14813_v40, %v16539_v43  ;;  %v11701_v40 = vld [vmem:[%s16730_s14 + $0x20] sm:$0xff] }
0x1fde   :  { %v9768_v2 = vmul.f32 %v14815_v4, %v16541_v5  ;;  %v11702_v4 = vld [vmem:[%s16730_s14 + $0x28] sm:$0xff] }
0x1fe0   :  { %13596 = vmatprep.mubr.msk.f32.mxu0 %vm141_vm0, %v9768_v2  ;;  %v14446_v2 = vpack.c.bf16 %v11702_v4, %v11701_v40  ;;  %v11725_v40 = vld [vmem:[%s16733_s30 + $0xf0] sm:$0xff]  ;;  %v11726_v4 = vld [vmem:[%s16733_s30 + $0xf8] sm:$0xff] }
0x1fe1   :  { %13597 = vmatmul.mubr.msk.f32.gmra.mrb[138].mxu0 %vm141_vm0, %v9769_v60  ;;  %v11703_v60 = vld [vmem:[%s16730_s14 + $0x30] sm:$0xff] }
0x1fe2   :  { %14447 = vmatprep.subr.bf16.mxu0 %v14446_v2 }
0x1fe3   :  { %14449 = vmatpush3.bf16.msra.mxu0 %v14446_v2  ;;  %v14482_v2 = vpack.c.bf16 %v11726_v4, %v11725_v40 }
0x208e   :  { %v13553_v19 = vpop.f32.mrb[118].mxu1 }
0x208f   :  { %v9848_v32 = vpop.f32.mrb[119].mxu1 }
0x2090   :  { %13601 = vmatprep.mubr.msk.f32.mxu1 %vm1139_vm1, %v9848_v32 }
0x2091   :  { %13602 = vmatmul.mubr.msk.f32.vlgmr.msra.gmra.mrb[126].mxu1 %vm1139_vm1, %v13553_v19 }
0x2092   :  { %v13556_v5 = vpop.f32.mrb[120].mxu1  ;;  %13608 = vmatpush3.msra.mxu1 %v11676_v23  ;;  %v14450_v23 = vpack.c.bf16 %v11704_v28, %v11703_v60  ;;  %v11706_v60 = vld [vmem:[%s16734_s6 + $0x1] ss:$0 sm:$0xff] }
0x2093   :  { %v9858_v43 = vpop.f32.mrb[121].mxu1  ;;  %13615 = vmatprep.subr.mxu1 %v11677_v29 }
0x2094   :  { %13604 = vmatprep.mubr.msk.f32.mxu1 %vm1139_vm1, %v9858_v43  ;;  %14451 = vmatprep.subr.bf16.mxu0 %v14450_v23 }
0x2095   :  { %13605 = vmatmul.mubr.msk.f32.gmra.mrb[128].mxu1 %vm1139_vm1, %v13556_v5  ;;  %14453 = vmatpush3.bf16.msra.mxu0 %v14450_v23 }
0x209f   :  { %v13567_v14 = vpop.f32.mrb[132].mxu0 }
0x20a0   :  { %v9945_v7 = vpop.f32.mrb[133].mxu0 }
0x20a1   :  { %13609 = vmatprep.mubr.msk.f32.mxu1 %vm1139_vm1, %v9945_v7 }
0x20a2   :  { %13610 = vmatmul.mubr.msk.f32.vlgmr.msra.gmra.mrb[126].mxu1 %vm1139_vm1, %v13567_v14 }
0x20a3   :  { %v13570_v51 = vpop.f32.mrb[134].mxu0  ;;  %13616 = vmatpush3.msra.mxu1 %v11677_v29 }
0x20a4   :  { %v9955_v20 = vpop.f32.mrb[135].mxu0  ;;  %13623 = vmatprep.subr.mxu1 %v11678_v31 }
0x20a5   :  { %13612 = vmatprep.mubr.msk.f32.mxu1 %vm1139_vm1, %v9955_v20 }
0x20a6   :  { %13613 = vmatmul.mubr.msk.f32.gmra.mrb[128].mxu1 %vm1139_vm1, %v13570_v51 }
0x20a7   :  { %v13581_v47 = vpop.f32.mrb[122].mxu1 }
0x20a8   :  { %v10042_v56 = vpop.f32.mrb[123].mxu1 }
0x20a9   :  { %13617 = vmatprep.mubr.msk.f32.mxu1 %vm1139_vm1, %v10042_v56 }
0x20aa   :  { %13618 = vmatmul.mubr.msk.f32.vlgmr.msra.gmra.mrb[126].mxu1 %vm1139_vm1, %v13581_v47 }
0x20ab   :  { %v13584_v38 = vpop.f32.mrb[124].mxu1  ;;  %13624 = vmatpush3.msra.mxu1 %v11678_v31 }
0x20ac   :  { %v10052_v59 = vpop.f32.mrb[125].mxu1  ;;  %14486 = vmatprep.subr.bf16.mxu1 %v14906_v46 }
0x20ad   :  { %13620 = vmatprep.mubr.msk.f32.mxu1 %vm1139_vm1, %v10052_v59  ;;  %v11699_v59 = vld [vmem:[%s16731_s19 + $0x1] ss:$0 sm:$0xff] }
0x20ae   :  { %13621 = vmatmul.mubr.msk.f32.gmra.mrb[128].mxu1 %vm1139_vm1, %v13584_v38 }
0x20b0   :  { %v13595_v62 = vpop.f32.mrb[136].mxu0 }
0x20b1   :  { %v10139_v34 = vpop.f32.mrb[137].mxu0 }
0x20b2   :  { %13625 = vmatprep.mubr.msk.f32.mxu1 %vm1139_vm1, %v10139_v34 }
0x20b3   :  { %13626 = vmatmul.mubr.msk.f32.vlgmr.msra.gmra.mrb[126].mxu1 %vm1139_vm1, %v13595_v62 }
0x20b4   :  { %v13598_v21 = vpop.f32.mrb[138].mxu0 }
0x20b5   :  { %v10149_v11 = vpop.f32.mrb[139].mxu0 }
0x20b6   :  { %13628 = vmatprep.mubr.msk.f32.mxu1 %vm1139_vm1, %v10149_v11  ;;  %v11700_v11 = vld [vmem:[%s16732_s24 + $0x1] ss:$0 sm:$0xff] }
0x20b7   :  { %13629 = vmatmul.mubr.msk.f32.gmra.mrb[128].mxu1 %vm1139_vm1, %v13598_v21 }
0x20b8   :  { %13691 = vmatprep.mubr.msk.f32.mxu1 %vm14907_vm4, %v14908_v8 }
0x2186   :  { %v13627_v50 = vpop.f32.mrb[126].mxu1 }
0x2187   :  { %v10564_v33 = vadd.f32 %v13627_v50, %v16102_v49  ;;  %v10532_v61 = vpop.f32.mrb[127].mxu1 }
0x2188   :  { %v10563_v25 = vadd.f32 %v10532_v61, %v16104_v0 }
0x2189   :  { %v16611_v45 = vadd.f32 %v11696_v44, %v10564_v33 }
0x218a   :  { %v16613_v24 = vadd.f32 %v11696_v44, %v10563_v25  ;;  %v13630_v17 = vpop.f32.mrb[128].mxu1 }
0x218b   :  { %v10566_v57 = vadd.f32 %v13630_v17, %v16112_v18  ;;  %v10542_v48 = vpop.f32.mrb[129].mxu1  ;;  %v10586_v6 = vsel %vm141_vm0, %v16611_v45, 0.0 }
0x218c   :  { %v10565_v12 = vadd.f32 %v10542_v48, %v16114_v54  ;;  %10587 = vadd.xlane.f32.xlu1 %v10586_v6  ;;  %v10583_v49 = vsel %vm141_vm0, %v16613_v24, 0.0 }
0x218d   :  { %v16621_v22 = vadd.f32 %v11696_v44, %v10566_v57  ;;  %10584 = vadd.xlane.f32.xlu0 %v10583_v49 }
0x218e   :  { %v16623_v0 = vadd.f32 %v11696_v44, %v10565_v12 }
0x218f   :  { %v10592_v9 = vsel %vm141_vm0, %v16621_v22, 0.0 }
0x2190   :  { %10593 = vadd.xlane.f32.xlu1 %v10592_v9  ;;  %v10589_v18 = vsel %vm141_vm0, %v16623_v0, 0.0 }
0x2191   :  { %10590 = vadd.xlane.f32.xlu0 %v10589_v18  ;;  %v11711_v18 = vld [vmem:[%s16733_s30 + $0x80] sm:$0xff] }
0x2219   :  { %v10588_v27 = vpop.xlane.xlu1 %10587 }
0x221a   :  { %v10596_v1 = vmul.f32 0.03125, %v10588_v27  ;;  %v10585_v54 = vpop.xlane.xlu0 %10584  ;;  %v11712_v27 = vld [vmem:[%s16733_s30 + $0x88] sm:$0xff] }
0x221b   :  { %v10595_v63 = vmul.f32 0.03125, %v10585_v54  ;;  %v11713_v54 = vld [vmem:[%s16733_s30 + $0x90] sm:$0xff] }
0x221c   :  { %v10600_v36 = vsub.f32 %v16611_v45, %v10596_v1  ;;  %v14454_v1 = vpack.c.bf16 %v11712_v27, %v11711_v18 }
0x221d   :  { %v10599_v3 = vsub.f32 %v16613_v24, %v10595_v63  ;;  %v10594_v41 = vpop.xlane.xlu1 %10593  ;;  %v11714_v63 = vld [vmem:[%s16733_s30 + $0x98] sm:$0xff] }
0x221e   :  { %v10598_v13 = vmul.f32 0.03125, %v10594_v41  ;;  %v10591_v37 = vpop.xlane.xlu0 %10590  ;;  %v10604_v55 = vmul.f32 %v10600_v36, %v10600_v36  ;;  %14455 = vmatprep.subr.bf16.mxu0 %v14454_v1  ;;  %v11716_v41 = vld [vmem:[%s16733_s30 + $0xa8] sm:$0xff] }
0x221f   :  { %v10597_v35 = vmul.f32 0.03125, %v10591_v37  ;;  %v10603_v39 = vmul.f32 %v10599_v3, %v10599_v3  ;;  %v11717_v37 = vld [vmem:[%s16733_s30 + $0xb0] sm:$0xff] }
0x2220   :  { %v10602_v30 = vsub.f32 %v16621_v22, %v10598_v13  ;;  %v10610_v52 = vsel %vm141_vm0, %v10604_v55, 0.0  ;;  %v11718_v55 = vld [vmem:[%s16733_s30 + $0xb8] sm:$0xff] }
0x2221   :  { %v10601_v53 = vsub.f32 %v16623_v0, %v10597_v35  ;;  %10611 = vadd.xlane.f32.xlu1 %v10610_v52  ;;  %v10607_v10 = vsel %vm141_vm0, %v10603_v39, 0.0  ;;  %v14466_v35 = vpack.c.bf16 %v11718_v55, %v11717_v37  ;;  %v11719_v39 = vld [vmem:[%s16733_s30 + $0xc0] sm:$0xff] }
0x2222   :  { %10608 = vadd.xlane.f32.xlu0 %v10607_v10  ;;  %v10606_v16 = vmul.f32 %v10602_v30, %v10602_v30  ;;  %v11722_v10 = vld [vmem:[%s16733_s30 + $0xd8] sm:$0xff] }
0x2223   :  { %v10605_v26 = vmul.f32 %v10601_v53, %v10601_v53 }
0x2224   :  { %v10616_v58 = vsel %vm141_vm0, %v10606_v16, 0.0 }
0x2225   :  { %10617 = vadd.xlane.f32.xlu1 %v10616_v58  ;;  %v10613_v15 = vsel %vm141_vm0, %v10605_v26, 0.0  ;;  %v11723_v26 = vld [vmem:[%s16733_s30 + $0xe0] sm:$0xff]  ;;  %v11724_v58 = vld [vmem:[%s16733_s30 + $0xe8] sm:$0xff] }
0x2226   :  { %10614 = vadd.xlane.f32.xlu0 %v10613_v15  ;;  %v14478_v15 = vpack.c.bf16 %v11724_v58, %v11723_v26 }
0x22ae   :  { %v10612_v19 = vpop.xlane.xlu1 %10611 }
0x22af   :  { %v10620_v32 = vmul.f32 0.03125, %v10612_v19  ;;  %v10609_v29 = vpop.xlane.xlu0 %10608 }
0x22b0   :  { %v10619_v5 = vmul.f32 0.03125, %v10609_v29 }
0x22b1   :  { %v10624_v43 = vadd.f32 1e-05, %v10620_v32 }
0x22b2   :  { %v10623_v14 = vadd.f32 1e-05, %v10619_v5  ;;  %v10618_v7 = vpop.xlane.xlu1 %10617 }
0x22b3   :  { %14816 = vrsqrt.f32 %v10624_v43  ;;  %v10622_v31 = vmul.f32 0.03125, %v10618_v7  ;;  %v10615_v51 = vpop.xlane.xlu0 %10614 }
0x22b4   :  { %14818 = vrsqrt.f32 %v10623_v14  ;;  %v10621_v20 = vmul.f32 0.03125, %v10615_v51 }
0x22b5   :  { %v10626_v47 = vadd.f32 1e-05, %v10622_v31 }
0x22b6   :  { %v10625_v56 = vadd.f32 1e-05, %v10621_v20 }
0x22b7   :  { %14820 = vrsqrt.f32 %v10626_v47 }
0x22b8   :  { %14822 = vrsqrt.f32 %v10625_v56 }
0x22bd   :  { %v14817_v38 = vpop.eup %14816 }
0x22be   :  { %v14819_v62 = vpop.eup %14818  ;;  %v10632_v34 = vmul.f32 %v14817_v38, %v10600_v36  ;;  %v14458_v36 = vpack.c.bf16 %v11714_v63, %v11713_v54 }
0x22bf   :  { %v10631_v21 = vmul.f32 %v14819_v62, %v10599_v3  ;;  %v11715_v3 = vld [vmem:[%s16733_s30 + $0xa0] sm:$0xff] }
0x22c0   :  { %v10642_v50 = vmul.f32 %v11699_v59, %v10632_v34  ;;  %v14462_v13 = vpack.c.bf16 %v11716_v41, %v11715_v3 }
0x22c1   :  { %v14821_v44 = vpop.eup %14820  ;;  %v10641_v33 = vmul.f32 %v11699_v59, %v10631_v21 }
0x22c2   :  { %v14823_v61 = vpop.eup %14822  ;;  %v10634_v25 = vmul.f32 %v14821_v44, %v10602_v30  ;;  %v10652_v48 = vadd.f32 %v11700_v11, %v10642_v50  ;;  %v11720_v30 = vld [vmem:[%s16733_s30 + $0xc8] sm:$0xff] }
0x22c3   :  { %v10651_v17 = vadd.f32 %v11700_v11, %v10641_v33  ;;  %v10633_v57 = vmul.f32 %v14823_v61, %v10601_v53  ;;  %v14470_v52 = vpack.c.bf16 %v11720_v30, %v11719_v39  ;;  %v11721_v53 = vld [vmem:[%s16733_s30 + $0xd0] sm:$0xff]  ;;  %v11728_v30 = vld [vmem:[%s15063_s4 + $0x1] ss:$0 sm:$0xff] }
0x22c4   :  { %v10644_v6 = vmul.f32 %v11699_v59, %v10634_v25  ;;  %v14474_v16 = vpack.c.bf16 %v11722_v10, %v11721_v53 }
0x22c5   :  { %13639 = vmatprep.mubr.msk.f32.mxu0 %vm141_vm0, %v10651_v17  ;;  %v10643_v12 = vmul.f32 %v11699_v59, %v10633_v57 }
0x22c6   :  { %13640 = vmatmul.mubr.msk.f32.vlgmr.msra.gmra.mrb[140].mxu0 %vm141_vm0, %v10652_v48  ;;  %v10654_v9 = vadd.f32 %v11700_v11, %v10644_v6 }
0x22c7   :  { %v10653_v49 = vadd.f32 %v11700_v11, %v10643_v12  ;;  %14457 = vmatpush3.bf16.msra.mxu0 %v14454_v1 }
0x22c8   :  { %14459 = vmatprep.subr.bf16.mxu0 %v14458_v36 }
0x22c9   :  { %13642 = vmatprep.mubr.msk.f32.mxu0 %vm141_vm0, %v10653_v49 }
0x22ca   :  { %13643 = vmatmul.mubr.msk.f32.gmra.mrb[142].mxu0 %vm141_vm0, %v10654_v9 }
0x22cb   :  { %14461 = vmatpush3.bf16.msra.mxu0 %v14458_v36 }
0x22cc   :  { %14463 = vmatprep.subr.bf16.mxu0 %v14462_v13 }
0x22cf   :  { %14465 = vmatpush3.bf16.msra.mxu0 %v14462_v13 }
0x22d0   :  { %14467 = vmatprep.subr.bf16.mxu0 %v14466_v35 }
0x22d3   :  { %14469 = vmatpush3.bf16.msra.mxu0 %v14466_v35 }
0x22d4   :  { %14471 = vmatprep.subr.bf16.mxu0 %v14470_v52 }
0x22d7   :  { %14473 = vmatpush3.bf16.msra.mxu0 %v14470_v52 }
0x22d8   :  { %14475 = vmatprep.subr.bf16.mxu0 %v14474_v16 }
0x22db   :  { %14477 = vmatpush3.bf16.msra.mxu0 %v14474_v16 }
0x22dc   :  { %14479 = vmatprep.subr.bf16.mxu0 %v14478_v15 }
0x22df   :  { %14481 = vmatpush3.bf16.msra.mxu0 %v14478_v15 }
0x22e0   :  { %14483 = vmatprep.subr.bf16.mxu0 %v14482_v2 }
0x22e3   :  { %14485 = vmatpush3.bf16.msra.mxu0 %v14482_v2 }
0x2399   :  { %v13641_v28 = vpop.f32.mrb[140].mxu0 }
0x239a   :  { %v10752_v23 = vadd.f32 %v13641_v28, %v11706_v60  ;;  %v10746_v19 = vpop.f32.mrb[141].mxu0 }
0x239b   :  { %v10747_v32 = vadd.f32 %v11706_v60, %v10746_v19 }
0x239c   :  { %v10766_v29 = vmul.f32 %v10752_v23, %v10752_v23 }
0x239d   :  { %v10765_v5 = vmul.f32 %v10747_v32, %v10747_v32  ;;  %v13644_v43 = vpop.f32.mrb[142].mxu0 }
0x239e   :  { %v10770_v14 = vmul.f32 %v10766_v29, %v10752_v23  ;;  %v10762_v7 = vadd.f32 %v13644_v43, %v11706_v60  ;;  %v10756_v31 = vpop.f32.mrb[143].mxu0 }
0x239f   :  { %v10769_v51 = vmul.f32 %v10765_v5, %v10747_v32  ;;  %v10757_v20 = vadd.f32 %v11706_v60, %v10756_v31 }
0x23a0   :  { %v10774_v47 = vmul.f32 0.044715, %v10770_v14  ;;  %v10768_v56 = vmul.f32 %v10762_v7, %v10762_v7 }
0x23a1   :  { %v10773_v38 = vmul.f32 0.044715, %v10769_v51  ;;  %v10767_v59 = vmul.f32 %v10757_v20, %v10757_v20 }
0x23a2   :  { %v10778_v62 = vadd.f32 %v10774_v47, %v10752_v23  ;;  %v10772_v34 = vmul.f32 %v10768_v56, %v10762_v7 }
0x23a3   :  { %v10777_v21 = vadd.f32 %v10773_v38, %v10747_v32  ;;  %v10771_v11 = vmul.f32 %v10767_v59, %v10757_v20 }
0x23a4   :  { %v10782_v50 = vmul.f32 0.7978846, %v10778_v62  ;;  %v10776_v44 = vmul.f32 0.044715, %v10772_v34 }
0x23a5   :  { %v10781_v33 = vmul.f32 0.7978846, %v10777_v21  ;;  %v10775_v61 = vmul.f32 0.044715, %v10771_v11 }
0x23a6   :  { %14824 = vtanh.f32 %v10782_v50  ;;  %v10780_v25 = vadd.f32 %v10776_v44, %v10762_v7 }
0x23a7   :  { %v10779_v17 = vadd.f32 %v10775_v61, %v10757_v20  ;;  %14826 = vtanh.f32 %v10781_v33 }
0x23a8   :  { %v10784_v57 = vmul.f32 0.7978846, %v10780_v25 }
0x23a9   :  { %v10783_v48 = vmul.f32 0.7978846, %v10779_v17 }
0x23aa   :  { %14828 = vtanh.f32 %v10784_v57 }
0x23ab   :  { %14830 = vtanh.f32 %v10783_v48 }
0x23b0   :  { %v14825_v6 = vpop.eup %14824 }
0x23b1   :  { %v14827_v12 = vpop.eup %14826  ;;  %v10790_v49 = vadd.f32 1.0, %v14825_v6 }
0x23b2   :  { %v10789_v9 = vadd.f32 1.0, %v14827_v12 }
0x23b3   :  { %v10794_v18 = vmul.f32 0.5, %v10790_v49 }
0x23b4   :  { %v14829_v27 = vpop.eup %14828  ;;  %v10793_v1 = vmul.f32 0.5, %v10789_v9 }
0x23b5   :  { %v14831_v54 = vpop.eup %14830  ;;  %v10792_v63 = vadd.f32 1.0, %v14829_v27  ;;  %v10798_v41 = vmul.f32 %v10794_v18, %v10752_v23  ;;  %v11729_v27 = vld [vmem:[%s15068_s13] ss:$0 sm:$0xff]  ;;  %s14909_s13 = smov [#allocation2]  }
0x23b6   :  { %v10797_v36 = vmul.f32 %v10793_v1, %v10747_v32  ;;  %v10791_v3 = vadd.f32 1.0, %v14831_v54 }
0x23b7   :  { %v10796_v13 = vmul.f32 0.5, %v10792_v63 }
0x23b8   :  { %13677 = vmatprep.mubr.f32.mxu0 %v10797_v36  ;;  %v10795_v37 = vmul.f32 0.5, %v10791_v3  ;;  %v11730_v36 = vld [vmem:[%s15073_s20] ss:$0 sm:$0xff]  ;;  %s11152_s20 = sshll.u32 %s14909_s13, 4  ;;  %s11153_s20 = int_to_ptr.vmem [resolvable:$true] %s11152_s20 }
0x23b9   :  { %13678 = vmatmul.mubr.f32.vlgmr.msra.gmra.mrb[144].mxu0 %v10798_v41  ;;  %v10800_v35 = vmul.f32 %v10796_v13, %v10762_v7  ;;  %s14850_s4 = scalar_lea.vmem %s11153_s20, 32  ;;  %p14855_p1 = scmp.lt.s32.totalorder %s11153_s20, %s11153_s20 }
0x23ba   :  { %v10799_v55 = vmul.f32 %v10795_v37, %v10757_v20  ;;  %p14851_p0 = scmp.ne.s32.totalorder %s11153_s20, %s14850_s4  ;;  %p14856_p2 = scmp.lt.s32.totalorder %s14850_s4, %s14850_s4 }
0x23bc   :  { %13680 = vmatprep.mubr.f32.mxu0 %v10799_v55  ;;  %p14857_p3 = por %p14856_p2, %p14855_p1 }
0x23bd   :  { %13681 = vmatmul.mubr.f32.gmra.mrb[146].mxu0 %v10800_v35 }
0x23be   :  { %p14858_p4 = pnand %p14857_p3, %p14851_p0 }
0x248c   :  { %v13679_v39 = vpop.f32.mrb[144].mxu0 }
0x248d   :  { %v10904_v52 = vadd.f32 %v13679_v39, %v16611_v45  ;;  %v10884_v53 = vpop.f32.mrb[145].mxu0 }
0x248e   :  { %v10903_v10 = vadd.f32 %v10884_v53, %v16613_v24 }
0x248f   :  { %v10916_v16 = vadd.f32 %v11728_v30, %v10904_v52 }
0x2490   :  { %v10915_v26 = vadd.f32 %v11728_v30, %v10903_v10  ;;  %v13682_v58 = vpop.f32.mrb[146].mxu0 }
0x2491   :  { %v10906_v15 = vadd.f32 %v13682_v58, %v16621_v22  ;;  %v10894_v40 = vpop.f32.mrb[147].mxu0  ;;  %v10924_v4 = vsel %vm141_vm0, %v10916_v16, 0.0 }
0x2492   :  { %v10905_v2 = vadd.f32 %v10894_v40, %v16623_v0  ;;  %10925 = vadd.xlane.f32.xlu1 %v10924_v4  ;;  %v10921_v60 = vsel %vm141_vm0, %v10915_v26, 0.0 }
0x2493   :  { %v10918_v28 = vadd.f32 %v11728_v30, %v10906_v15  ;;  %10922 = vadd.xlane.f32.xlu0 %v10921_v60  ;;  %v10993_v15 = vld [vmem:[%s16735_s27] sm:$0x3] }
0x2494   :  { %v10917_v23 = vadd.f32 %v11728_v30, %v10905_v2 }
0x2495   :  { %v10930_v45 = vsel %vm141_vm0, %v10918_v28, 0.0 }
0x2496   :  { %10931 = vadd.xlane.f32.xlu1 %v10930_v45  ;;  %v10927_v24 = vsel %vm141_vm0, %v10917_v23, 0.0 }
0x2497   :  { %10928 = vadd.xlane.f32.xlu0 %v10927_v24 }
0x251f   :  { %v10926_v19 = vpop.xlane.xlu1 %10925 }
0x2520   :  { %v10934_v32 = vmul.f32 0.03125, %v10926_v19  ;;  %v10923_v22 = vpop.xlane.xlu0 %10922 }
0x2521   :  { %v10933_v29 = vmul.f32 0.03125, %v10923_v22 }
0x2522   :  { %v10938_v5 = vsub.f32 %v10916_v16, %v10934_v32 }
0x2523   :  { %v10937_v43 = vsub.f32 %v10915_v26, %v10933_v29  ;;  %v10932_v14 = vpop.xlane.xlu1 %10931 }
0x2524   :  { %v10936_v0 = vmul.f32 0.03125, %v10932_v14  ;;  %v10929_v7 = vpop.xlane.xlu0 %10928  ;;  %v10942_v31 = vmul.f32 %v10938_v5, %v10938_v5 }
0x2525   :  { %v10935_v51 = vmul.f32 0.03125, %v10929_v7  ;;  %v10941_v20 = vmul.f32 %v10937_v43, %v10937_v43 }
0x2526   :  { %v10940_v47 = vsub.f32 %v10918_v28, %v10936_v0  ;;  %v10948_v56 = vsel %vm141_vm0, %v10942_v31, 0.0 }
0x2527   :  { %v10939_v38 = vsub.f32 %v10917_v23, %v10935_v51  ;;  %10949 = vadd.xlane.f32.xlu1 %v10948_v56  ;;  %v10945_v59 = vsel %vm141_vm0, %v10941_v20, 0.0 }
0x2528   :  { %10946 = vadd.xlane.f32.xlu0 %v10945_v59  ;;  %v10944_v62 = vmul.f32 %v10940_v47, %v10940_v47 }
0x2529   :  { %v10943_v34 = vmul.f32 %v10939_v38, %v10939_v38 }
0x252a   :  { %v10954_v21 = vsel %vm141_vm0, %v10944_v62, 0.0 }
0x252b   :  { %10955 = vadd.xlane.f32.xlu1 %v10954_v21  ;;  %v10951_v11 = vsel %vm141_vm0, %v10943_v34, 0.0 }
0x252c   :  { %10952 = vadd.xlane.f32.xlu0 %v10951_v11 }
0x25b4   :  { %v10950_v50 = vpop.xlane.xlu1 %10949 }
0x25b5   :  { %v10958_v44 = vmul.f32 0.03125, %v10950_v50  ;;  %v10947_v33 = vpop.xlane.xlu0 %10946 }
0x25b6   :  { %v10957_v61 = vmul.f32 0.03125, %v10947_v33 }
0x25b7   :  { %v10962_v25 = vadd.f32 1e-05, %v10958_v44 }
0x25b8   :  { %v10961_v17 = vadd.f32 1e-05, %v10957_v61  ;;  %v10956_v57 = vpop.xlane.xlu1 %10955 }
0x25b9   :  { %14832 = vrsqrt.f32 %v10962_v25  ;;  %v10960_v48 = vmul.f32 0.03125, %v10956_v57  ;;  %v10953_v6 = vpop.xlane.xlu0 %10952 }
0x25ba   :  { %14834 = vrsqrt.f32 %v10961_v17  ;;  %v10959_v12 = vmul.f32 0.03125, %v10953_v6 }
0x25bb   :  { %v10964_v49 = vadd.f32 1e-05, %v10960_v48 }
0x25bc   :  { %v10963_v9 = vadd.f32 1e-05, %v10959_v12 }
0x25bd   :  { %14836 = vrsqrt.f32 %v10964_v49 }
0x25be   :  { %14838 = vrsqrt.f32 %v10963_v9 }
0x25c3   :  { %v14833_v18 = vpop.eup %14832 }
0x25c4   :  { %v14835_v1 = vpop.eup %14834  ;;  %v10970_v54 = vmul.f32 %v14833_v18, %v10938_v5 }
0x25c5   :  { %v10969_v63 = vmul.f32 %v14835_v1, %v10937_v43 }
0x25c6   :  { %v10980_v3 = vmul.f32 %v11729_v27, %v10970_v54 }
0x25c7   :  { %v14837_v41 = vpop.eup %14836  ;;  %v10979_v13 = vmul.f32 %v11729_v27, %v10969_v63 }
0x25c8   :  { %v14839_v37 = vpop.eup %14838  ;;  %v10972_v55 = vmul.f32 %v14837_v41, %v10940_v47  ;;  %v10990_v35 = vadd.f32 %v11730_v36, %v10980_v3 }
0x25c9   :  { %v10971_v39 = vmul.f32 %v14839_v37, %v10939_v38  ;;  %v10989_v30 = vadd.f32 %v11730_v36, %v10979_v13 }
0x25ca   :  { %v10982_v52 = vmul.f32 %v11729_v27, %v10972_v55 }
0x25cb   :  { %v14487_v53 = vpack.c.bf16 %v10990_v35, %v10989_v30  ;;  %v10981_v10 = vmul.f32 %v11729_v27, %v10971_v39 }
0x25cc   :  { %v10992_v16 = vadd.f32 %v11730_v36, %v10982_v52 }
0x25cd   :  { %14488 = vmatpush3.bf16.msra.mxu1 %v14487_v53  ;;  %v10991_v26 = vadd.f32 %v11730_v36, %v10981_v10 }
0x25ce   :  { %14489 = vmatprep.subr.bf16.mxu1 %v14906_v46 }
0x25cf   :  { %v14490_v58 = vpack.c.bf16 %v10992_v16, %v10991_v26 }
0x25d1   :  { %14491 = vmatpush3.bf16.msra.mxu1 %v14490_v58 }
0x25d2   :  { %13694 = vmatprep.subr.mxu1 %v14908_v8 }
0x25d4   :  { %13692 = vmatmul.mubr.msk.f32.vlgmr.msra.gmra.mrb[130].mxu1 %vm141_vm0, %v10993_v15 }
0x25d5   :  { %13696 = vmatprep.mubr.msk.f32.mxu1 %vm14907_vm4, %v14908_v8 }
0x26a7   :  { %v11063_v40 = vpop.f32.mrb[130].mxu1 }
0x26a8   :  { %v13693_v4 = vpop.f32.mrb[131].mxu1  ;;  %13695 = vmatpush3.xpose.msk.msra.mxu1 %vm141_vm0, %v11063_v40 }
0x26ab   :  { %13697 = vmatmul.mubr.msk.f32.vlgmr.msra.gmra.mrb[132].mxu1 %vm141_vm0, %v15753_v42 }
0x277e   :  { %v11139_v46 = vpop.f32.mrb[132].mxu1 }
0x277f   :  { %v11143_v2 = vmul.f32 0.17677669, %v11139_v46  ;;  %v13698_v60 = vpop.f32.mrb[133].mxu1 }
0x2781   :  { %11145 = vst.msk [vmem:[#allocation2] sm:$0x3] %vm11144_vm5, %v11143_v2 }
0x2782   :  { %14861 = shalt.err (!%p14858_p4)
}
0x2783   :  { %s14862_s28 = scalar_lea.hbm %s15078_s12, 32 }
0x2784   :  { %p14863_p5 = scmp.ne.s32.totalorder %s15078_s12, %s14862_s28  ;;  %p14866_p6 = scmp.lt.u32.totalorder %s14862_s28, %s15078_s12 }
0x2786   :  { %p14868_p7 = pnand %p14866_p6, %p14863_p5 }
0x2788   :  { %14871 = shalt.err (!%p14868_p7)
}
0x2789   :  { %11155 = dma.vmem_to_hbm [thread:$0]  %s11153_s20, 32, %s15078_s12, [#allocation3]  }
0x278a   :  { %14872 = dma.done.wait [#allocation3], 32  }
0x278b   :  { %14873 = vsyncadd [#allocation3], 4294967264 }
0x278c   :  { %11159 = vsyncpa [#allocation3], 1 }

</bundles_post_ra>
